<compile_context>
chip_gen: v7x
topology: tpu7x:2x2x1
jax: 0.10.0
libtpu: 0.0.40
codegen_flags: <defaults>
</compile_context>

<pallas_src>
import math

import numpy as np
import jax
import jax.numpy as jnp
from jax.experimental import pallas as pl
from jax.experimental.pallas import tpu as pltpu


# ----------------------------------------------------------------------------
# Pallas kernels
# ----------------------------------------------------------------------------
def _conv_block_kernel(x_ref, L1_ref, b1_ref, RW1_ref, LH1_ref,
                       L2_ref, b2_ref, RW2_ref, LH2_ref, o_ref):
    """Per-image conv1+ReLU+pool1(+pad)+conv2+ReLU+pool2, all in VMEM / vregs.

    x_ref : (1, 32, 32)  zero-padded input image
    L1    : (5, 168, 32) banded conv1 weights   (rows = co*28+h)
    b1    : (168, 1)     conv1 bias broadcast column
    RW1   : (2, 28, 18)  pool1 even/odd column picks fused with +2 zero-pad
    LH1   : (2, 108, 168) pool1 even/odd row picks fused with +2 zero-pad (per channel block)
    L2    : (5, 224, 108) banded conv2 weights  (rows = co*14+h, cols = ci*18+h+i)
    b2    : (224, 1)     conv2 bias broadcast column
    RW2   : (2, 14, 7)   pool2 even/odd column picks
    LH2   : (2, 112, 224) pool2 even/odd row picks
    o_ref : (1, 112, 7)  pooled conv2 features, row index = c*7+h (matches torch .view order)
    """
    def mm(a, b):
        return jnp.dot(a, b, preferred_element_type=jnp.float32)

    xp = x_ref[0]                                   # (32, 32)

    # ---- conv1 (+bias, ReLU): 5 tap-column matmuls -> (6*28, 28) -------------
    acc1 = jnp.zeros((6 * 28, 28), jnp.float32)
    for j in range(5):
        acc1 = acc1 + mm(L1_ref[j], xp[:, j:j + 28])
    acc1 = jnp.maximum(acc1 + b1_ref[...], 0.0)

    # ---- pool1 (2x2/2) fused with zero-pad(2) for conv2 -> (6*18, 18) --------
    cw1 = jnp.maximum(mm(acc1, RW1_ref[0]), mm(acc1, RW1_ref[1]))
    p1 = jnp.maximum(mm(LH1_ref[0], cw1), mm(LH1_ref[1], cw1))

    # ---- conv2 (+bias, ReLU): 5 tap-column matmuls -> (16*14, 14) ------------
    acc2 = jnp.zeros((16 * 14, 14), jnp.float32)
    for j in range(5):
        acc2 = acc2 + mm(L2_ref[j], p1[:, j:j + 14])
    acc2 = jnp.maximum(acc2 + b2_ref[...], 0.0)

    # ---- pool2 (2x2/2) -> (16*7, 7) ------------------------------------------
    cw2 = jnp.maximum(mm(acc2, RW2_ref[0]), mm(acc2, RW2_ref[1]))
    p2 = jnp.maximum(mm(LH2_ref[0], cw2), mm(LH2_ref[1], cw2))

    o_ref[0] = p2


def _fc_chain_kernel(x_ref, w1_ref, b1_ref, w2_ref, b2_ref, w3_ref, b3_ref, o_ref):
    """fc1 -> ReLU -> fc2 -> ReLU -> fc3 chained; all out-features padded to 128 lanes."""
    def mm(a, b):
        return jnp.dot(a, b, preferred_element_type=jnp.float32)

    h = jnp.maximum(mm(x_ref[...], w1_ref[...]) + b1_ref[...], 0.0)
    h = jnp.maximum(mm(h, w2_ref[...]) + b2_ref[...], 0.0)
    o_ref[...] = mm(h, w3_ref[...]) + b3_ref[...]


# ----------------------------------------------------------------------------
# pallas_call wrappers
# ----------------------------------------------------------------------------
def conv_block(xp, prep):
    """xp: (B, 32, 32) padded images -> (B, 112, 7) pooled conv2 features."""
    (L1, b1col, RW1, LH1, L2, b2col, RW2, LH2) = prep[:8]
    B = xp.shape[0]

    flops = 2 * B * (5 * 168 * 32 * 28 + 2 * 168 * 28 * 18 + 2 * 108 * 168 * 18
                     + 5 * 224 * 108 * 14 + 2 * 224 * 14 * 7 + 2 * 112 * 224 * 7)
    bytes_acc = 4 * (B * 32 * 32 + L1.size + b1col.size + RW1.size + LH1.size
                     + L2.size + b2col.size + RW2.size + LH2.size + B * 112 * 7)

    return pl.pallas_call(
        _conv_block_kernel,
        out_shape=jax.ShapeDtypeStruct((B, 112, 7), jnp.float32),
        grid=(B,),
        in_specs=[
            pl.BlockSpec((1, 32, 32), lambda b: (b, 0, 0)),
            pl.BlockSpec(L1.shape, lambda b: (0, 0, 0)),
            pl.BlockSpec(b1col.shape, lambda b: (0, 0)),
            pl.BlockSpec(RW1.shape, lambda b: (0, 0, 0)),
            pl.BlockSpec(LH1.shape, lambda b: (0, 0, 0)),
            pl.BlockSpec(L2.shape, lambda b: (0, 0, 0)),
            pl.BlockSpec(b2col.shape, lambda b: (0, 0)),
            pl.BlockSpec(RW2.shape, lambda b: (0, 0, 0)),
            pl.BlockSpec(LH2.shape, lambda b: (0, 0, 0)),
        ],
        out_specs=pl.BlockSpec((1, 112, 7), lambda b: (b, 0, 0)),
        compiler_params=pltpu.CompilerParams(dimension_semantics=("parallel",)),
        cost_estimate=pl.CostEstimate(flops=flops, transcendentals=0,
                                      bytes_accessed=bytes_acc),
    )(xp, L1, b1col, RW1, LH1, L2, b2col, RW2, LH2)


def fc_chain(feats, prep):
    """feats: (B, 784) -> (B, 128) padded logits (first 10 columns are the real outputs)."""
    (wf1p, bf1p, wf2p, bf2p, wf3p, bf3p) = prep[8:]
    B, Kin = feats.shape
    NP = wf1p.shape[1]

    flops = 2 * B * (Kin * NP + NP * NP + NP * NP)
    bytes_acc = 4 * (feats.size + wf1p.size + bf1p.size + wf2p.size + bf2p.size
                     + wf3p.size + bf3p.size + B * NP)

    # Single whole-array VMEM block per operand: no grid machinery needed.
    return pl.pallas_call(
        _fc_chain_kernel,
        out_shape=jax.ShapeDtypeStruct((B, NP), jnp.float32),
        cost_estimate=pl.CostEstimate(flops=flops, transcendentals=0,
                                      bytes_accessed=bytes_acc),
    )(feats, wf1p, bf1p, wf2p, bf2p, wf3p, bf3p)


# ----------------------------------------------------------------------------
# One-time host-side weight preprocessing (zero per-call activation glue)
# ----------------------------------------------------------------------------
def prepare_params(params):
    (w1, b1, w2, b2, wf1, bf1, wf2, bf2, wf3, bf3) = [
        np.asarray(p, np.float32) for p in params]

    K = 5
    # conv1 banded left-matrices: acc1[co*28+h, w] += L1[j][co*28+h, hp] * xpad[hp, w+j]
    L1 = np.zeros((K, 6 * 28, 32), np.float32)
    h28 = np.arange(28)
    for j in range(K):
        for co in range(6):
            for i in range(K):
                L1[j, co * 28 + h28, h28 + i] = w1[co, 0, i, j]
    b1col = np.repeat(b1, 28).reshape(6 * 28, 1)

    # pool1 even/odd selections, fused with the zero-pad(2) the next conv needs.
    RW1 = np.zeros((2, 28, 18), np.float32)
    s14 = np.arange(14)
    RW1[0, 2 * s14, s14 + 2] = 1.0
    RW1[1, 2 * s14 + 1, s14 + 2] = 1.0
    LH1 = np.zeros((2, 6 * 18, 6 * 28), np.float32)
    for c in range(6):
        LH1[0, c * 18 + s14 + 2, c * 28 + 2 * s14] = 1.0
        LH1[1, c * 18 + s14 + 2, c * 28 + 2 * s14 + 1] = 1.0

    # conv2 banded left-matrices over the channel-stacked padded input (6*18, 18).
    L2 = np.zeros((K, 16 * 14, 6 * 18), np.float32)
    h14 = np.arange(14)
    for j in range(K):
        for co in range(16):
            for ci in range(6):
                for i in range(K):
                    L2[j, co * 14 + h14, ci * 18 + h14 + i] = w2[co, ci, i, j]
    b2col = np.repeat(b2, 14).reshape(16 * 14, 1)

    # pool2 even/odd selections (no pad needed afterwards).
    RW2 = np.zeros((2, 14, 7), np.float32)
    s7 = np.arange(7)
    RW2[0, 2 * s7, s7] = 1.0
    RW2[1, 2 * s7 + 1, s7] = 1.0
    LH2 = np.zeros((2, 16 * 7, 16 * 14), np.float32)
    for c in range(16):
        LH2[0, c * 7 + s7, c * 14 + 2 * s7] = 1.0
        LH2[1, c * 7 + s7, c * 14 + 2 * s7 + 1] = 1.0

    # FC weights transposed and zero-padded to 128 output lanes (lane-dense stores).
    NP = 128
    wf1p = np.zeros((16 * 7 * 7, NP), np.float32); wf1p[:, :120] = wf1.T
    bf1p = np.zeros((1, NP), np.float32);          bf1p[0, :120] = bf1
    wf2p = np.zeros((NP, NP), np.float32);         wf2p[:120, :84] = wf2.T
    bf2p = np.zeros((1, NP), np.float32);          bf2p[0, :84] = bf2
    wf3p = np.zeros((NP, NP), np.float32);         wf3p[:84, :10] = wf3.T
    bf3p = np.zeros((1, NP), np.float32);          bf3p[0, :10] = bf3

    arrs = (L1, b1col, RW1, LH1, L2, b2col, RW2, LH2,
            wf1p, bf1p, wf2p, bf2p, wf3p, bf3p)
    return tuple(jnp.asarray(a) for a in arrs)


# ----------------------------------------------------------------------------
# LeNet forward (matches the PyTorch module semantics)
# ----------------------------------------------------------------------------
def lenet_forward(x, prep):
    """x: (B, 1, 28, 28) f32 -> (B, 10) logits."""
    B = x.shape[0]
    assert x.shape[1:] == (1, 28, 28), "this LeNet variant requires 1x28x28 inputs"
    xp = jnp.pad(x[:, 0], ((0, 0), (2, 2), (2, 2)))   # (B, 32, 32): shared pad for conv1
    feats = conv_block(xp, prep)                      # (B, 112, 7): rows = c*7+h
    feats = feats.reshape(B, 16 * 7 * 7)              # row-major == torch .view order
    out = fc_chain(feats, prep)                       # (B, 128) lane-dense
    return out[:, :10]


def init_params(key):
    """Deterministic PyTorch-like U(-1/sqrt(fan_in), 1/sqrt(fan_in)) init."""
    def u(k, shape, fan_in):
        bound = 1.0 / math.sqrt(fan_in)
        return jax.random.uniform(k, shape, jnp.float32, -bound, bound)

    ks = jax.random.split(key, 10)
    w1 = u(ks[0], (6, 1, 5, 5), 1 * 25);   b1 = u(ks[1], (6,), 1 * 25)
    w2 = u(ks[2], (16, 6, 5, 5), 6 * 25);  b2 = u(ks[3], (16,), 6 * 25)
    wf1 = u(ks[4], (120, 16 * 7 * 7), 16 * 7 * 7); bf1 = u(ks[5], (120,), 16 * 7 * 7)
    wf2 = u(ks[6], (84, 120), 120);        bf2 = u(ks[7], (84,), 120)
    wf3 = u(ks[8], (10, 84), 84);          bf3 = u(ks[9], (10,), 84)
    return (w1, b1, w2, b2, wf1, bf1, wf2, bf2, wf3, bf3)


def lenet_reference(x, params):
    """Pure-JAX (XLA) reference mirroring the PyTorch forward."""
    (w1, b1, w2, b2, wf1, bf1, wf2, bf2, wf3, bf3) = params
    dn = ("NCHW", "OIHW", "NCHW")
    y = jax.lax.conv_general_dilated(x, w1, (1, 1), ((2, 2), (2, 2)),
                                     dimension_numbers=dn) + b1[None, :, None, None]
    y = jnp.maximum(y, 0.0)
    y = jax.lax.reduce_window(y, -jnp.inf, jax.lax.max,
                              (1, 1, 2, 2), (1, 1, 2, 2), "VALID")
    y = jax.lax.conv_general_dilated(y, w2, (1, 1), ((2, 2), (2, 2)),
                                     dimension_numbers=dn) + b2[None, :, None, None]
    y = jnp.maximum(y, 0.0)
    y = jax.lax.reduce_window(y, -jnp.inf, jax.lax.max,
                              (1, 1, 2, 2), (1, 1, 2, 2), "VALID")
    y = y.reshape(x.shape[0], -1)
    y = jnp.maximum(y @ wf1.T + bf1, 0.0)
    y = jnp.maximum(y @ wf2.T + bf2, 0.0)
    return y @ wf3.T + bf3


if __name__ == "__main__":
    key = jax.random.PRNGKey(0)
    pkey, xkey = jax.random.split(key)
    params = init_params(pkey)
    prep = prepare_params(params)          # one-time weight preprocessing (host-side)

    # conv1(pad=2) keeps 28 -> pool 14 -> conv2(pad=2) keeps 14 -> pool 7 -> 16*7*7 = fc1 in.
    x = jax.random.normal(xkey, (2, 1, 28, 28), jnp.float32)

    fwd = jax.jit(lenet_forward)
    out = jax.block_until_ready(fwd(x, prep))
    assert out.shape == (2, 10) and out.dtype == jnp.float32

    ref = jax.block_until_ready(lenet_reference(x, params))
    assert jnp.allclose(out, ref, rtol=5e-2, atol=5e-2), (
        "mismatch vs reference, max abs diff = "
        f"{float(jnp.max(jnp.abs(out - ref)))}")

    print("KERNEL_OK")
</pallas_src>

<mosaic_0001>
module attributes {stable_mosaic.version = 11 : i64} {
  func.func @_conv_block_kernel(%arg0: i32, %arg1: memref<1x32x32xf32, #tpu.memory_space<vmem>>, %arg2: memref<5x168x32xf32, #tpu.memory_space<vmem>>, %arg3: memref<168x1xf32, #tpu.memory_space<vmem>>, %arg4: memref<2x28x18xf32, #tpu.memory_space<vmem>>, %arg5: memref<2x108x168xf32, #tpu.memory_space<vmem>>, %arg6: memref<5x224x108xf32, #tpu.memory_space<vmem>>, %arg7: memref<224x1xf32, #tpu.memory_space<vmem>>, %arg8: memref<2x14x7xf32, #tpu.memory_space<vmem>>, %arg9: memref<2x112x224xf32, #tpu.memory_space<vmem>>, %arg10: memref<1x112x7xf32, #tpu.memory_space<vmem>>) attributes {dimension_semantics = [#tpu.dimension_semantics<parallel>], iteration_bounds = array<i64: 2>, scalar_prefetch = 0 : i64, scratch_operands = 0 : i64, tpu.core_type = #tpu.core_type<tc>, window_params = [{transform_indices = @transform_0, window_bounds = array<i64: 1, 32, 32>}, {pipeline_mode = #tpu.pipeline_mode<synchronous>, transform_indices = @transform_1, window_bounds = array<i64: 5, 168, 32>}, {pipeline_mode = #tpu.pipeline_mode<synchronous>, transform_indices = @transform_2, window_bounds = array<i64: 168, 1>}, {pipeline_mode = #tpu.pipeline_mode<synchronous>, transform_indices = @transform_3, window_bounds = array<i64: 2, 28, 18>}, {pipeline_mode = #tpu.pipeline_mode<synchronous>, transform_indices = @transform_4, window_bounds = array<i64: 2, 108, 168>}, {pipeline_mode = #tpu.pipeline_mode<synchronous>, transform_indices = @transform_5, window_bounds = array<i64: 5, 224, 108>}, {pipeline_mode = #tpu.pipeline_mode<synchronous>, transform_indices = @transform_6, window_bounds = array<i64: 224, 1>}, {pipeline_mode = #tpu.pipeline_mode<synchronous>, transform_indices = @transform_7, window_bounds = array<i64: 2, 14, 7>}, {pipeline_mode = #tpu.pipeline_mode<synchronous>, transform_indices = @transform_8, window_bounds = array<i64: 2, 112, 224>}, {transform_indices = @transform_9, window_bounds = array<i64: 1, 112, 7>}]} {
    %c0 = arith.constant 0 : index
    %c0_0 = arith.constant 0 : index
    %c0_1 = arith.constant 0 : index
    %0 = vector.load %arg1[%c0, %c0_0, %c0_1] : memref<1x32x32xf32, #tpu.memory_space<vmem>>, vector<1x32x32xf32>
    %1 = vector.shape_cast %0 : vector<1x32x32xf32> to vector<32x32xf32>
    %cst = arith.constant 0.000000e+00 : f32
    %2 = vector.broadcast %cst : f32 to vector<168x28xf32>
    %c0_2 = arith.constant 0 : index
    %c0_3 = arith.constant 0 : index
    %c0_4 = arith.constant 0 : index
    %3 = vector.load %arg2[%c0_2, %c0_3, %c0_4] : memref<5x168x32xf32, #tpu.memory_space<vmem>>, vector<1x168x32xf32>
    %4 = vector.shape_cast %3 : vector<1x168x32xf32> to vector<168x32xf32>
    %5 = vector.extract_strided_slice %1 {offsets = [0, 0], sizes = [32, 28], strides = [1, 1]} : vector<32x32xf32> to vector<32x28xf32>
    %cst_5 = arith.constant dense<0.000000e+00> : vector<168x28xf32>
    %6 = tpu.matmul %4, %5, %cst_5 {dimension_numbers = #tpu.dot_dimension_numbers<[1], [0], [0], [1], [0, 0, 1, 1], [], []>} : vector<168x32xf32>, vector<32x28xf32>, vector<168x28xf32> -> vector<168x28xf32>
    %7 = arith.addf %2, %6 : vector<168x28xf32>
    %c1 = arith.constant 1 : index
    %c0_6 = arith.constant 0 : index
    %c0_7 = arith.constant 0 : index
    %8 = vector.load %arg2[%c1, %c0_6, %c0_7] : memref<5x168x32xf32, #tpu.memory_space<vmem>>, vector<1x168x32xf32>
    %9 = vector.shape_cast %8 : vector<1x168x32xf32> to vector<168x32xf32>
    %10 = vector.extract_strided_slice %1 {offsets = [0, 1], sizes = [32, 28], strides = [1, 1]} : vector<32x32xf32> to vector<32x28xf32>
    %cst_8 = arith.constant dense<0.000000e+00> : vector<168x28xf32>
    %11 = tpu.matmul %9, %10, %cst_8 {dimension_numbers = #tpu.dot_dimension_numbers<[1], [0], [0], [1], [0, 0, 1, 1], [], []>} : vector<168x32xf32>, vector<32x28xf32>, vector<168x28xf32> -> vector<168x28xf32>
    %12 = arith.addf %7, %11 : vector<168x28xf32>
    %c2 = arith.constant 2 : index
    %c0_9 = arith.constant 0 : index
    %c0_10 = arith.constant 0 : index
    %13 = vector.load %arg2[%c2, %c0_9, %c0_10] : memref<5x168x32xf32, #tpu.memory_space<vmem>>, vector<1x168x32xf32>
    %14 = vector.shape_cast %13 : vector<1x168x32xf32> to vector<168x32xf32>
    %15 = vector.extract_strided_slice %1 {offsets = [0, 2], sizes = [32, 28], strides = [1, 1]} : vector<32x32xf32> to vector<32x28xf32>
    %cst_11 = arith.constant dense<0.000000e+00> : vector<168x28xf32>
    %16 = tpu.matmul %14, %15, %cst_11 {dimension_numbers = #tpu.dot_dimension_numbers<[1], [0], [0], [1], [0, 0, 1, 1], [], []>} : vector<168x32xf32>, vector<32x28xf32>, vector<168x28xf32> -> vector<168x28xf32>
    %17 = arith.addf %12, %16 : vector<168x28xf32>
    %c3 = arith.constant 3 : index
    %c0_12 = arith.constant 0 : index
    %c0_13 = arith.constant 0 : index
    %18 = vector.load %arg2[%c3, %c0_12, %c0_13] : memref<5x168x32xf32, #tpu.memory_space<vmem>>, vector<1x168x32xf32>
    %19 = vector.shape_cast %18 : vector<1x168x32xf32> to vector<168x32xf32>
    %20 = vector.extract_strided_slice %1 {offsets = [0, 3], sizes = [32, 28], strides = [1, 1]} : vector<32x32xf32> to vector<32x28xf32>
    %cst_14 = arith.constant dense<0.000000e+00> : vector<168x28xf32>
    %21 = tpu.matmul %19, %20, %cst_14 {dimension_numbers = #tpu.dot_dimension_numbers<[1], [0], [0], [1], [0, 0, 1, 1], [], []>} : vector<168x32xf32>, vector<32x28xf32>, vector<168x28xf32> -> vector<168x28xf32>
    %22 = arith.addf %17, %21 : vector<168x28xf32>
    %c4 = arith.constant 4 : index
    %c0_15 = arith.constant 0 : index
    %c0_16 = arith.constant 0 : index
    %23 = vector.load %arg2[%c4, %c0_15, %c0_16] : memref<5x168x32xf32, #tpu.memory_space<vmem>>, vector<1x168x32xf32>
    %24 = vector.shape_cast %23 : vector<1x168x32xf32> to vector<168x32xf32>
    %25 = vector.extract_strided_slice %1 {offsets = [0, 4], sizes = [32, 28], strides = [1, 1]} : vector<32x32xf32> to vector<32x28xf32>
    %cst_17 = arith.constant dense<0.000000e+00> : vector<168x28xf32>
    %26 = tpu.matmul %24, %25, %cst_17 {dimension_numbers = #tpu.dot_dimension_numbers<[1], [0], [0], [1], [0, 0, 1, 1], [], []>} : vector<168x32xf32>, vector<32x28xf32>, vector<168x28xf32> -> vector<168x28xf32>
    %27 = arith.addf %22, %26 : vector<168x28xf32>
    %c0_18 = arith.constant 0 : index
    %c0_19 = arith.constant 0 : index
    %28 = vector.load %arg3[%c0_18, %c0_19] : memref<168x1xf32, #tpu.memory_space<vmem>>, vector<168x1xf32>
    %29 = vector.broadcast %28 : vector<168x1xf32> to vector<168x28xf32>
    %30 = arith.addf %27, %29 : vector<168x28xf32>
    %cst_20 = arith.constant 0.000000e+00 : f32
    %31 = vector.broadcast %cst_20 : f32 to vector<168x28xf32>
    %32 = arith.maximumf %30, %31 : vector<168x28xf32>
    %c0_21 = arith.constant 0 : index
    %c0_22 = arith.constant 0 : index
    %c0_23 = arith.constant 0 : index
    %33 = vector.load %arg4[%c0_21, %c0_22, %c0_23] : memref<2x28x18xf32, #tpu.memory_space<vmem>>, vector<1x28x18xf32>
    %34 = vector.shape_cast %33 : vector<1x28x18xf32> to vector<28x18xf32>
    %cst_24 = arith.constant dense<0.000000e+00> : vector<168x18xf32>
    %35 = tpu.matmul %32, %34, %cst_24 {dimension_numbers = #tpu.dot_dimension_numbers<[1], [0], [0], [1], [0, 0, 1, 1], [], []>} : vector<168x28xf32>, vector<28x18xf32>, vector<168x18xf32> -> vector<168x18xf32>
    %c1_25 = arith.constant 1 : index
    %c0_26 = arith.constant 0 : index
    %c0_27 = arith.constant 0 : index
    %36 = vector.load %arg4[%c1_25, %c0_26, %c0_27] : memref<2x28x18xf32, #tpu.memory_space<vmem>>, vector<1x28x18xf32>
    %37 = vector.shape_cast %36 : vector<1x28x18xf32> to vector<28x18xf32>
    %cst_28 = arith.constant dense<0.000000e+00> : vector<168x18xf32>
    %38 = tpu.matmul %32, %37, %cst_28 {dimension_numbers = #tpu.dot_dimension_numbers<[1], [0], [0], [1], [0, 0, 1, 1], [], []>} : vector<168x28xf32>, vector<28x18xf32>, vector<168x18xf32> -> vector<168x18xf32>
    %39 = arith.maximumf %35, %38 : vector<168x18xf32>
    %c0_29 = arith.constant 0 : index
    %c0_30 = arith.constant 0 : index
    %c0_31 = arith.constant 0 : index
    %40 = vector.load %arg5[%c0_29, %c0_30, %c0_31] : memref<2x108x168xf32, #tpu.memory_space<vmem>>, vector<1x108x168xf32>
    %41 = vector.shape_cast %40 : vector<1x108x168xf32> to vector<108x168xf32>
    %cst_32 = arith.constant dense<0.000000e+00> : vector<108x18xf32>
    %42 = tpu.matmul %41, %39, %cst_32 {dimension_numbers = #tpu.dot_dimension_numbers<[1], [0], [0], [1], [0, 0, 1, 1], [], []>} : vector<108x168xf32>, vector<168x18xf32>, vector<108x18xf32> -> vector<108x18xf32>
    %c1_33 = arith.constant 1 : index
    %c0_34 = arith.constant 0 : index
    %c0_35 = arith.constant 0 : index
    %43 = vector.load %arg5[%c1_33, %c0_34, %c0_35] : memref<2x108x168xf32, #tpu.memory_space<vmem>>, vector<1x108x168xf32>
    %44 = vector.shape_cast %43 : vector<1x108x168xf32> to vector<108x168xf32>
    %cst_36 = arith.constant dense<0.000000e+00> : vector<108x18xf32>
    %45 = tpu.matmul %44, %39, %cst_36 {dimension_numbers = #tpu.dot_dimension_numbers<[1], [0], [0], [1], [0, 0, 1, 1], [], []>} : vector<108x168xf32>, vector<168x18xf32>, vector<108x18xf32> -> vector<108x18xf32>
    %46 = arith.maximumf %42, %45 : vector<108x18xf32>
    %cst_37 = arith.constant 0.000000e+00 : f32
    %47 = vector.broadcast %cst_37 : f32 to vector<224x14xf32>
    %c0_38 = arith.constant 0 : index
    %c0_39 = arith.constant 0 : index
    %c0_40 = arith.constant 0 : index
    %48 = vector.load %arg6[%c0_38, %c0_39, %c0_40] : memref<5x224x108xf32, #tpu.memory_space<vmem>>, vector<1x224x108xf32>
    %49 = vector.shape_cast %48 : vector<1x224x108xf32> to vector<224x108xf32>
    %50 = vector.extract_strided_slice %46 {offsets = [0, 0], sizes = [108, 14], strides = [1, 1]} : vector<108x18xf32> to vector<108x14xf32>
    %cst_41 = arith.constant dense<0.000000e+00> : vector<224x14xf32>
    %51 = tpu.matmul %49, %50, %cst_41 {dimension_numbers = #tpu.dot_dimension_numbers<[1], [0], [0], [1], [0, 0, 1, 1], [], []>} : vector<224x108xf32>, vector<108x14xf32>, vector<224x14xf32> -> vector<224x14xf32>
    %52 = arith.addf %47, %51 : vector<224x14xf32>
    %c1_42 = arith.constant 1 : index
    %c0_43 = arith.constant 0 : index
    %c0_44 = arith.constant 0 : index
    %53 = vector.load %arg6[%c1_42, %c0_43, %c0_44] : memref<5x224x108xf32, #tpu.memory_space<vmem>>, vector<1x224x108xf32>
    %54 = vector.shape_cast %53 : vector<1x224x108xf32> to vector<224x108xf32>
    %55 = vector.extract_strided_slice %46 {offsets = [0, 1], sizes = [108, 14], strides = [1, 1]} : vector<108x18xf32> to vector<108x14xf32>
    %cst_45 = arith.constant dense<0.000000e+00> : vector<224x14xf32>
    %56 = tpu.matmul %54, %55, %cst_45 {dimension_numbers = #tpu.dot_dimension_numbers<[1], [0], [0], [1], [0, 0, 1, 1], [], []>} : vector<224x108xf32>, vector<108x14xf32>, vector<224x14xf32> -> vector<224x14xf32>
    %57 = arith.addf %52, %56 : vector<224x14xf32>
    %c2_46 = arith.constant 2 : index
    %c0_47 = arith.constant 0 : index
    %c0_48 = arith.constant 0 : index
    %58 = vector.load %arg6[%c2_46, %c0_47, %c0_48] : memref<5x224x108xf32, #tpu.memory_space<vmem>>, vector<1x224x108xf32>
    %59 = vector.shape_cast %58 : vector<1x224x108xf32> to vector<224x108xf32>
    %60 = vector.extract_strided_slice %46 {offsets = [0, 2], sizes = [108, 14], strides = [1, 1]} : vector<108x18xf32> to vector<108x14xf32>
    %cst_49 = arith.constant dense<0.000000e+00> : vector<224x14xf32>
    %61 = tpu.matmul %59, %60, %cst_49 {dimension_numbers = #tpu.dot_dimension_numbers<[1], [0], [0], [1], [0, 0, 1, 1], [], []>} : vector<224x108xf32>, vector<108x14xf32>, vector<224x14xf32> -> vector<224x14xf32>
    %62 = arith.addf %57, %61 : vector<224x14xf32>
    %c3_50 = arith.constant 3 : index
    %c0_51 = arith.constant 0 : index
    %c0_52 = arith.constant 0 : index
    %63 = vector.load %arg6[%c3_50, %c0_51, %c0_52] : memref<5x224x108xf32, #tpu.memory_space<vmem>>, vector<1x224x108xf32>
    %64 = vector.shape_cast %63 : vector<1x224x108xf32> to vector<224x108xf32>
    %65 = vector.extract_strided_slice %46 {offsets = [0, 3], sizes = [108, 14], strides = [1, 1]} : vector<108x18xf32> to vector<108x14xf32>
    %cst_53 = arith.constant dense<0.000000e+00> : vector<224x14xf32>
    %66 = tpu.matmul %64, %65, %cst_53 {dimension_numbers = #tpu.dot_dimension_numbers<[1], [0], [0], [1], [0, 0, 1, 1], [], []>} : vector<224x108xf32>, vector<108x14xf32>, vector<224x14xf32> -> vector<224x14xf32>
    %67 = arith.addf %62, %66 : vector<224x14xf32>
    %c4_54 = arith.constant 4 : index
    %c0_55 = arith.constant 0 : index
    %c0_56 = arith.constant 0 : index
    %68 = vector.load %arg6[%c4_54, %c0_55, %c0_56] : memref<5x224x108xf32, #tpu.memory_space<vmem>>, vector<1x224x108xf32>
    %69 = vector.shape_cast %68 : vector<1x224x108xf32> to vector<224x108xf32>
    %70 = vector.extract_strided_slice %46 {offsets = [0, 4], sizes = [108, 14], strides = [1, 1]} : vector<108x18xf32> to vector<108x14xf32>
    %cst_57 = arith.constant dense<0.000000e+00> : vector<224x14xf32>
    %71 = tpu.matmul %69, %70, %cst_57 {dimension_numbers = #tpu.dot_dimension_numbers<[1], [0], [0], [1], [0, 0, 1, 1], [], []>} : vector<224x108xf32>, vector<108x14xf32>, vector<224x14xf32> -> vector<224x14xf32>
    %72 = arith.addf %67, %71 : vector<224x14xf32>
    %c0_58 = arith.constant 0 : index
    %c0_59 = arith.constant 0 : index
    %73 = vector.load %arg7[%c0_58, %c0_59] : memref<224x1xf32, #tpu.memory_space<vmem>>, vector<224x1xf32>
    %74 = vector.broadcast %73 : vector<224x1xf32> to vector<224x14xf32>
    %75 = arith.addf %72, %74 : vector<224x14xf32>
    %cst_60 = arith.constant 0.000000e+00 : f32
    %76 = vector.broadcast %cst_60 : f32 to vector<224x14xf32>
    %77 = arith.maximumf %75, %76 : vector<224x14xf32>
    %c0_61 = arith.constant 0 : index
    %c0_62 = arith.constant 0 : index
    %c0_63 = arith.constant 0 : index
    %78 = vector.load %arg8[%c0_61, %c0_62, %c0_63] : memref<2x14x7xf32, #tpu.memory_space<vmem>>, vector<1x14x7xf32>
    %79 = vector.shape_cast %78 : vector<1x14x7xf32> to vector<14x7xf32>
    %cst_64 = arith.constant dense<0.000000e+00> : vector<224x7xf32>
    %80 = tpu.matmul %77, %79, %cst_64 {dimension_numbers = #tpu.dot_dimension_numbers<[1], [0], [0], [1], [0, 0, 1, 1], [], []>} : vector<224x14xf32>, vector<14x7xf32>, vector<224x7xf32> -> vector<224x7xf32>
    %c1_65 = arith.constant 1 : index
    %c0_66 = arith.constant 0 : index
    %c0_67 = arith.constant 0 : index
    %81 = vector.load %arg8[%c1_65, %c0_66, %c0_67] : memref<2x14x7xf32, #tpu.memory_space<vmem>>, vector<1x14x7xf32>
    %82 = vector.shape_cast %81 : vector<1x14x7xf32> to vector<14x7xf32>
    %cst_68 = arith.constant dense<0.000000e+00> : vector<224x7xf32>
    %83 = tpu.matmul %77, %82, %cst_68 {dimension_numbers = #tpu.dot_dimension_numbers<[1], [0], [0], [1], [0, 0, 1, 1], [], []>} : vector<224x14xf32>, vector<14x7xf32>, vector<224x7xf32> -> vector<224x7xf32>
    %84 = arith.maximumf %80, %83 : vector<224x7xf32>
    %c0_69 = arith.constant 0 : index
    %c0_70 = arith.constant 0 : index
    %c0_71 = arith.constant 0 : index
    %85 = vector.load %arg9[%c0_69, %c0_70, %c0_71] : memref<2x112x224xf32, #tpu.memory_space<vmem>>, vector<1x112x224xf32>
    %86 = vector.shape_cast %85 : vector<1x112x224xf32> to vector<112x224xf32>
    %cst_72 = arith.constant dense<0.000000e+00> : vector<112x7xf32>
    %87 = tpu.matmul %86, %84, %cst_72 {dimension_numbers = #tpu.dot_dimension_numbers<[1], [0], [0], [1], [0, 0, 1, 1], [], []>} : vector<112x224xf32>, vector<224x7xf32>, vector<112x7xf32> -> vector<112x7xf32>
    %c1_73 = arith.constant 1 : index
    %c0_74 = arith.constant 0 : index
    %c0_75 = arith.constant 0 : index
    %88 = vector.load %arg9[%c1_73, %c0_74, %c0_75] : memref<2x112x224xf32, #tpu.memory_space<vmem>>, vector<1x112x224xf32>
    %89 = vector.shape_cast %88 : vector<1x112x224xf32> to vector<112x224xf32>
    %cst_76 = arith.constant dense<0.000000e+00> : vector<112x7xf32>
    %90 = tpu.matmul %89, %84, %cst_76 {dimension_numbers = #tpu.dot_dimension_numbers<[1], [0], [0], [1], [0, 0, 1, 1], [], []>} : vector<112x224xf32>, vector<224x7xf32>, vector<112x7xf32> -> vector<112x7xf32>
    %91 = arith.maximumf %87, %90 : vector<112x7xf32>
    %c0_77 = arith.constant 0 : index
    %c0_78 = arith.constant 0 : index
    %c0_79 = arith.constant 0 : index
    %92 = vector.load %arg10[%c0_77, %c0_78, %c0_79] : memref<1x112x7xf32, #tpu.memory_space<vmem>>, vector<1x112x7xf32>
    %93 = vector.shape_cast %92 : vector<1x112x7xf32> to vector<112x7xf32>
    %94 = vector.shape_cast %91 : vector<112x7xf32> to vector<1x112x7xf32>
    tpu.vector_store %arg10[%c0_77, %c0_78, %c0_79], %94 {strides = array<i32>} : memref<1x112x7xf32, #tpu.memory_space<vmem>>, vector<1x112x7xf32>,
    return
  }
  func.func @transform_0(%arg0: i32) -> (i32, i32, i32) {
    %c0_i32 = arith.constant 0 : i32
    %c0_i32_0 = arith.constant 0 : i32
    %c0_i32_1 = arith.constant 0 : i32
    return %arg0, %c0_i32, %c0_i32_0 : i32, i32, i32
  }
  func.func @transform_1(%arg0: i32) -> (i32, i32, i32) {
    %c0_i32 = arith.constant 0 : i32
    %c0_i32_0 = arith.constant 0 : i32
    %c0_i32_1 = arith.constant 0 : i32
    %c0_i32_2 = arith.constant 0 : i32
    return %c0_i32, %c0_i32_0, %c0_i32_1 : i32, i32, i32
  }
  func.func @transform_2(%arg0: i32) -> (i32, i32) {
    %c0_i32 = arith.constant 0 : i32
    %c0_i32_0 = arith.constant 0 : i32
    %c0_i32_1 = arith.constant 0 : i32
    return %c0_i32, %c0_i32_0 : i32, i32
  }
  func.func @transform_3(%arg0: i32) -> (i32, i32, i32) {
    %c0_i32 = arith.constant 0 : i32
    %c0_i32_0 = arith.constant 0 : i32
    %c0_i32_1 = arith.constant 0 : i32
    %c0_i32_2 = arith.constant 0 : i32
    return %c0_i32, %c0_i32_0, %c0_i32_1 : i32, i32, i32
  }
  func.func @transform_4(%arg0: i32) -> (i32, i32, i32) {
    %c0_i32 = arith.constant 0 : i32
    %c0_i32_0 = arith.constant 0 : i32
    %c0_i32_1 = arith.constant 0 : i32
    %c0_i32_2 = arith.constant 0 : i32
    return %c0_i32, %c0_i32_0, %c0_i32_1 : i32, i32, i32
  }
  func.func @transform_5(%arg0: i32) -> (i32, i32, i32) {
    %c0_i32 = arith.constant 0 : i32
    %c0_i32_0 = arith.constant 0 : i32
    %c0_i32_1 = arith.constant 0 : i32
    %c0_i32_2 = arith.constant 0 : i32
    return %c0_i32, %c0_i32_0, %c0_i32_1 : i32, i32, i32
  }
  func.func @transform_6(%arg0: i32) -> (i32, i32) {
    %c0_i32 = arith.constant 0 : i32
    %c0_i32_0 = arith.constant 0 : i32
    %c0_i32_1 = arith.constant 0 : i32
    return %c0_i32, %c0_i32_0 : i32, i32
  }
  func.func @transform_7(%arg0: i32) -> (i32, i32, i32) {
    %c0_i32 = arith.constant 0 : i32
    %c0_i32_0 = arith.constant 0 : i32
    %c0_i32_1 = arith.constant 0 : i32
    %c0_i32_2 = arith.constant 0 : i32
    return %c0_i32, %c0_i32_0, %c0_i32_1 : i32, i32, i32
  }
  func.func @transform_8(%arg0: i32) -> (i32, i32, i32) {
    %c0_i32 = arith.constant 0 : i32
    %c0_i32_0 = arith.constant 0 : i32
    %c0_i32_1 = arith.constant 0 : i32
    %c0_i32_2 = arith.constant 0 : i32
    return %c0_i32, %c0_i32_0, %c0_i32_1 : i32, i32, i32
  }
  func.func @transform_9(%arg0: i32) -> (i32, i32, i32) {
    %c0_i32 = arith.constant 0 : i32
    %c0_i32_0 = arith.constant 0 : i32
    %c0_i32_1 = arith.constant 0 : i32
    return %arg0, %c0_i32, %c0_i32_0 : i32, i32, i32
  }
}

module attributes {stable_mosaic.version = 11 : i64} {
  func.func @_fc_chain_kernel(%arg0: memref<2x784xf32, #tpu.memory_space<vmem>>, %arg1: memref<784x128xf32, #tpu.memory_space<vmem>>, %arg2: memref<1x128xf32, #tpu.memory_space<vmem>>, %arg3: memref<128x128xf32, #tpu.memory_space<vmem>>, %arg4: memref<1x128xf32, #tpu.memory_space<vmem>>, %arg5: memref<128x128xf32, #tpu.memory_space<vmem>>, %arg6: memref<1x128xf32, #tpu.memory_space<vmem>>, %arg7: memref<2x128xf32, #tpu.memory_space<vmem>>) attributes {dimension_semantics = [], scalar_prefetch = 0 : i64, scratch_operands = 0 : i64, tpu.core_type = #tpu.core_type<tc>} {
    %c0 = arith.constant 0 : index
    %c0_0 = arith.constant 0 : index
    %0 = vector.load %arg0[%c0, %c0_0] : memref<2x784xf32, #tpu.memory_space<vmem>>, vector<2x784xf32>
    %c0_1 = arith.constant 0 : index
    %c0_2 = arith.constant 0 : index
    %1 = vector.load %arg1[%c0_1, %c0_2] : memref<784x128xf32, #tpu.memory_space<vmem>>, vector<784x128xf32>
    %cst = arith.constant dense<0.000000e+00> : vector<2x128xf32>
    %2 = tpu.matmul %0, %1, %cst {dimension_numbers = #tpu.dot_dimension_numbers<[1], [0], [0], [1], [0, 0, 1, 1], [], []>} : vector<2x784xf32>, vector<784x128xf32>, vector<2x128xf32> -> vector<2x128xf32>
    %c0_3 = arith.constant 0 : index
    %c0_4 = arith.constant 0 : index
    %3 = vector.load %arg2[%c0_3, %c0_4] : memref<1x128xf32, #tpu.memory_space<vmem>>, vector<1x128xf32>
    %4 = vector.broadcast %3 : vector<1x128xf32> to vector<2x128xf32>
    %5 = arith.addf %2, %4 : vector<2x128xf32>
    %cst_5 = arith.constant 0.000000e+00 : f32
    %6 = vector.broadcast %cst_5 : f32 to vector<2x128xf32>
    %7 = arith.maximumf %5, %6 : vector<2x128xf32>
    %c0_6 = arith.constant 0 : index
    %c0_7 = arith.constant 0 : index
    %8 = vector.load %arg3[%c0_6, %c0_7] : memref<128x128xf32, #tpu.memory_space<vmem>>, vector<128x128xf32>
    %cst_8 = arith.constant dense<0.000000e+00> : vector<2x128xf32>
    %9 = tpu.matmul %7, %8, %cst_8 {dimension_numbers = #tpu.dot_dimension_numbers<[1], [0], [0], [1], [0, 0, 1, 1], [], []>} : vector<2x128xf32>, vector<128x128xf32>, vector<2x128xf32> -> vector<2x128xf32>
    %c0_9 = arith.constant 0 : index
    %c0_10 = arith.constant 0 : index
    %10 = vector.load %arg4[%c0_9, %c0_10] : memref<1x128xf32, #tpu.memory_space<vmem>>, vector<1x128xf32>
    %11 = vector.broadcast %10 : vector<1x128xf32> to vector<2x128xf32>
    %12 = arith.addf %9, %11 : vector<2x128xf32>
    %cst_11 = arith.constant 0.000000e+00 : f32
    %13 = vector.broadcast %cst_11 : f32 to vector<2x128xf32>
    %14 = arith.maximumf %12, %13 : vector<2x128xf32>
    %c0_12 = arith.constant 0 : index
    %c0_13 = arith.constant 0 : index
    %15 = vector.load %arg5[%c0_12, %c0_13] : memref<128x128xf32, #tpu.memory_space<vmem>>, vector<128x128xf32>
    %cst_14 = arith.constant dense<0.000000e+00> : vector<2x128xf32>
    %16 = tpu.matmul %14, %15, %cst_14 {dimension_numbers = #tpu.dot_dimension_numbers<[1], [0], [0], [1], [0, 0, 1, 1], [], []>} : vector<2x128xf32>, vector<128x128xf32>, vector<2x128xf32> -> vector<2x128xf32>
    %c0_15 = arith.constant 0 : index
    %c0_16 = arith.constant 0 : index
    %17 = vector.load %arg6[%c0_15, %c0_16] : memref<1x128xf32, #tpu.memory_space<vmem>>, vector<1x128xf32>
    %18 = vector.broadcast %17 : vector<1x128xf32> to vector<2x128xf32>
    %19 = arith.addf %16, %18 : vector<2x128xf32>
    %c0_17 = arith.constant 0 : index
    %c0_18 = arith.constant 0 : index
    %20 = vector.load %arg7[%c0_17, %c0_18] : memref<2x128xf32, #tpu.memory_space<vmem>>, vector<2x128xf32>
    tpu.vector_store %arg7[%c0_17, %c0_18], %19 {strides = array<i32>} : memref<2x128xf32, #tpu.memory_space<vmem>>, vector<2x128xf32>,
    return
  }
}

</mosaic_0001>

<bundles_post_ra>
// kernel: lenet_forward.3
= control target key start
LH: loop header
LB: loop body
LE: loop exit
PB: predicated region body
PF: predicated region fallthrough
CT: control target
= control target key end

     0   :  { %v1062_v43 = vmov 1983009808   ;;  %v140_v45 = vlaneseq  ;;  %s1555_s0 = inlined_call_operand.vmem [shape: f32[2,784], index: 0, kind: input, shape index: {}]   ;;  %s1556_s1 = inlined_call_operand.vmem [shape: f32[784,128], index: 1, kind: input, shape index: {}]   ;;  %s1557_s2 = inlined_call_operand.vmem [shape: f32[1,128], index: 2, kind: input, shape index: {}]   ;;  %s1558_s3 = inlined_call_operand.vmem [shape: f32[128,128], index: 3, kind: input, shape index: {}]   ;;  %s1559_s4 = inlined_call_operand.vmem [shape: f32[1,128], index: 4, kind: input, shape index: {}]   ;;  %s1560_s5 = inlined_call_operand.vmem [shape: f32[128,128], index: 5, kind: input, shape index: {}]   ;;  %s1561_s6 = inlined_call_operand.vmem [shape: f32[1,128], index: 6, kind: input, shape index: {}]   ;;  %s1562_s7 = inlined_call_operand.hbm [shape: f32[2,128], index: 7, kind: output, shape index: {}]  }
   0x1   :  { %v45_v0 = vld [vmem:[%s1556_s1 + $0x80] sm:$0xff]  ;;  %v46_v1 = vld [vmem:[%s1556_s1 + $0x88] sm:$0xff]  ;;  %v47_v11 = vld [vmem:[%s1556_s1 + $0x90] sm:$0xff]  ;;  %v138_v44 = vunpack.c.l.s4 %v1062_v43 }
   0x2   :  { %v29_v2 = vld [vmem:[%s1556_s1] sm:$0xff]  ;;  %v884_v3 = vpack.c.bf16 %v46_v1, %v45_v0  ;;  %v30_v4 = vld [vmem:[%s1556_s1 + $0x8] sm:$0xff]  ;;  %v48_v13 = vld [vmem:[%s1556_s1 + $0x98] sm:$0xff]  ;;  %v141_v60 = vshrl.u32 %v140_v45, 7 }
   0x3   :  { %v77_v5 = vld [vmem:[%s1556_s1 + $0x180] sm:$0xff]  ;;  %v78_v6 = vld [vmem:[%s1556_s1 + $0x188] sm:$0xff]  ;;  %v886_v7 = vpack.c.bf16 %v30_v4, %v29_v2  ;;  %v31_v14 = vld [vmem:[%s1556_s1 + $0x10] sm:$0xff]  ;;  %v888_v16 = vpack.c.bf16 %v48_v13, %v47_v11  ;;  %v139_v59 = vunpack.c.0.s8 %v138_v44 }
   0x4   :  { %v916_v8 = vpack.c.bf16 %v78_v6, %v77_v5  ;;  %v61_v9 = vld [vmem:[%s1556_s1 + $0x100] sm:$0xff]  ;;  %v62_v10 = vld [vmem:[%s1556_s1 + $0x108] sm:$0xff]  ;;  %885 = vmatprep.subr.bf16.mxu0 %v884_v3  ;;  %v32_v15 = vld [vmem:[%s1556_s1 + $0x18] sm:$0xff] }
   0x5   :  { %v918_v12 = vpack.c.bf16 %v62_v10, %v61_v9  ;;  %887 = vmatpush3.bf16.msra.mxu0 %v886_v7  ;;  %v890_v17 = vpack.c.bf16 %v32_v15, %v31_v14  ;;  %v79_v18 = vld [vmem:[%s1556_s1 + $0x190] sm:$0xff]  ;;  %v80_v19 = vld [vmem:[%s1556_s1 + $0x198] sm:$0xff]  ;;  %v49_v23 = vld [vmem:[%s1556_s1 + $0xa0] sm:$0xff]  ;;  %v1251_v10 = vsub.s32 %v139_v59, %v141_v60 }
   0x6   :  { %917 = vmatprep.subr.bf16.mxu1 %v916_v8  ;;  %v63_v20 = vld [vmem:[%s1556_s1 + $0x110] sm:$0xff]  ;;  %v920_v21 = vpack.c.bf16 %v80_v19, %v79_v18  ;;  %v64_v22 = vld [vmem:[%s1556_s1 + $0x118] sm:$0xff]  ;;  %v50_v24 = vld [vmem:[%s1556_s1 + $0xa8] sm:$0xff]  ;;  %889 = vmatprep.subr.bf16.mxu0 %v888_v16 }
   0x7   :  { %919 = vmatpush3.bf16.msra.mxu1 %v918_v12  ;;  %v922_v25 = vpack.c.bf16 %v64_v22, %v63_v20  ;;  %v892_v26 = vpack.c.bf16 %v50_v24, %v49_v23  ;;  %v33_v27 = vld [vmem:[%s1556_s1 + $0x20] sm:$0xff]  ;;  %v34_v28 = vld [vmem:[%s1556_s1 + $0x28] sm:$0xff]  ;;  %v51_v35 = vld [vmem:[%s1556_s1 + $0xb0] sm:$0xff] }
   0x8   :  { %v81_v29 = vld [vmem:[%s1556_s1 + $0x1a0] sm:$0xff]  ;;  %921 = vmatprep.subr.bf16.mxu1 %v920_v21  ;;  %v82_v30 = vld [vmem:[%s1556_s1 + $0x1a8] sm:$0xff]  ;;  %v894_v33 = vpack.c.bf16 %v34_v28, %v33_v27  ;;  %v52_v36 = vld [vmem:[%s1556_s1 + $0xb8] sm:$0xff] }
   0x9   :  { %v65_v31 = vld [vmem:[%s1556_s1 + $0x120] sm:$0xff]  ;;  %v66_v32 = vld [vmem:[%s1556_s1 + $0x128] sm:$0xff]  ;;  %891 = vmatpush3.bf16.msra.mxu0 %v890_v17  ;;  %v924_v34 = vpack.c.bf16 %v82_v30, %v81_v29  ;;  %v35_v37 = vld [vmem:[%s1556_s1 + $0x30] sm:$0xff]  ;;  %v896_v39 = vpack.c.bf16 %v52_v36, %v51_v35 }
   0xa   :  { %893 = vmatprep.subr.bf16.mxu0 %v892_v26  ;;  %v926_v38 = vpack.c.bf16 %v66_v32, %v65_v31  ;;  %v36_v40 = vld [vmem:[%s1556_s1 + $0x38] sm:$0xff]  ;;  %v83_v41 = vld [vmem:[%s1556_s1 + $0x1b0] sm:$0xff]  ;;  %v53_v49 = vld [vmem:[%s1556_s1 + $0xc0] sm:$0xff] }
   0xb   :  { %923 = vmatpush3.bf16.msra.mxu1 %v922_v25  ;;  %v84_v42 = vld [vmem:[%s1556_s1 + $0x1b8] sm:$0xff]  ;;  %v67_v47 = vld [vmem:[%s1556_s1 + $0x130] sm:$0xff]  ;;  %v54_v50 = vld [vmem:[%s1556_s1 + $0xc8] sm:$0xff]  ;;  %v898_v51 = vpack.c.bf16 %v36_v40, %v35_v37 }
   0xc   :  { %925 = vmatprep.subr.bf16.mxu1 %v924_v34  ;;  %v928_v46 = vpack.c.bf16 %v84_v42, %v83_v41  ;;  %v68_v48 = vld [vmem:[%s1556_s1 + $0x138] sm:$0xff]  ;;  %v85_v52 = vld [vmem:[%s1556_s1 + $0x1c0] sm:$0xff]  ;;  %v86_v53 = vld [vmem:[%s1556_s1 + $0x1c8] sm:$0xff]  ;;  %v900_v55 = vpack.c.bf16 %v54_v50, %v53_v49 }
   0xd   :  { %895 = vmatpush3.bf16.msra.mxu0 %v894_v33  ;;  %v930_v54 = vpack.c.bf16 %v68_v48, %v67_v47  ;;  %v37_v56 = vld [vmem:[%s1556_s1 + $0x40] sm:$0xff]  ;;  %v38_v57 = vld [vmem:[%s1556_s1 + $0x48] sm:$0xff]  ;;  %v932_v61 = vpack.c.bf16 %v86_v53, %v85_v52  ;;  %v55_v63 = vld [vmem:[%s1556_s1 + $0xd0] sm:$0xff] }
   0xe   :  { %897 = vmatprep.subr.bf16.mxu0 %v896_v39  ;;  %v69_v58 = vld [vmem:[%s1556_s1 + $0x140] sm:$0xff]  ;;  %v70_v62 = vld [vmem:[%s1556_s1 + $0x148] sm:$0xff]  ;;  %v56_v0 = vld [vmem:[%s1556_s1 + $0xd8] sm:$0xff]  ;;  %v902_v3 = vpack.c.bf16 %v38_v57, %v37_v56 }
   0xf   :  { %927 = vmatpush3.bf16.msra.mxu1 %v926_v38  ;;  %v87_v1 = vld [vmem:[%s1556_s1 + $0x1d0] sm:$0xff]  ;;  %v88_v2 = vld [vmem:[%s1556_s1 + $0x1d8] sm:$0xff]  ;;  %v934_v5 = vpack.c.bf16 %v70_v62, %v69_v58  ;;  %v904_v6 = vpack.c.bf16 %v56_v0, %v55_v63  ;;  %v57_v12 = vld [vmem:[%s1556_s1 + $0xe0] sm:$0xff] }
  0x10   :  { %929 = vmatprep.subr.bf16.mxu1 %v928_v46  ;;  %v39_v4 = vld [vmem:[%s1556_s1 + $0x50] sm:$0xff]  ;;  %v40_v7 = vld [vmem:[%s1556_s1 + $0x58] sm:$0xff]  ;;  %v936_v11 = vpack.c.bf16 %v88_v2, %v87_v1  ;;  %v58_v13 = vld [vmem:[%s1556_s1 + $0xe8] sm:$0xff] }
  0x11   :  { %899 = vmatpush3.bf16.msra.mxu0 %v898_v51  ;;  %v71_v8 = vld [vmem:[%s1556_s1 + $0x150] sm:$0xff]  ;;  %v72_v9 = vld [vmem:[%s1556_s1 + $0x158] sm:$0xff]  ;;  %v89_v14 = vld [vmem:[%s1556_s1 + $0x1e0] sm:$0xff]  ;;  %v906_v16 = vpack.c.bf16 %v40_v7, %v39_v4  ;;  %v908_v19 = vpack.c.bf16 %v58_v13, %v57_v12 }
  0x12   :  { %901 = vmatprep.subr.bf16.mxu0 %v900_v55  ;;  %v90_v15 = vld [vmem:[%s1556_s1 + $0x1e8] sm:$0xff]  ;;  %v938_v17 = vpack.c.bf16 %v72_v9, %v71_v8  ;;  %v27_v18 = vld [vmem:[%s1555_s0] sm:$0xff]  ;;  %v59_v27 = vld [vmem:[%s1556_s1 + $0xf0] sm:$0xff] }
  0x13   :  { %931 = vmatpush3.bf16.msra.mxu1 %v930_v54  ;;  %v41_v20 = vld [vmem:[%s1556_s1 + $0x60] sm:$0xff]  ;;  %v42_v21 = vld [vmem:[%s1556_s1 + $0x68] sm:$0xff]  ;;  %v143_v23 = vrot.slane %v27_v18, %v1251_v10  ;;  %v136_v24 = vcombine.high %v27_v18, %v27_v18  ;;  %v940_v25 = vpack.c.bf16 %v90_v15, %v89_v14  ;;  %v60_v28 = vld [vmem:[%s1556_s1 + $0xf8] sm:$0xff] }
  0x14   :  { %933 = vmatprep.subr.bf16.mxu1 %v932_v61  ;;  %v73_v22 = vld [vmem:[%s1556_s1 + $0x160] sm:$0xff]  ;;  %v74_v26 = vld [vmem:[%s1556_s1 + $0x168] sm:$0xff]  ;;  %v91_v29 = vld [vmem:[%s1556_s1 + $0x1f0] sm:$0xff]  ;;  %v910_v33 = vpack.c.bf16 %v42_v21, %v41_v20  ;;  %v912_v35 = vpack.c.bf16 %v60_v28, %v59_v27 }
  0x15   :  { %903 = vmatpush3.bf16.msra.mxu0 %v902_v3  ;;  %v92_v30 = vld [vmem:[%s1556_s1 + $0x1f8] sm:$0xff]  ;;  %v151_v31 = vcombine.high %v143_v23, %v143_v23  ;;  %v150_v32 = vrot.slane %v136_v24, %v1251_v10  ;;  %v942_v34 = vpack.c.bf16 %v74_v26, %v73_v22  ;;  %v43_v36 = vld [vmem:[%s1556_s1 + $0x70] sm:$0xff]  ;;  %v109_v42 = vld [vmem:[%s1556_s1 + $0x280] sm:$0xff] }
  0x16   :  { %905 = vmatprep.subr.bf16.mxu0 %v904_v6  ;;  %v44_v37 = vld [vmem:[%s1556_s1 + $0x78] sm:$0xff]  ;;  %v75_v38 = vld [vmem:[%s1556_s1 + $0x170] sm:$0xff]  ;;  %v944_v40 = vpack.c.bf16 %v92_v30, %v91_v29  ;;  %v110_v43 = vld [vmem:[%s1556_s1 + $0x288] sm:$0xff] }
  0x17   :  { %935 = vmatpush3.bf16.msra.mxu1 %v934_v5  ;;  %v152_v39 = vcombine.high %v150_v32, %v150_v32  ;;  %242 = vmatprep.mubr.f32.mxu0 %v151_v31  ;;  %v76_v41 = vld [vmem:[%s1556_s1 + $0x178] sm:$0xff]  ;;  %v914_v44 = vpack.c.bf16 %v44_v37, %v43_v36  ;;  %v948_v46 = vpack.c.bf16 %v110_v43, %v109_v42  ;;  %v93_v47 = vld [vmem:[%s1556_s1 + $0x200] sm:$0xff]  ;;  %v94_v48 = vld [vmem:[%s1556_s1 + $0x208] sm:$0xff] }
  0x18   :  { %937 = vmatprep.subr.bf16.mxu1 %v936_v11  ;;  %v946_v45 = vpack.c.bf16 %v76_v41, %v75_v38  ;;  %v111_v49 = vld [vmem:[%s1556_s1 + $0x290] sm:$0xff]  ;;  %v112_v50 = vld [vmem:[%s1556_s1 + $0x298] sm:$0xff]  ;;  %v950_v51 = vpack.c.bf16 %v94_v48, %v93_v47  ;;  %v28_v53 = vld [vmem:[%s1555_s0 + $0x8] sm:$0x3f] }
  0x19   :  { %907 = vmatpush3.bf16.msra.mxu0 %v906_v16  ;;  %312 = vmatprep.mubr.f32.mxu1 %v152_v39  ;;  %v95_v52 = vld [vmem:[%s1556_s1 + $0x210] sm:$0xff]  ;;  %v125_v54 = vld [vmem:[%s1556_s1 + $0x300] sm:$0xff]  ;;  %v952_v55 = vpack.c.bf16 %v112_v50, %v111_v49  ;;  %v96_v56 = vld [vmem:[%s1556_s1 + $0x218] sm:$0xff]  ;;  %v153_v57 = vcombine.high %v28_v53, %v28_v53  ;;  %v1337_v58 = vrot.slane %v28_v53, %v1251_v10 }
  0x1a   :  { %909 = vmatprep.subr.bf16.mxu0 %v908_v19  ;;  %v126_v59 = vld [vmem:[%s1556_s1 + $0x308] sm:$0xff] }
  0x1b   :  { %939 = vmatpush3.bf16.msra.mxu1 %v938_v17 }
  0x1c   :  { %941 = vmatprep.subr.bf16.mxu1 %v940_v25 }
  0x1d   :  { %911 = vmatpush3.bf16.msra.mxu0 %v910_v33 }
  0x1e   :  { %913 = vmatprep.subr.bf16.mxu0 %v912_v35 }
  0x1f   :  { %943 = vmatpush3.bf16.msra.mxu1 %v942_v34 }
  0x20   :  { %945 = vmatprep.subr.bf16.mxu1 %v944_v40 }
  0x21   :  { %915 = vmatpush3.bf16.msra.mxu0 %v914_v44 }
  0x22   :  { %949 = vmatprep.subr.bf16.mxu0 %v948_v46 }
  0x23   :  { %947 = vmatpush3.bf16.msra.mxu1 %v946_v45 }
  0x24   :  { %12 = vsyncpa [#allocation3], 0  ;;  %v113_v60 = vld [vmem:[%s1556_s1 + $0x2a0] sm:$0xff]  ;;  %v114_v61 = vld [vmem:[%s1556_s1 + $0x2a8] sm:$0xff]  ;;  %v1063_v62 = vmov 0.0|0.0   ;;  %v981_v63 = vpack.c.bf16 %v126_v59, %v125_v54  ;;  %243 = vmatmul.mubr.f32.vlgmr.msra.gmra.mrb[0].mxu0 %v143_v23  ;;  %v168_v0 = vcombine.high %v1337_v58, %v1337_v58  ;;  %v954_v1 = vpack.c.bf16 %v96_v56, %v95_v52  ;;  %s1066_s30 = smov [#allocation2]  }
  0x25   :  { %980 = vmatprep.subr.bf16.mxu1 %v1063_v62  ;;  %951 = vmatpush3.bf16.msra.mxu0 %v950_v51  ;;  %v956_v2 = vpack.c.bf16 %v114_v61, %v113_v60  ;;  %v97_v3 = vld [vmem:[%s1556_s1 + $0x220] sm:$0xff]  ;;  %v98_v4 = vld [vmem:[%s1556_s1 + $0x228] sm:$0xff]  ;;  %v167_v5 = vrot.slane %v153_v57, %v1251_v10  ;;  %v115_v6 = vld [vmem:[%s1556_s1 + $0x2b0] sm:$0xff]  ;;  %vm1064_vm0 = vmmov 0   ;;  %v1065_v8 = vmov 0.0   ;;  %s653_s8 = sshll.u32 %s1066_s30, 4  ;;  %s654_s8 = int_to_ptr.vmem [resolvable:$true] %s653_s8 }
  0x26   :  { %313 = vmatmul.mubr.f32.vlgmr.msra.gmra.mrb[0].mxu1 %v150_v32  ;;  %953 = vmatprep.subr.bf16.mxu0 %v952_v55  ;;  %v116_v7 = vld [vmem:[%s1556_s1 + $0x2b8] sm:$0xff]  ;;  %vm175_vm1 = vcmask 130048   ;;  %v958_v9 = vpack.c.bf16 %v98_v4, %v97_v3  ;;  %v99_v11 = vld [vmem:[%s1556_s1 + $0x230] sm:$0xff]  ;;  %v117_v13 = vld [vmem:[%s1556_s1 + $0x2c0] sm:$0xff]  ;;  %p1043_p1 = scmp.lt.s32.totalorder %s654_s8, %s654_s8 }
  0x27   :  { %382 = vmatprep.mubr.f32.mxu0 %v168_v0  ;;  %982 = vmatpush3.bf16.msra.mxu1 %v981_v63  ;;  %v960_v10 = vpack.c.bf16 %v116_v7, %v115_v6  ;;  %v100_v12 = vld [vmem:[%s1556_s1 + $0x238] sm:$0xff]  ;;  %v118_v14 = vld [vmem:[%s1556_s1 + $0x2c8] sm:$0xff]  ;;  %v101_v17 = vld [vmem:[%s1556_s1 + $0x240] sm:$0xff] }
  0x28   :  { %811 = vmatprep.mubr.msk.f32.mxu1 %vm1064_vm0, %v1065_v8  ;;  %983 = vmatprep.subr.bf16.mxu1 %v1063_v62  ;;  %v962_v15 = vpack.c.bf16 %v100_v12, %v99_v11  ;;  %v964_v16 = vpack.c.bf16 %v118_v14, %v117_v13  ;;  %v102_v18 = vld [vmem:[%s1556_s1 + $0x248] sm:$0xff]  ;;  %v119_v19 = vld [vmem:[%s1556_s1 + $0x2d0] sm:$0xff]  ;;  %v120_v20 = vld [vmem:[%s1556_s1 + $0x2d8] sm:$0xff] }
  0x29   :  { %955 = vmatpush3.bf16.msra.mxu0 %v954_v1  ;;  %v966_v21 = vpack.c.bf16 %v102_v18, %v101_v17  ;;  %v968_v22 = vpack.c.bf16 %v120_v20, %v119_v19  ;;  %v103_v23 = vld [vmem:[%s1556_s1 + $0x250] sm:$0xff]  ;;  %v104_v24 = vld [vmem:[%s1556_s1 + $0x258] sm:$0xff]  ;;  %v121_v25 = vld [vmem:[%s1556_s1 + $0x2e0] sm:$0xff] }
  0x2a   :  { %957 = vmatprep.subr.bf16.mxu0 %v956_v2  ;;  %812 = vmatmul.mubr.msk.f32.vlgmr.msra.gmra.mrb[2].mxu1 %vm175_vm1, %v167_v5  ;;  %v122_v26 = vld [vmem:[%s1556_s1 + $0x2e8] sm:$0xff]  ;;  %v970_v27 = vpack.c.bf16 %v104_v24, %v103_v23  ;;  %v105_v29 = vld [vmem:[%s1556_s1 + $0x260] sm:$0xff]  ;;  %v123_v31 = vld [vmem:[%s1556_s1 + $0x2f0] sm:$0xff] }
  0x2b   :  { %846 = vmatprep.mubr.msk.f32.mxu1 %vm1064_vm0, %v1065_v8  ;;  %v972_v28 = vpack.c.bf16 %v122_v26, %v121_v25  ;;  %v106_v30 = vld [vmem:[%s1556_s1 + $0x268] sm:$0xff]  ;;  %v124_v32 = vld [vmem:[%s1556_s1 + $0x2f8] sm:$0xff]  ;;  %v107_v35 = vld [vmem:[%s1556_s1 + $0x270] sm:$0xff] }
  0x2c   :  { %v974_v33 = vpack.c.bf16 %v106_v30, %v105_v29  ;;  %v976_v34 = vpack.c.bf16 %v124_v32, %v123_v31  ;;  %v108_v36 = vld [vmem:[%s1556_s1 + $0x278] sm:$0xff]  ;;  %v459_v38 = vld [vmem:[%s1558_s3] sm:$0xff]  ;;  %v460_v39 = vld [vmem:[%s1558_s3 + $0x8] sm:$0xff] }
  0x2d   :  { %959 = vmatpush3.bf16.msra.mxu0 %v958_v9  ;;  %v978_v37 = vpack.c.bf16 %v108_v36, %v107_v35  ;;  %v461_v40 = vld [vmem:[%s1558_s3 + $0x10] sm:$0xff]  ;;  %v984_v41 = vpack.c.bf16 %v460_v39, %v459_v38  ;;  %v462_v42 = vld [vmem:[%s1558_s3 + $0x18] sm:$0xff]  ;;  %v463_v44 = vld [vmem:[%s1558_s3 + $0x20] sm:$0xff] }
  0x2e   :  { %961 = vmatprep.subr.bf16.mxu0 %v960_v10  ;;  %v987_v43 = vpack.c.bf16 %v462_v42, %v461_v40  ;;  %v464_v45 = vld [vmem:[%s1558_s3 + $0x28] sm:$0xff]  ;;  %v465_v47 = vld [vmem:[%s1558_s3 + $0x30] sm:$0xff]  ;;  %v466_v48 = vld [vmem:[%s1558_s3 + $0x38] sm:$0xff] }
  0x2f   :  { %985 = vmatpush3.bf16.msra.mxu1 %v984_v41  ;;  %v990_v46 = vpack.c.bf16 %v464_v45, %v463_v44  ;;  %v993_v49 = vpack.c.bf16 %v466_v48, %v465_v47  ;;  %v467_v50 = vld [vmem:[%s1558_s3 + $0x40] sm:$0xff]  ;;  %v468_v51 = vld [vmem:[%s1558_s3 + $0x48] sm:$0xff]  ;;  %v469_v53 = vld [vmem:[%s1558_s3 + $0x50] sm:$0xff] }
  0x30   :  { %986 = vmatprep.subr.bf16.mxu1 %v1063_v62  ;;  %v996_v52 = vpack.c.bf16 %v468_v51, %v467_v50  ;;  %v470_v54 = vld [vmem:[%s1558_s3 + $0x58] sm:$0xff]  ;;  %v471_v56 = vld [vmem:[%s1558_s3 + $0x60] sm:$0xff]  ;;  %v472_v57 = vld [vmem:[%s1558_s3 + $0x68] sm:$0xff] }
  0x31   :  { %963 = vmatpush3.bf16.msra.mxu0 %v962_v15  ;;  %v999_v55 = vpack.c.bf16 %v470_v54, %v469_v53  ;;  %v473_v59 = vld [vmem:[%s1558_s3 + $0x70] sm:$0xff]  ;;  %v474_v60 = vld [vmem:[%s1558_s3 + $0x78] sm:$0xff]  ;;  %v553_v63 = vld [vmem:[%s1560_s5] sm:$0xff] }
  0x32   :  { %965 = vmatprep.subr.bf16.mxu0 %v964_v16  ;;  %v1005_v61 = vpack.c.bf16 %v474_v60, %v473_v59  ;;  %v554_v0 = vld [vmem:[%s1560_s5 + $0x8] sm:$0xff]  ;;  %v555_v1 = vld [vmem:[%s1560_s5 + $0x10] sm:$0xff]  ;;  %v556_v3 = vld [vmem:[%s1560_s5 + $0x18] sm:$0xff] }
  0x33   :  { %988 = vmatpush3.bf16.msra.mxu1 %v987_v43  ;;  %v1008_v2 = vpack.c.bf16 %v554_v0, %v553_v63  ;;  %v1011_v4 = vpack.c.bf16 %v556_v3, %v555_v1  ;;  %v557_v5 = vld [vmem:[%s1560_s5 + $0x20] sm:$0xff]  ;;  %v558_v6 = vld [vmem:[%s1560_s5 + $0x28] sm:$0xff]  ;;  %v560_v9 = vld [vmem:[%s1560_s5 + $0x38] sm:$0xff] }
  0x34   :  { %989 = vmatprep.subr.bf16.mxu1 %v1063_v62  ;;  %v1014_v7 = vpack.c.bf16 %v558_v6, %v557_v5  ;;  %v561_v11 = vld [vmem:[%s1560_s5 + $0x40] sm:$0xff]  ;;  %v562_v12 = vld [vmem:[%s1560_s5 + $0x48] sm:$0xff]  ;;  %v563_v14 = vld [vmem:[%s1560_s5 + $0x50] sm:$0xff] }
  0x35   :  { %967 = vmatpush3.bf16.msra.mxu0 %v966_v21  ;;  %v1020_v13 = vpack.c.bf16 %v562_v12, %v561_v11  ;;  %v564_v15 = vld [vmem:[%s1560_s5 + $0x58] sm:$0xff]  ;;  %v565_v17 = vld [vmem:[%s1560_s5 + $0x60] sm:$0xff]  ;;  %v566_v18 = vld [vmem:[%s1560_s5 + $0x68] sm:$0xff] }
  0x36   :  { %969 = vmatprep.subr.bf16.mxu0 %v968_v22  ;;  %v1023_v16 = vpack.c.bf16 %v564_v15, %v563_v14  ;;  %v1026_v19 = vpack.c.bf16 %v566_v18, %v565_v17  ;;  %v661_v21 = vld [vmem:[%s1557_s2] ss:$0 sm:$0xff]  ;;  %v567_v36 = vld [vmem:[%s1560_s5 + $0x70] sm:$0xff] }
  0x37   :  { %991 = vmatpush3.bf16.msra.mxu1 %v990_v46  ;;  %v663_v39 = vld [vmem:[%s1559_s4] ss:$0 sm:$0xff] }
  0x38   :  { %992 = vmatprep.subr.bf16.mxu1 %v1063_v62  ;;  %v664_v44 = vld [vmem:[%s1561_s6] ss:$0 sm:$0xff] }
  0x39   :  { %971 = vmatpush3.bf16.msra.mxu0 %v970_v27 }
  0x3a   :  { %973 = vmatprep.subr.bf16.mxu0 %v972_v28 }
  0x3b   :  { %994 = vmatpush3.bf16.msra.mxu1 %v993_v49 }
  0x3c   :  { %995 = vmatprep.subr.bf16.mxu1 %v1063_v62 }
  0x3d   :  { %975 = vmatpush3.bf16.msra.mxu0 %v974_v33 }
  0x3e   :  { %977 = vmatprep.subr.bf16.mxu0 %v976_v34 }
  0x3f   :  { %997 = vmatpush3.bf16.msra.mxu1 %v996_v52 }
  0x40   :  { %998 = vmatprep.subr.bf16.mxu1 %v1063_v62 }
  0x41   :  { %979 = vmatpush3.bf16.msra.mxu0 %v978_v37  ;;  %v568_v37 = vld [vmem:[%s1560_s5 + $0x78] sm:$0xff] }
  0x42   :  { %1007 = vmatprep.subr.bf16.mxu0 %v1063_v62  ;;  %v1029_v38 = vpack.c.bf16 %v568_v37, %v567_v36 }
  0x43   :  { %1000 = vmatpush3.bf16.msra.mxu1 %v999_v55 }
  0x44   :  { %383 = vmatmul.mubr.f32.vlgmr.msra.gmra.mrb[2].mxu0 %v1337_v58  ;;  %1001 = vmatprep.subr.bf16.mxu1 %v1063_v62  ;;  %v1002_v58 = vpack.c.bf16 %v472_v57, %v471_v56 }
  0x45   :  { %881 = vmatprep.mubr.msk.f32.mxu0 %vm1064_vm0, %v1065_v8  ;;  %1009 = vmatpush3.bf16.msra.mxu0 %v1008_v2  ;;  %v559_v8 = vld [vmem:[%s1560_s5 + $0x30] sm:$0xff]  ;;  %s1038_s5 = scalar_lea.vmem %s654_s8, 32 }
  0x46   :  { %1010 = vmatprep.subr.bf16.mxu0 %v1063_v62  ;;  %v1017_v10 = vpack.c.bf16 %v560_v9, %v559_v8  ;;  %p1039_p0 = scmp.ne.s32.totalorder %s654_s8, %s1038_s5  ;;  %p1044_p2 = scmp.lt.s32.totalorder %s1038_s5, %s1038_s5 }
  0x47   :  { %1003 = vmatpush3.bf16.msra.mxu1 %v1002_v58 }
  0x48   :  { %1004 = vmatprep.subr.bf16.mxu1 %v1063_v62  ;;  %p1045_p3 = por %p1044_p2, %p1043_p1 }
  0x49   :  { %1012 = vmatpush3.bf16.msra.mxu0 %v1011_v4 }
  0x4a   :  { %1013 = vmatprep.subr.bf16.mxu0 %v1063_v62  ;;  %p1046_p4 = pnand %p1045_p3, %p1039_p0 }
  0x4b   :  { %1006 = vmatpush3.bf16.msra.mxu1 %v1005_v61 }
  0x4d   :  { %1015 = vmatpush3.bf16.msra.mxu0 %v1014_v7 }
  0x4e   :  { %1016 = vmatprep.subr.bf16.mxu0 %v1063_v62 }
  0x51   :  { %1018 = vmatpush3.bf16.msra.mxu0 %v1017_v10 }
  0x52   :  { %1019 = vmatprep.subr.bf16.mxu0 %v1063_v62 }
  0x55   :  { %1021 = vmatpush3.bf16.msra.mxu0 %v1020_v13 }
  0x56   :  { %1022 = vmatprep.subr.bf16.mxu0 %v1063_v62 }
  0x59   :  { %1024 = vmatpush3.bf16.msra.mxu0 %v1023_v16 }
  0x5a   :  { %1025 = vmatprep.subr.bf16.mxu0 %v1063_v62 }
  0x5d   :  { %1027 = vmatpush3.bf16.msra.mxu0 %v1026_v19 }
  0x5e   :  { %1028 = vmatprep.subr.bf16.mxu0 %v1063_v62 }
  0x61   :  { %1030 = vmatpush3.bf16.msra.mxu0 %v1029_v38 }
  0xf7   :  { %v697_v20 = vpop.f32.mrb[0].mxu0 }
  0xf8   :  { %v698_v22 = vpop.f32.mrb[1].mxu0 }
  0xf9   :  { %v732_v23 = vpop.f32.mrb[0].mxu1  ;;  %v699_v24 = vadd.f32 %v698_v22, %v697_v20 }
  0xfa   :  { %v733_v25 = vpop.f32.mrb[1].mxu1 }
  0xfb   :  { %v734_v26 = vadd.f32 %v733_v25, %v732_v23  ;;  %v245_v27 = vadd.f32 %v699_v24, %v661_v21 }
  0xfd   :  { %v315_v28 = vadd.f32 %v734_v26, %v245_v27  ;;  %v454_v29 = vpop.f32.mrb[2].mxu1 }
  0xfe   :  { %v813_v30 = vpop.f32.mrb[3].mxu1 }
 0x117   :  { %v767_v31 = vpop.f32.mrb[2].mxu0 }
 0x118   :  { %v768_v32 = vpop.f32.mrb[3].mxu0 }
 0x119   :  { %v769_v33 = vadd.f32 %v768_v32, %v767_v31 }
 0x11b   :  { %v385_v34 = vadd.f32 %v769_v33, %v315_v28 }
 0x11d   :  { %v455_v35 = vadd.f32 %v454_v29, %v385_v34 }
 0x11f   :  { %v458_v62 = vmax.f32 %v455_v35, 0.0 }
 0x121   :  { %847 = vmatmul.mubr.f32.vlgmr.msra.gmra.mrb[4].mxu1 %v458_v62 }
 0x1f4   :  { %v548_v40 = vpop.f32.mrb[4].mxu1 }
 0x1f5   :  { %v549_v41 = vadd.f32 %v663_v39, %v548_v40  ;;  %v848_v42 = vpop.f32.mrb[5].mxu1 }
 0x1f7   :  { %v552_v43 = vmax.f32 %v549_v41, 0.0 }
 0x1f9   :  { %882 = vmatmul.mubr.f32.vlgmr.msra.gmra.mrb[4].mxu0 %v552_v43 }
 0x2cc   :  { %v642_v45 = vpop.f32.mrb[4].mxu0 }
 0x2cd   :  { %v643_v46 = vadd.f32 %v664_v44, %v642_v45  ;;  %v883_v47 = vpop.f32.mrb[5].mxu0 }
 0x2cf   :  { %646 = vst [vmem:[#allocation2] sm:$0x3] %v643_v46 }
 0x2d0   :  { %1049 = shalt.err (!%p1046_p4)
}
 0x2d1   :  { %s1050_s10 = scalar_lea.hbm %s1562_s7, 32 }
 0x2d2   :  { %p1051_p5 = scmp.ne.s32.totalorder %s1562_s7, %s1050_s10  ;;  %p1054_p6 = scmp.lt.u32.totalorder %s1050_s10, %s1562_s7 }
 0x2d4   :  { %p1056_p7 = pnand %p1054_p6, %p1051_p5 }
 0x2d6   :  { %1059 = shalt.err (!%p1056_p7)
}
 0x2d7   :  { %656 = dma.vmem_to_hbm [thread:$0]  %s654_s8, 32, %s1562_s7, [#allocation3]  }
 0x2d8   :  { %1060 = dma.done.wait [#allocation3], 32  }
 0x2d9   :  { %1061 = vsyncadd [#allocation3], 4294967264 }
 0x2da   :  { %660 = vsyncpa [#allocation3], 1 }

// kernel: lenet_forward.2
= control target key start
LH: loop header
LB: loop body
LE: loop exit
PB: predicated region body
PF: predicated region fallthrough
CT: control target
= control target key end

     0   :  { %s8673_s30 = smov 0   ;;  %s11273_s0 = inlined_call_operand.vmem [shape: f32[2,32,32], index: 0, kind: input, shape index: {}]   ;;  %s11274_s1 = inlined_call_operand.vmem [shape: f32[5,168,32], index: 1, kind: input, shape index: {}]   ;;  %s11275_s2 = inlined_call_operand.vmem [shape: f32[168,1], index: 2, kind: input, shape index: {}]   ;;  %s11276_s3 = inlined_call_operand.vmem [shape: f32[2,28,18], index: 3, kind: input, shape index: {}]   ;;  %s11277_s4 = inlined_call_operand.vmem [shape: f32[2,108,168], index: 4, kind: input, shape index: {}]   ;;  %s11278_s5 = inlined_call_operand.vmem [shape: f32[5,224,108], index: 5, kind: input, shape index: {}]   ;;  %s11279_s6 = inlined_call_operand.vmem [shape: f32[224,1], index: 6, kind: input, shape index: {}]   ;;  %s11280_s7 = inlined_call_operand.vmem [shape: f32[2,14,7], index: 7, kind: input, shape index: {}]   ;;  %s11281_s8 = inlined_call_operand.vmem [shape: f32[2,112,224], index: 8, kind: input, shape index: {}]   ;;  %s11282_s9 = inlined_call_operand.vmem [shape: f32[2,112,7], index: 9, kind: output, shape index: {}]  }
   0x1 LB: > { %s5879_s10 = sadd.s32 4294967295, %s8612_s30   ;;  %p5883_p0 = scmp.ge.s32.totalorder %s8612_s30, 1  ;;  %s8612_s30 = sphi %s8673_s30, %s19_s30  }
   0x2   : > { %p287_p1 = scmp.lt.s32.totalorder %s8612_s30, 3 }
   0x4   : > { %p288_p2 = pnand %p5883_p0, %p287_p1 }
   0x5   : > { %p323_p3 = scmp.lt.s32.totalorder (!%p288_p2), %s5879_s10, 1  ;;  %v8614_v0 = vmov (!%p288_p2), 0.0|0.0   ;;  %vm8615_vm0 = vmmov (!%p288_p2), 0   ;;  %v8616_v1 = vmov (!%p288_p2), 0.0   ;;  %s8617_s15 = smov (!%p288_p2), 127   ;;  %v5887_v22 = vld [vmem:[%s11274_s1 + $0xa8] sm:$0xff] (!%p288_p2) }
   0x6   : > { %291 = sbr.rel (%p288_p2) target bundleno = 2356 (0x934), region = 56  ;;  %7940 = vmatprep.subr.bf16.mxu0 (!%p288_p2), %v8614_v0  ;;  %8290 = vmatprep.subr.bf16.mxu1 (!%p288_p2), %v8614_v0  ;;  %s8618_s16 = smov (!%p288_p2), 126   ;;  %vm396_vm1 = vcmask (!%p288_p2), 261120   ;;  %v5905_v23 = vld [vmem:[%s11274_s1 + $0x138] sm:$0xff] (!%p288_p2)  ;;  %v5888_v27 = vld [vmem:[%s11274_s1 + $0xb0] sm:$0xff] (!%p288_p2)  ;;  %v5906_v28 = vld [vmem:[%s11274_s1 + $0x140] sm:$0xff] (!%p288_p2) }
   0x7   : > { %7009 = vmatprep.mubr.msk.f32.mxu0 (!%p288_p2), %vm8615_vm0, %v8616_v1  ;;  %7063 = vmatprep.mubr.msk.f32.mxu1 (!%p288_p2), %vm8615_vm0, %v8616_v1  ;;  %s8619_s17 = smov (!%p288_p2), 125   ;;  %s8620_s18 = smov (!%p288_p2), 124   ;;  %v5889_v31 = vld [vmem:[%s11274_s1 + $0xb8] sm:$0xff] (!%p288_p2)  ;;  %v5907_v32 = vld [vmem:[%s11274_s1 + $0x148] sm:$0xff] (!%p288_p2)  ;;  %v5890_v36 = vld [vmem:[%s11274_s1 + $0xc0] sm:$0xff] (!%p288_p2)  ;;  %vm1963_vm2 = vcmask (!%p288_p2), 1043456  }
   0x8   : > { %v337_v37 = vld [vmem:[%s11274_s1] sm:$0xff] (!%p288_p2)  ;;  %v5891_v41 = vld [vmem:[%s11274_s1 + $0xc8] sm:$0xff] (!%p288_p2)  ;;  %v5892_v44 = vld [vmem:[%s11274_s1 + $0xd0] sm:$0xff] (!%p288_p2)  ;;  %vm8622_vm3 = vmmov (!%p288_p2), 1   ;;  %vm1899_vm5 = vcmask (!%p288_p2), 228352   ;;  %vm2364_vm6 = vcmask (!%p288_p2), 326656  }
   0x9   : > { %v338_v42 = vld [vmem:[%s11274_s1 + $0x8] sm:$0xff] (!%p288_p2)  ;;  %v339_v45 = vld [vmem:[%s11274_s1 + $0x10] sm:$0xff] (!%p288_p2)  ;;  %v5893_v46 = vld [vmem:[%s11274_s1 + $0xd8] sm:$0xff] (!%p288_p2)  ;;  %vm2874_vm7 = vcmask (!%p288_p2), 883712   ;;  %vm4935_vm8 = vcmask (!%p288_p2), 1045504   ;;  %vm4850_vm10 = vcmask (!%p288_p2), 113664  }
   0xa   : > { %v340_v47 = vld [vmem:[%s11274_s1 + $0x18] sm:$0xff] (!%p288_p2)  ;;  %v5894_v48 = vld [vmem:[%s11274_s1 + $0xe0] sm:$0xff] (!%p288_p2)  ;;  %v5895_v50 = vld [vmem:[%s11274_s1 + $0xe8] sm:$0xff] (!%p288_p2)  ;;  %vm5411_vm11 = vcmask (!%p288_p2), 785408   ;;  %vm5809_vm12 = vcmask (!%p288_p2), 56320  }
   0xb   : > { %v341_v49 = vld [vmem:[%s11274_s1 + $0x20] sm:$0xff] (!%p288_p2)  ;;  %v342_v51 = vld [vmem:[%s11274_s1 + $0x28] sm:$0xff] (!%p288_p2)  ;;  %v5896_v52 = vld [vmem:[%s11274_s1 + $0xf0] sm:$0xff] (!%p288_p2) }
   0xc   : > { %v343_v53 = vld [vmem:[%s11274_s1 + $0x30] sm:$0xff] (!%p288_p2)  ;;  %v5897_v54 = vld [vmem:[%s11274_s1 + $0xf8] sm:$0xff] (!%p288_p2)  ;;  %v5898_v56 = vld [vmem:[%s11274_s1 + $0x100] sm:$0xff] (!%p288_p2) }
   0xd   : > { %s11288_s10 = smov (!%p323_p3, %s5879_s10), 1  ;;  %v344_v55 = vld [vmem:[%s11274_s1 + $0x38] sm:$0xff]  ;;  %v345_v57 = vld [vmem:[%s11274_s1 + $0x40] sm:$0xff]  ;;  %v5899_v58 = vld [vmem:[%s11274_s1 + $0x108] sm:$0xff] }
   0xe   : > { %s6555_s11 = sshll.u32 %s11288_s10, 5  ;;  %v346_v59 = vld [vmem:[%s11274_s1 + $0x48] sm:$0xff]  ;;  %v5900_v60 = vld [vmem:[%s11274_s1 + $0x110] sm:$0xff]  ;;  %v5901_v62 = vld [vmem:[%s11274_s1 + $0x118] sm:$0xff]  ;;  %s8406_s24 = smul.u32 112, %s11288_s10 }
   0xf   : > { %s327_s14 = scalar_lea.vmem %s11273_s0, %s6555_s11  ;;  %v347_v61 = vld [vmem:[%s11274_s1 + $0x50] sm:$0xff]  ;;  %v348_v63 = vld [vmem:[%s11274_s1 + $0x58] sm:$0xff]  ;;  %vm9447_vm4 = vmpackc.low %vm1963_vm2, %vm8622_vm3 }
  0x10   : > { %v333_v2 = vld [vmem:[%s327_s14] sm:$0xff]  ;;  %v334_v3 = vld [vmem:[%s327_s14 + $0x8] sm:$0xff]  ;;  %v335_v4 = vld [vmem:[%s327_s14 + $0x10] sm:$0xff] }
  0x11   : > { %v8424_v5 = vpack.i.bf16 %v334_v3, %v333_v2  ;;  %v336_v6 = vld [vmem:[%s327_s14 + $0x18] sm:$0xff]  ;;  %v7947_v8 = vpack.c.bf16 %v334_v3, %v333_v2  ;;  %v5902_v2 = vld [vmem:[%s11274_s1 + $0x120] sm:$0xff]  ;;  %vm10452_vm9 = vmpackc.low %vm4935_vm8, %vm8622_vm3 }
  0x12   : > { %v8429_v7 = vpack.i.bf16 %v336_v6, %v335_v4  ;;  %v7950_v9 = vpack.c.bf16 %v336_v6, %v335_v4  ;;  %v349_v3 = vld [vmem:[%s11274_s1 + $0x60] sm:$0xff]  ;;  %v5903_v4 = vld [vmem:[%s11274_s1 + $0x128] sm:$0xff] }
  0x13   : > { %8425 = vrot.lane.b32.xlu0 %v8424_v5, %s8617_s15  ;;  %8435 = vrot.lane.b32.xlu1 %v8424_v5, %s8618_s16 }
  0x17   : > { %8430 = vrot.lane.b32.xlu0 %v8429_v7, %s8617_s15  ;;  %8440 = vrot.lane.b32.xlu1 %v8429_v7, %s8618_s16 }
  0x1b   : > { %8445 = vrot.lane.b32.xlu0 %v8424_v5, %s8619_s17  ;;  %8450 = vrot.lane.b32.xlu1 %v8424_v5, %s8620_s18  ;;  %v350_v5 = vld [vmem:[%s11274_s1 + $0x68] sm:$0xff] }
  0x1f   : > { %8455 = vrot.lane.b32.xlu0 %v8429_v7, %s8619_s17  ;;  %8460 = vrot.lane.b32.xlu1 %v8429_v7, %s8620_s18  ;;  %v5904_v7 = vld [vmem:[%s11274_s1 + $0x130] sm:$0xff] }
  0x85   : > { %v8426_v10 = vpop.permute.xlu0 %8425  ;;  %v8436_v13 = vpop.permute.xlu1 %8435 }
  0x86   : > { %v8428_v11 = vunpack.i.h.bf16 %v8426_v10  ;;  %v8427_v12 = vunpack.i.l.bf16 %v8426_v10  ;;  %v8438_v18 = vunpack.i.h.bf16 %v8436_v13  ;;  %v8437_v19 = vunpack.i.l.bf16 %v8436_v13  ;;  %v5950_v13 = vld [vmem:[%s11274_s1 + $0x150] sm:$0xff] }
  0x88   : > { %v7941_v14 = vpack.c.bf16 %v8428_v11, %v8427_v12  ;;  %v7953_v24 = vpack.c.bf16 %v8438_v18, %v8437_v19  ;;  %v352_v12 = vld [vmem:[%s11274_s1 + $0x78] sm:$0xff] }
  0x89   : > { %v8431_v15 = vpop.permute.xlu0 %8430  ;;  %v8441_v21 = vpop.permute.xlu1 %8440  ;;  %v5951_v18 = vld [vmem:[%s11274_s1 + $0x158] sm:$0xff] }
  0x8a   : > { %v8433_v16 = vunpack.i.h.bf16 %v8431_v15  ;;  %v8432_v17 = vunpack.i.l.bf16 %v8431_v15  ;;  %7942 = vmatpush3.bf16.msra.mxu0 %v7941_v14  ;;  %8292 = vmatpush3.bf16.msra.mxu1 %v7941_v14  ;;  %v8443_v25 = vunpack.i.h.bf16 %v8441_v21  ;;  %v8442_v26 = vunpack.i.l.bf16 %v8441_v21  ;;  %v354_v21 = vld [vmem:[%s11274_s1 + $0x88] sm:$0xff] }
  0x8b   : > { %7943 = vmatprep.subr.bf16.mxu0 %v8614_v0  ;;  %8291 = vmatprep.subr.bf16.mxu1 %v8614_v0 }
  0x8c   : > { %v7944_v20 = vpack.c.bf16 %v8433_v16, %v8432_v17  ;;  %v7956_v30 = vpack.c.bf16 %v8443_v25, %v8442_v26  ;;  %v353_v17 = vld [vmem:[%s11274_s1 + $0x80] sm:$0xff]  ;;  %v1729_v25 = vld [vmem:[%s11275_s2 + $0x10] sm:$0xff] }
  0x8d   : > { %v8446_v29 = vpop.permute.xlu0 %8445  ;;  %v8451_v6 = vpop.permute.xlu1 %8450  ;;  %v355_v26 = vld [vmem:[%s11274_s1 + $0x90] sm:$0xff] }
  0x8e   : > { %7945 = vmatpush3.bf16.msra.mxu0 %v7944_v20  ;;  %8293 = vmatpush3.bf16.msra.mxu1 %v7944_v20  ;;  %v8448_v33 = vunpack.i.h.bf16 %v8446_v29  ;;  %v8447_v34 = vunpack.i.l.bf16 %v8446_v29  ;;  %v8452_v10 = vunpack.i.l.bf16 %v8451_v6  ;;  %v1728_v20 = vld [vmem:[%s11275_s2 + $0x8] sm:$0xff]  ;;  %v1731_v29 = vld [vmem:[%s11275_s2 + $0x20] sm:$0xff] }
  0x8f   : > { %7946 = vmatprep.subr.bf16.mxu1 %v8614_v0  ;;  %7952 = vmatprep.subr.bf16.mxu0 %v8614_v0 }
  0x90   : > { %v7959_v38 = vpack.c.bf16 %v8448_v33, %v8447_v34  ;;  %v1733_v33 = vld [vmem:[%s11275_s2 + $0x30] sm:$0xff]  ;;  %v357_v34 = vld [vmem:[%s11274_s1 + $0xa0] sm:$0xff] }
  0x91   : > { %7010 = vmatmul.mubr.msk.f32.vlgmr.msra.gmra.mrb[0].mxu0 %vm396_vm1, %v5887_v22  ;;  %7064 = vmatmul.mubr.msk.f32.vlgmr.msra.gmra.mrb[0].mxu1 %vm396_vm1, %v5905_v23  ;;  %v8456_v35 = vpop.permute.xlu0 %8455  ;;  %v8461_v11 = vpop.permute.xlu1 %8460  ;;  %v5952_v22 = vld [vmem:[%s11274_s1 + $0x160] sm:$0xff]  ;;  %v8621_v23 = vmov 0  }
  0x92   : > { %7012 = vmatprep.mubr.msk.f32.mxu0 %vm8615_vm0, %v8616_v1  ;;  %7066 = vmatprep.mubr.msk.f32.mxu1 %vm8615_vm0, %v8616_v1  ;;  %v8458_v39 = vunpack.i.h.bf16 %v8456_v35  ;;  %v8457_v40 = vunpack.i.l.bf16 %v8456_v35  ;;  %v8463_v15 = vunpack.i.h.bf16 %v8461_v11  ;;  %v8462_v16 = vunpack.i.l.bf16 %v8461_v11  ;;  %v5955_v35 = vld [vmem:[%s11274_s1 + $0x178] sm:$0xff]  ;;  %v6003_v11 = vld [vmem:[%s11274_s1 + $0x250] sm:$0xff] }
  0x93   : > { %7948 = vmatpush3.bf16.msra.mxu1 %v7947_v8  ;;  %7954 = vmatpush3.bf16.msra.mxu0 %v7953_v24  ;;  %v351_v8 = vld [vmem:[%s11274_s1 + $0x70] sm:$0xff]  ;;  %v1727_v24 = vld [vmem:[%s11275_s2] sm:$0xff] }
  0x94   : > { %7949 = vmatprep.subr.bf16.mxu1 %v8614_v0  ;;  %7955 = vmatprep.subr.bf16.mxu0 %v8614_v0  ;;  %v7962_v43 = vpack.c.bf16 %v8458_v39, %v8457_v40  ;;  %v7968_v19 = vpack.c.bf16 %v8463_v15, %v8462_v16  ;;  %v5992_v39 = vld [vmem:[%s11274_s1 + $0x1f8] sm:$0xff]  ;;  %v1736_v40 = vld [vmem:[%s11275_s2 + $0x48] sm:$0xff]  ;;  %v6005_v15 = vld [vmem:[%s11274_s1 + $0x260] sm:$0xff] }
  0x95   : > { %7013 = vmatmul.mubr.msk.f32.gmra.mrb[2].mxu0 %vm396_vm1, %v5888_v27  ;;  %7067 = vmatmul.mubr.msk.f32.gmra.mrb[2].mxu1 %vm396_vm1, %v5906_v28  ;;  %v5953_v27 = vld [vmem:[%s11274_s1 + $0x168] sm:$0xff]  ;;  %v1730_v28 = vld [vmem:[%s11275_s2 + $0x18] sm:$0xff]  ;;  %v5970_v16 = vld [vmem:[%s11274_s1 + $0x1f0] sm:$0xff] }
  0x96   : > { %7015 = vmatprep.mubr.msk.f32.mxu0 %vm8615_vm0, %v8616_v1  ;;  %7069 = vmatprep.mubr.msk.f32.mxu1 %vm8615_vm0, %v8616_v1 }
  0x97   : > { %7951 = vmatpush3.bf16.msra.mxu1 %v7950_v9  ;;  %7957 = vmatpush3.bf16.msra.mxu0 %v7956_v30  ;;  %v8453_v9 = vunpack.i.h.bf16 %v8451_v6  ;;  %v356_v30 = vld [vmem:[%s11274_s1 + $0x98] sm:$0xff]  ;;  %v5965_v6 = vld [vmem:[%s11274_s1 + $0x1c8] sm:$0xff] }
  0x98   : > { %7958 = vmatprep.subr.bf16.mxu1 %v8614_v0  ;;  %7964 = vmatprep.subr.bf16.mxu0 %v8614_v0 }
  0x99   : > { %7016 = vmatmul.mubr.msk.f32.gmra.mrb[4].mxu0 %vm396_vm1, %v5889_v31  ;;  %7070 = vmatmul.mubr.msk.f32.gmra.mrb[4].mxu1 %vm396_vm1, %v5907_v32  ;;  %v7965_v14 = vpack.c.bf16 %v8453_v9, %v8452_v10  ;;  %v5954_v31 = vld [vmem:[%s11274_s1 + $0x170] sm:$0xff]  ;;  %v1732_v32 = vld [vmem:[%s11275_s2 + $0x28] sm:$0xff]  ;;  %v5967_v10 = vld [vmem:[%s11274_s1 + $0x1d8] sm:$0xff] }
  0x9a   : > { %7018 = vmatprep.mubr.msk.f32.mxu0 %vm8615_vm0, %v8616_v1  ;;  %7080 = vmatprep.mubr.msk.f32.mxu1 %vm8615_vm0, %v8616_v1  ;;  %v6002_v9 = vld [vmem:[%s11274_s1 + $0x248] sm:$0xff] }
  0x9b   : > { %8465 = vset.pattern.permute.xlu1 %v8621_v23  ;;  %8464 = vset.pattern.permute.xlu0 %v8621_v23  ;;  %v6036_v23 = vld [vmem:[%s11274_s1 + $0x2b0] sm:$0xff] }
  0x9c   : > { %1755 = vperm.xlu1 %8465, %v1728_v20   ;;  %1750 = vperm.xlu0 %8464, %v1727_v24   ;;  %v6008_v20 = vld [vmem:[%s11274_s1 + $0x278] sm:$0xff]  ;;  %v6010_v24 = vld [vmem:[%s11274_s1 + $0x288] sm:$0xff] }
  0x9d   : > { %7019 = vmatmul.mubr.msk.f32.gmra.mrb[6].mxu0 %vm396_vm1, %v5890_v36  ;;  %7081 = vmatmul.mubr.msk.f32.vlgmr.msra.gmra.mrb[6].mxu1 %vm396_vm1, %v337_v37  ;;  %v1734_v36 = vld [vmem:[%s11275_s2 + $0x38] sm:$0xff]  ;;  %v1735_v37 = vld [vmem:[%s11275_s2 + $0x40] sm:$0xff] }
  0x9e   : > { %7021 = vmatprep.mubr.msk.f32.mxu0 %vm8615_vm0, %v8616_v1  ;;  %7083 = vmatprep.mubr.msk.f32.mxu1 %vm8615_vm0, %v8616_v1 }
  0x9f   : > { %7960 = vmatpush3.bf16.msra.mxu1 %v7959_v38  ;;  %v5956_v38 = vld [vmem:[%s11274_s1 + $0x180] sm:$0xff] }
  0xa0   : > { %7961 = vmatprep.subr.bf16.mxu1 %v8614_v0  ;;  %1760 = vperm.xlu1 %8465, %v1729_v25   ;;  %v6037_v25 = vld [vmem:[%s11274_s1 + $0x2b8] sm:$0xff] }
  0xa1   : > { %7022 = vmatmul.mubr.msk.f32.gmra.mrb[8].mxu0 %vm396_vm1, %v5891_v41  ;;  %7084 = vmatmul.mubr.msk.f32.gmra.mrb[8].mxu1 %vm396_vm1, %v338_v42  ;;  %v1737_v41 = vld [vmem:[%s11275_s2 + $0x50] sm:$0xff]  ;;  %v5957_v42 = vld [vmem:[%s11274_s1 + $0x188] sm:$0xff] }
  0xa2   : > { %7024 = vmatprep.mubr.msk.f32.mxu0 %vm8615_vm0, %v8616_v1  ;;  %7086 = vmatprep.mubr.msk.f32.mxu1 %vm8615_vm0, %v8616_v1 }
  0xa3   : > { %7963 = vmatpush3.bf16.msra.mxu1 %v7962_v43  ;;  %1765 = vperm.xlu0 %8464, %v1730_v28   ;;  %v5993_v43 = vld [vmem:[%s11274_s1 + $0x200] sm:$0xff]  ;;  %v6012_v28 = vld [vmem:[%s11274_s1 + $0x298] sm:$0xff] }
  0xa4   : > { %7970 = vmatprep.subr.bf16.mxu1 %v8614_v0  ;;  %1770 = vperm.xlu1 %8465, %v1731_v29   ;;  %v6039_v29 = vld [vmem:[%s11274_s1 + $0x2c8] sm:$0xff] }
  0xa5   : > { %7025 = vmatmul.mubr.msk.f32.gmra.mrb[10].mxu0 %vm396_vm1, %v5892_v44  ;;  %7087 = vmatmul.mubr.msk.f32.gmra.mrb[10].mxu1 %vm396_vm1, %v339_v45  ;;  %v1738_v44 = vld [vmem:[%s11275_s2 + $0x58] sm:$0xff]  ;;  %v1739_v45 = vld [vmem:[%s11275_s2 + $0x60] sm:$0xff] }
  0xa6   : > { %7027 = vmatprep.mubr.msk.f32.mxu0 %vm8615_vm0, %v8616_v1  ;;  %7089 = vmatprep.mubr.msk.f32.mxu1 %vm8615_vm0, %v8616_v1 }
  0xa7   : > { %1775 = vperm.xlu0 %8464, %v1732_v32   ;;  %v6042_v32 = vld [vmem:[%s11274_s1 + $0x2e0] sm:$0xff] }
  0xa8   : > { %1780 = vperm.xlu1 %8465, %v1733_v33   ;;  %v6043_v33 = vld [vmem:[%s11274_s1 + $0x2e8] sm:$0xff] }
  0xa9   : > { %7028 = vmatmul.mubr.msk.f32.gmra.mrb[12].mxu0 %vm396_vm1, %v5893_v46  ;;  %7090 = vmatmul.mubr.msk.f32.gmra.mrb[12].mxu1 %vm396_vm1, %v340_v47  ;;  %v5958_v46 = vld [vmem:[%s11274_s1 + $0x190] sm:$0xff]  ;;  %v5994_v47 = vld [vmem:[%s11274_s1 + $0x208] sm:$0xff] }
  0xaa   : > { %7030 = vmatprep.mubr.msk.f32.mxu0 %vm8615_vm0, %v8616_v1  ;;  %7092 = vmatprep.mubr.msk.f32.mxu1 %vm8615_vm0, %v8616_v1 }
  0xab   : > { %1785 = vperm.xlu0 %8464, %v1734_v36   ;;  %v1896_v36 = vld [vmem:[%s11276_s3 + $0x8] sm:$0xff] }
  0xac   : > { %1790 = vperm.xlu1 %8465, %v1735_v37   ;;  %v6098_v37 = vld [vmem:[%s11276_s3 + $0x20] sm:$0xff] }
  0xad   : > { %7031 = vmatmul.mubr.msk.f32.gmra.mrb[14].mxu0 %vm396_vm1, %v5894_v48  ;;  %7093 = vmatmul.mubr.msk.f32.gmra.mrb[14].mxu1 %vm396_vm1, %v341_v49  ;;  %v1740_v48 = vld [vmem:[%s11275_s2 + $0x68] sm:$0xff]  ;;  %v1741_v49 = vld [vmem:[%s11275_s2 + $0x70] sm:$0xff] }
  0xae   : > { %7033 = vmatprep.mubr.msk.f32.mxu0 %vm8615_vm0, %v8616_v1  ;;  %7095 = vmatprep.mubr.msk.f32.mxu1 %vm8615_vm0, %v8616_v1 }
  0xaf   : > { %1795 = vperm.xlu0 %8464, %v1736_v40   ;;  %v6099_v40 = vld [vmem:[%s11276_s3 + $0x28] sm:$0xff] }
  0xb0   : > { %1800 = vperm.xlu1 %8465, %v1737_v41   ;;  %v7978_v41 = vpack.c.bf16 %v6099_v40, %v6098_v37 }
  0xb1   : > { %7034 = vmatmul.mubr.msk.f32.gmra.mrb[16].mxu0 %vm396_vm1, %v5895_v50  ;;  %7096 = vmatmul.mubr.msk.f32.gmra.mrb[16].mxu1 %vm396_vm1, %v342_v51  ;;  %v5959_v50 = vld [vmem:[%s11274_s1 + $0x198] sm:$0xff]  ;;  %v5995_v51 = vld [vmem:[%s11274_s1 + $0x210] sm:$0xff] }
  0xb2   : > { %7036 = vmatprep.mubr.msk.f32.mxu0 %vm8615_vm0, %v8616_v1  ;;  %7098 = vmatprep.mubr.msk.f32.mxu1 %vm8615_vm0, %v8616_v1 }
  0xb3   : > { %1805 = vperm.xlu0 %8464, %v1738_v44   ;;  %v6048_v44 = vld [vmem:[%s11274_s1 + $0x310] sm:$0xff] }
  0xb4   : > { %1810 = vperm.xlu1 %8465, %v1739_v45  }
  0xb5   : > { %7037 = vmatmul.mubr.msk.f32.gmra.mrb[18].mxu0 %vm396_vm1, %v5896_v52  ;;  %7099 = vmatmul.mubr.msk.f32.gmra.mrb[18].mxu1 %vm396_vm1, %v343_v53  ;;  %v1742_v52 = vld [vmem:[%s11275_s2 + $0x78] sm:$0xff]  ;;  %v1743_v53 = vld [vmem:[%s11275_s2 + $0x80] sm:$0xff] }
  0xb6   : > { %7039 = vmatprep.mubr.msk.f32.mxu0 %vm8615_vm0, %v8616_v1  ;;  %7101 = vmatprep.mubr.msk.f32.mxu1 %vm8615_vm0, %v8616_v1 }
  0xb7   : > { %1815 = vperm.xlu0 %8464, %v1740_v48  }
  0xb8   : > { %1820 = vperm.xlu1 %8465, %v1741_v49   ;;  %v6049_v49 = vld [vmem:[%s11274_s1 + $0x318] sm:$0xff] }
  0xb9   : > { %7040 = vmatmul.mubr.msk.f32.gmra.mrb[20].mxu0 %vm396_vm1, %v5897_v54  ;;  %7102 = vmatmul.mubr.msk.f32.gmra.mrb[20].mxu1 %vm396_vm1, %v344_v55  ;;  %v5960_v54 = vld [vmem:[%s11274_s1 + $0x1a0] sm:$0xff]  ;;  %v5996_v55 = vld [vmem:[%s11274_s1 + $0x218] sm:$0xff] }
  0xba   : > { %7042 = vmatprep.mubr.msk.f32.mxu0 %vm8615_vm0, %v8616_v1  ;;  %7104 = vmatprep.mubr.msk.f32.mxu1 %vm8615_vm0, %v8616_v1 }
  0xbb   : > { %1825 = vperm.xlu0 %8464, %v1742_v52  }
  0xbc   : > { %1830 = vperm.xlu1 %8465, %v1743_v53  }
  0xbd   : > { %7043 = vmatmul.mubr.msk.f32.gmra.mrb[22].mxu0 %vm396_vm1, %v5898_v56  ;;  %7105 = vmatmul.mubr.msk.f32.gmra.mrb[22].mxu1 %vm396_vm1, %v345_v57  ;;  %v1744_v56 = vld [vmem:[%s11275_s2 + $0x88] sm:$0xff]  ;;  %v1745_v57 = vld [vmem:[%s11275_s2 + $0x90] sm:$0xff] }
  0xbe   : > { %7045 = vmatprep.mubr.msk.f32.mxu0 %vm8615_vm0, %v8616_v1  ;;  %7107 = vmatprep.mubr.msk.f32.mxu1 %vm8615_vm0, %v8616_v1 }
  0xbf   : > { %1835 = vperm.xlu0 %8464, %v1744_v56  }
  0xc0   : > { %1840 = vperm.xlu1 %8465, %v1745_v57  }
  0xc1   : > { %7046 = vmatmul.mubr.msk.f32.gmra.mrb[24].mxu0 %vm396_vm1, %v5899_v58  ;;  %7108 = vmatmul.mubr.msk.f32.gmra.mrb[24].mxu1 %vm396_vm1, %v346_v59  ;;  %v5961_v58 = vld [vmem:[%s11274_s1 + $0x1a8] sm:$0xff]  ;;  %v5997_v59 = vld [vmem:[%s11274_s1 + $0x220] sm:$0xff] }
  0xc2   : > { %7048 = vmatprep.mubr.msk.f32.mxu0 %vm8615_vm0, %v8616_v1  ;;  %7110 = vmatprep.mubr.msk.f32.mxu1 %vm8615_vm0, %v8616_v1 }
  0xc5   : > { %7049 = vmatmul.mubr.msk.f32.gmra.mrb[26].mxu0 %vm396_vm1, %v5900_v60  ;;  %7111 = vmatmul.mubr.msk.f32.gmra.mrb[26].mxu1 %vm396_vm1, %v347_v61  ;;  %v1746_v60 = vld [vmem:[%s11275_s2 + $0x98] sm:$0xff]  ;;  %v1747_v61 = vld [vmem:[%s11275_s2 + $0xa0] sm:$0xff] }
  0xc6   : > { %7051 = vmatprep.mubr.msk.f32.mxu0 %vm8615_vm0, %v8616_v1  ;;  %7113 = vmatprep.mubr.msk.f32.mxu1 %vm8615_vm0, %v8616_v1 }
  0xc7   : > { %1845 = vperm.xlu0 %8464, %v1746_v60   ;;  %1850 = vperm.xlu1 %8465, %v1747_v61  }
  0xc9   : > { %7052 = vmatmul.mubr.msk.f32.gmra.mrb[28].mxu0 %vm396_vm1, %v5901_v62  ;;  %7114 = vmatmul.mubr.msk.f32.gmra.mrb[28].mxu1 %vm396_vm1, %v348_v63  ;;  %v5962_v62 = vld [vmem:[%s11274_s1 + $0x1b0] sm:$0xff]  ;;  %v5998_v63 = vld [vmem:[%s11274_s1 + $0x228] sm:$0xff] }
  0xca   : > { %7054 = vmatprep.mubr.msk.f32.mxu0 %vm8615_vm0, %v8616_v1  ;;  %7116 = vmatprep.mubr.msk.f32.mxu1 %vm8615_vm0, %v8616_v1 }
  0xcd   : > { %7055 = vmatmul.mubr.msk.f32.gmra.mrb[30].mxu0 %vm396_vm1, %v5902_v2  ;;  %7117 = vmatmul.mubr.msk.f32.gmra.mrb[30].mxu1 %vm396_vm1, %v349_v3  ;;  %v5963_v2 = vld [vmem:[%s11274_s1 + $0x1b8] sm:$0xff]  ;;  %v5999_v3 = vld [vmem:[%s11274_s1 + $0x230] sm:$0xff] }
  0xce   : > { %7057 = vmatprep.mubr.msk.f32.mxu0 %vm8615_vm0, %v8616_v1  ;;  %7119 = vmatprep.mubr.msk.f32.mxu1 %vm8615_vm0, %v8616_v1 }
  0xd1   : > { %7058 = vmatmul.mubr.msk.f32.gmra.mrb[32].mxu0 %vm396_vm1, %v5903_v4  ;;  %7120 = vmatmul.mubr.msk.f32.gmra.mrb[32].mxu1 %vm396_vm1, %v350_v5  ;;  %v5964_v4 = vld [vmem:[%s11274_s1 + $0x1c0] sm:$0xff]  ;;  %v6000_v5 = vld [vmem:[%s11274_s1 + $0x238] sm:$0xff] }
  0xd2   : > { %7060 = vmatprep.mubr.msk.f32.mxu0 %vm8615_vm0, %v8616_v1  ;;  %7122 = vmatprep.mubr.msk.f32.mxu1 %vm8615_vm0, %v8616_v1 }
  0xd5   : > { %7061 = vmatmul.mubr.msk.f32.gmra.mrb[34].mxu0 %vm396_vm1, %v5904_v7  ;;  %7123 = vmatmul.mubr.msk.f32.gmra.mrb[34].mxu1 %vm396_vm1, %v351_v8  ;;  %v6001_v7 = vld [vmem:[%s11274_s1 + $0x240] sm:$0xff]  ;;  %v5966_v8 = vld [vmem:[%s11274_s1 + $0x1d0] sm:$0xff] }
  0xd6   : > { %7125 = vmatprep.mubr.msk.f32.mxu1 %vm8615_vm0, %v8616_v1  ;;  %7151 = vmatprep.mubr.msk.f32.mxu0 %vm8615_vm0, %v8616_v1 }
  0xd9   : > { %7126 = vmatmul.mubr.msk.f32.gmra.mrb[36].mxu1 %vm396_vm1, %v352_v12  ;;  %7152 = vmatmul.mubr.msk.f32.vlgmr.msra.gmra.mrb[36].mxu0 %vm396_vm1, %v5950_v13  ;;  %v5968_v12 = vld [vmem:[%s11274_s1 + $0x1e0] sm:$0xff]  ;;  %v6004_v13 = vld [vmem:[%s11274_s1 + $0x258] sm:$0xff] }
  0xda   : > { %7128 = vmatprep.mubr.msk.f32.mxu1 %vm8615_vm0, %v8616_v1  ;;  %7154 = vmatprep.mubr.msk.f32.mxu0 %vm8615_vm0, %v8616_v1 }
  0xdb   : > { %7966 = vmatpush3.bf16.msra.mxu0 %v7965_v14  ;;  %v5969_v14 = vld [vmem:[%s11274_s1 + $0x1e8] sm:$0xff] }
  0xdc   : > { %7967 = vmatprep.subr.bf16.mxu0 %v8614_v0 }
  0xdd   : > { %7129 = vmatmul.mubr.msk.f32.gmra.mrb[38].mxu1 %vm396_vm1, %v353_v17  ;;  %7155 = vmatmul.mubr.msk.f32.gmra.mrb[38].mxu0 %vm396_vm1, %v5951_v18  ;;  %v6006_v17 = vld [vmem:[%s11274_s1 + $0x268] sm:$0xff]  ;;  %v6007_v18 = vld [vmem:[%s11274_s1 + $0x270] sm:$0xff] }
  0xde   : > { %7131 = vmatprep.mubr.msk.f32.mxu1 %vm8615_vm0, %v8616_v1  ;;  %7157 = vmatprep.mubr.msk.f32.mxu0 %vm8615_vm0, %v8616_v1 }
  0xdf   : > { %7969 = vmatpush3.bf16.msra.mxu0 %v7968_v19  ;;  %v6034_v19 = vld [vmem:[%s11274_s1 + $0x2a0] sm:$0xff] }
  0xe0   : > { %7977 = vmatprep.subr.bf16.mxu0 %v8614_v0 }
  0xe1   : > { %7132 = vmatmul.mubr.msk.f32.gmra.mrb[40].mxu1 %vm396_vm1, %v354_v21  ;;  %7158 = vmatmul.mubr.msk.f32.gmra.mrb[40].mxu0 %vm396_vm1, %v5952_v22  ;;  %v6035_v21 = vld [vmem:[%s11274_s1 + $0x2a8] sm:$0xff]  ;;  %v6009_v22 = vld [vmem:[%s11274_s1 + $0x280] sm:$0xff] }
  0xe2   : > { %7134 = vmatprep.mubr.msk.f32.mxu1 %vm8615_vm0, %v8616_v1  ;;  %7160 = vmatprep.mubr.msk.f32.mxu0 %vm8615_vm0, %v8616_v1 }
  0xe5   : > { %7135 = vmatmul.mubr.msk.f32.gmra.mrb[42].mxu1 %vm396_vm1, %v355_v26  ;;  %7161 = vmatmul.mubr.msk.f32.gmra.mrb[42].mxu0 %vm396_vm1, %v5953_v27  ;;  %v6011_v26 = vld [vmem:[%s11274_s1 + $0x290] sm:$0xff]  ;;  %v6038_v27 = vld [vmem:[%s11274_s1 + $0x2c0] sm:$0xff] }
  0xe6   : > { %7137 = vmatprep.mubr.msk.f32.mxu1 %vm8615_vm0, %v8616_v1  ;;  %7163 = vmatprep.mubr.msk.f32.mxu0 %vm8615_vm0, %v8616_v1 }
  0xe9   : > { %7138 = vmatmul.mubr.msk.f32.gmra.mrb[44].mxu1 %vm396_vm1, %v356_v30  ;;  %7164 = vmatmul.mubr.msk.f32.gmra.mrb[44].mxu0 %vm396_vm1, %v5954_v31  ;;  %v6040_v30 = vld [vmem:[%s11274_s1 + $0x2d0] sm:$0xff]  ;;  %v6041_v31 = vld [vmem:[%s11274_s1 + $0x2d8] sm:$0xff] }
  0xea   : > { %7140 = vmatprep.mubr.msk.f32.mxu1 %vm8615_vm0, %v8616_v1  ;;  %7166 = vmatprep.mubr.msk.f32.mxu0 %vm8615_vm0, %v8616_v1 }
  0xed   : > { %7141 = vmatmul.mubr.msk.f32.gmra.mrb[46].mxu1 %vm396_vm1, %v357_v34  ;;  %7167 = vmatmul.mubr.msk.f32.gmra.mrb[46].mxu0 %vm396_vm1, %v5955_v35  ;;  %v6044_v34 = vld [vmem:[%s11274_s1 + $0x2f0] sm:$0xff]  ;;  %v1895_v35 = vld [vmem:[%s11276_s3] sm:$0xff] }
  0xee   : > { %7169 = vmatprep.mubr.msk.f32.mxu0 %vm8615_vm0, %v8616_v1  ;;  %7222 = vmatprep.mubr.msk.f32.mxu1 %vm8615_vm0, %v8616_v1 }
  0xf1   : > { %7170 = vmatmul.mubr.msk.f32.gmra.mrb[48].mxu0 %vm396_vm1, %v5956_v38  ;;  %7223 = vmatmul.mubr.msk.f32.vlgmr.msra.gmra.mrb[48].mxu1 %vm396_vm1, %v5992_v39  ;;  %v6045_v38 = vld [vmem:[%s11274_s1 + $0x2f8] sm:$0xff]  ;;  %v7971_v39 = vpack.c.bf16 %v1896_v36, %v1895_v35 }
  0xf2   : > { %7172 = vmatprep.mubr.msk.f32.mxu0 %vm8615_vm0, %v8616_v1  ;;  %7225 = vmatprep.mubr.msk.f32.mxu1 %vm8615_vm0, %v8616_v1 }
  0xf3   : > { %7972 = vmatpush3.bf16.msra.mxu1 %v7971_v39 }
  0xf4   : > { %7973 = vmatprep.subr.bf16.mxu1 %v8614_v0 }
  0xf5   : > { %7173 = vmatmul.mubr.msk.f32.gmra.mrb[50].mxu0 %vm396_vm1, %v5957_v42  ;;  %7226 = vmatmul.mubr.msk.f32.gmra.mrb[50].mxu1 %vm396_vm1, %v5993_v43  ;;  %v6046_v42 = vld [vmem:[%s11274_s1 + $0x300] sm:$0xff]  ;;  %v6047_v43 = vld [vmem:[%s11274_s1 + $0x308] sm:$0xff] }
  0xf6   : > { %7175 = vmatprep.mubr.msk.f32.mxu0 %vm8615_vm0, %v8616_v1  ;;  %7228 = vmatprep.mubr.msk.f32.mxu1 %vm8615_vm0, %v8616_v1 }
  0xf9   : > { %7176 = vmatmul.mubr.msk.f32.gmra.mrb[52].mxu0 %vm396_vm1, %v5958_v46  ;;  %7229 = vmatmul.mubr.msk.f32.gmra.mrb[52].mxu1 %vm396_vm1, %v5994_v47 }
  0xfa   : > { %7178 = vmatprep.mubr.msk.f32.mxu0 %vm8615_vm0, %v8616_v1  ;;  %7231 = vmatprep.mubr.msk.f32.mxu1 %vm8615_vm0, %v8616_v1 }
  0xfd   : > { %7179 = vmatmul.mubr.msk.f32.gmra.mrb[54].mxu0 %vm396_vm1, %v5959_v50  ;;  %7232 = vmatmul.mubr.msk.f32.gmra.mrb[54].mxu1 %vm396_vm1, %v5995_v51 }
  0xfe   : > { %7181 = vmatprep.mubr.msk.f32.mxu0 %vm8615_vm0, %v8616_v1  ;;  %7234 = vmatprep.mubr.msk.f32.mxu1 %vm8615_vm0, %v8616_v1 }
 0x101   : > { %7182 = vmatmul.mubr.msk.f32.gmra.mrb[56].mxu0 %vm396_vm1, %v5960_v54  ;;  %7235 = vmatmul.mubr.msk.f32.gmra.mrb[56].mxu1 %vm396_vm1, %v5996_v55  ;;  %v6050_v54 = vld [vmem:[%s11274_s1 + $0x320] sm:$0xff] }
 0x102   : > { %7184 = vmatprep.mubr.msk.f32.mxu0 %vm8615_vm0, %v8616_v1  ;;  %7237 = vmatprep.mubr.msk.f32.mxu1 %vm8615_vm0, %v8616_v1 }
 0x105   : > { %7185 = vmatmul.mubr.msk.f32.gmra.mrb[58].mxu0 %vm396_vm1, %v5961_v58  ;;  %7238 = vmatmul.mubr.msk.f32.gmra.mrb[58].mxu1 %vm396_vm1, %v5997_v59  ;;  %v6051_v59 = vld [vmem:[%s11274_s1 + $0x328] sm:$0xff] }
 0x106   : > { %7187 = vmatprep.mubr.msk.f32.mxu0 %vm8615_vm0, %v8616_v1  ;;  %7240 = vmatprep.mubr.msk.f32.mxu1 %vm8615_vm0, %v8616_v1 }
 0x109   : > { %7188 = vmatmul.mubr.msk.f32.gmra.mrb[60].mxu0 %vm396_vm1, %v5962_v62  ;;  %7241 = vmatmul.mubr.msk.f32.gmra.mrb[60].mxu1 %vm396_vm1, %v5998_v63 }
 0x10a   : > { %7190 = vmatprep.mubr.msk.f32.mxu0 %vm8615_vm0, %v8616_v1  ;;  %7243 = vmatprep.mubr.msk.f32.mxu1 %vm8615_vm0, %v8616_v1 }
 0x10d   : > { %7191 = vmatmul.mubr.msk.f32.gmra.mrb[62].mxu0 %vm396_vm1, %v5963_v2  ;;  %7244 = vmatmul.mubr.msk.f32.gmra.mrb[62].mxu1 %vm396_vm1, %v5999_v3  ;;  %v6052_v3 = vld [vmem:[%s11274_s1 + $0x330] sm:$0xff] }
 0x10e   : > { %7193 = vmatprep.mubr.msk.f32.mxu0 %vm8615_vm0, %v8616_v1  ;;  %7246 = vmatprep.mubr.msk.f32.mxu1 %vm8615_vm0, %v8616_v1 }
 0x111   : > { %7194 = vmatmul.mubr.msk.f32.gmra.mrb[64].mxu0 %vm396_vm1, %v5964_v4  ;;  %7247 = vmatmul.mubr.msk.f32.gmra.mrb[64].mxu1 %vm396_vm1, %v6000_v5 }
 0x112   : > { %7196 = vmatprep.mubr.msk.f32.mxu0 %vm8615_vm0, %v8616_v1  ;;  %7249 = vmatprep.mubr.msk.f32.mxu1 %vm8615_vm0, %v8616_v1 }
 0x115   : > { %7197 = vmatmul.mubr.msk.f32.gmra.mrb[66].mxu0 %vm396_vm1, %v5965_v6  ;;  %7250 = vmatmul.mubr.msk.f32.gmra.mrb[66].mxu1 %vm396_vm1, %v6001_v7 }
 0x116   : > { %7199 = vmatprep.mubr.msk.f32.mxu0 %vm8615_vm0, %v8616_v1  ;;  %7252 = vmatprep.mubr.msk.f32.mxu1 %vm8615_vm0, %v8616_v1 }
 0x119   : > { %7200 = vmatmul.mubr.msk.f32.gmra.mrb[68].mxu0 %vm396_vm1, %v5966_v8  ;;  %7253 = vmatmul.mubr.msk.f32.gmra.mrb[68].mxu1 %vm396_vm1, %v6002_v9  ;;  %v6053_v9 = vld [vmem:[%s11274_s1 + $0x338] sm:$0xff] }
 0x11a   : > { %7202 = vmatprep.mubr.msk.f32.mxu0 %vm8615_vm0, %v8616_v1  ;;  %7255 = vmatprep.mubr.msk.f32.mxu1 %vm8615_vm0, %v8616_v1 }
 0x11d   : > { %7203 = vmatmul.mubr.msk.f32.gmra.mrb[70].mxu0 %vm396_vm1, %v5967_v10  ;;  %7256 = vmatmul.mubr.msk.f32.gmra.mrb[70].mxu1 %vm396_vm1, %v6003_v11 }
 0x11e   : > { %7205 = vmatprep.mubr.msk.f32.mxu0 %vm8615_vm0, %v8616_v1  ;;  %7258 = vmatprep.mubr.msk.f32.mxu1 %vm8615_vm0, %v8616_v1 }
 0x121   : > { %7206 = vmatmul.mubr.msk.f32.gmra.mrb[72].mxu0 %vm396_vm1, %v5968_v12  ;;  %7259 = vmatmul.mubr.msk.f32.gmra.mrb[72].mxu1 %vm396_vm1, %v6004_v13 }
 0x122   : > { %7208 = vmatprep.mubr.msk.f32.mxu0 %vm8615_vm0, %v8616_v1  ;;  %7261 = vmatprep.mubr.msk.f32.mxu1 %vm8615_vm0, %v8616_v1 }
 0x125   : > { %7209 = vmatmul.mubr.msk.f32.gmra.mrb[74].mxu0 %vm396_vm1, %v5969_v14  ;;  %7262 = vmatmul.mubr.msk.f32.gmra.mrb[74].mxu1 %vm396_vm1, %v6005_v15  ;;  %v6054_v15 = vld [vmem:[%s11274_s1 + $0x340] sm:$0xff] }
 0x126   : > { %7211 = vmatprep.mubr.msk.f32.mxu0 %vm8615_vm0, %v8616_v1  ;;  %7264 = vmatprep.mubr.msk.f32.mxu1 %vm8615_vm0, %v8616_v1 }
 0x129   : > { %7212 = vmatmul.mubr.msk.f32.gmra.mrb[76].mxu0 %vm396_vm1, %v5970_v16  ;;  %7265 = vmatmul.mubr.msk.f32.gmra.mrb[76].mxu1 %vm396_vm1, %v6006_v17 }
 0x12a   : > { %7267 = vmatprep.mubr.msk.f32.mxu1 %vm8615_vm0, %v8616_v1  ;;  %7293 = vmatprep.mubr.msk.f32.mxu0 %vm8615_vm0, %v8616_v1 }
 0x12d   : > { %7268 = vmatmul.mubr.msk.f32.gmra.mrb[78].mxu1 %vm396_vm1, %v6007_v18  ;;  %7294 = vmatmul.mubr.msk.f32.vlgmr.msra.gmra.mrb[78].mxu0 %vm396_vm1, %v6034_v19 }
 0x12e   : > { %7270 = vmatprep.mubr.msk.f32.mxu1 %vm8615_vm0, %v8616_v1  ;;  %7296 = vmatprep.mubr.msk.f32.mxu0 %vm8615_vm0, %v8616_v1 }
 0x12f   : > { %7979 = vmatpush3.bf16.msra.mxu0 %v7978_v41 }
 0x130   : > { %7980 = vmatprep.subr.bf16.mxu0 %v8614_v0 }
 0x131   : > { %7271 = vmatmul.mubr.msk.f32.gmra.mrb[80].mxu1 %vm396_vm1, %v6008_v20  ;;  %7297 = vmatmul.mubr.msk.f32.gmra.mrb[80].mxu0 %vm396_vm1, %v6035_v21  ;;  %v1897_v21 = vld [vmem:[%s11276_s3 + $0x10] sm:$0xff] }
 0x132   : > { %7273 = vmatprep.mubr.msk.f32.mxu1 %vm8615_vm0, %v8616_v1  ;;  %7299 = vmatprep.mubr.msk.f32.mxu0 %vm8615_vm0, %v8616_v1 }
 0x135   : > { %7274 = vmatmul.mubr.msk.f32.gmra.mrb[82].mxu1 %vm396_vm1, %v6009_v22  ;;  %7300 = vmatmul.mubr.msk.f32.gmra.mrb[82].mxu0 %vm396_vm1, %v6036_v23  ;;  %v1898_v22 = vld [vmem:[%s11276_s3 + $0x18] sm:$0xf] }
 0x136   : > { %7276 = vmatprep.mubr.msk.f32.mxu1 %vm8615_vm0, %v8616_v1  ;;  %7302 = vmatprep.mubr.msk.f32.mxu0 %vm8615_vm0, %v8616_v1  ;;  %v7974_v23 = vpack.c.bf16 %v1898_v22, %v1897_v21 }
 0x138   : > { %7976 = vmatpush3.bf16.msk.msra.mxu1 %vm9447_vm4, %v7974_v23 }
 0x139   : > { %7277 = vmatmul.mubr.msk.f32.gmra.mrb[84].mxu1 %vm396_vm1, %v6010_v24  ;;  %7303 = vmatmul.mubr.msk.f32.gmra.mrb[84].mxu0 %vm396_vm1, %v6037_v25  ;;  %v6100_v24 = vld [vmem:[%s11276_s3 + $0x30] sm:$0xff]  ;;  %v6101_v25 = vld [vmem:[%s11276_s3 + $0x38] sm:$0xf] }
 0x13a   : > { %7279 = vmatprep.mubr.msk.f32.mxu1 %vm8615_vm0, %v8616_v1  ;;  %7305 = vmatprep.mubr.msk.f32.mxu0 %vm8615_vm0, %v8616_v1 }
 0x13b   : > { %7984 = vmatprep.subr.bf16.mxu1 %v8614_v0 }
 0x13d   : > { %7280 = vmatmul.mubr.msk.f32.gmra.mrb[86].mxu1 %vm396_vm1, %v6011_v26  ;;  %7306 = vmatmul.mubr.msk.f32.gmra.mrb[86].mxu0 %vm396_vm1, %v6038_v27  ;;  %v7981_v27 = vpack.c.bf16 %v6101_v25, %v6100_v24  ;;  %v6341_v26 = vld [vmem:[%s11278_s5 + $0x330] sm:$0xff] }
 0x13e   : > { %7282 = vmatprep.mubr.msk.f32.mxu1 %vm8615_vm0, %v8616_v1  ;;  %7308 = vmatprep.mubr.msk.f32.mxu0 %vm8615_vm0, %v8616_v1 }
 0x13f   : > { %7983 = vmatpush3.bf16.msk.msra.mxu0 %vm9447_vm4, %v7981_v27 }
 0x141   : > { %7283 = vmatmul.mubr.msk.f32.gmra.mrb[88].mxu1 %vm396_vm1, %v6012_v28  ;;  %7309 = vmatmul.mubr.msk.f32.gmra.mrb[88].mxu0 %vm396_vm1, %v6039_v29 }
 0x142   : > { %7311 = vmatprep.mubr.msk.f32.mxu0 %vm8615_vm0, %v8616_v1  ;;  %7364 = vmatprep.mubr.msk.f32.mxu1 %vm8615_vm0, %v8616_v1 }
 0x145   : > { %7312 = vmatmul.mubr.msk.f32.gmra.mrb[90].mxu0 %vm396_vm1, %v6040_v30 }
 0x146   : > { %7314 = vmatprep.mubr.msk.f32.mxu0 %vm8615_vm0, %v8616_v1 }
 0x149   : > { %7315 = vmatmul.mubr.msk.f32.gmra.mrb[92].mxu0 %vm396_vm1, %v6041_v31 }
 0x14a   : > { %7317 = vmatprep.mubr.msk.f32.mxu0 %vm8615_vm0, %v8616_v1 }
 0x14d   : > { %7318 = vmatmul.mubr.msk.f32.gmra.mrb[94].mxu0 %vm396_vm1, %v6042_v32 }
 0x14e   : > { %7320 = vmatprep.mubr.msk.f32.mxu0 %vm8615_vm0, %v8616_v1 }
 0x151   : > { %7321 = vmatmul.mubr.msk.f32.gmra.mrb[96].mxu0 %vm396_vm1, %v6043_v33 }
 0x152   : > { %7323 = vmatprep.mubr.msk.f32.mxu0 %vm8615_vm0, %v8616_v1 }
 0x155   : > { %7324 = vmatmul.mubr.msk.f32.gmra.mrb[98].mxu0 %vm396_vm1, %v6044_v34 }
 0x156   : > { %7326 = vmatprep.mubr.msk.f32.mxu0 %vm8615_vm0, %v8616_v1 }
 0x159   : > { %7327 = vmatmul.mubr.msk.f32.gmra.mrb[100].mxu0 %vm396_vm1, %v6045_v38 }
 0x15a   : > { %7329 = vmatprep.mubr.msk.f32.mxu0 %vm8615_vm0, %v8616_v1 }
 0x15d   : > { %7330 = vmatmul.mubr.msk.f32.gmra.mrb[102].mxu0 %vm396_vm1, %v6046_v42 }
 0x15e   : > { %7332 = vmatprep.mubr.msk.f32.mxu0 %vm8615_vm0, %v8616_v1 }
 0x161   : > { %7333 = vmatmul.mubr.msk.f32.gmra.mrb[104].mxu0 %vm396_vm1, %v6047_v43 }
 0x162   : > { %7335 = vmatprep.mubr.msk.f32.mxu0 %vm8615_vm0, %v8616_v1 }
 0x164   : > { %v526_v45 = vpop.f32.mrb[0].mxu0  ;;  %v9381_v46 = vpop.f32.mrb[0].mxu1 }
 0x165   : > { %v7011_v47 = vpop.f32.mrb[1].mxu0  ;;  %7336 = vmatmul.mubr.msk.f32.gmra.mrb[106].mxu0 %vm396_vm1, %v6048_v44  ;;  %v7065_v48 = vpop.f32.mrb[1].mxu1 }
 0x166   : > { %7338 = vmatprep.mubr.msk.f32.mxu0 %vm8615_vm0, %v8616_v1 }
 0x168   : > { %v531_v50 = vpop.f32.mrb[2].mxu0  ;;  %v9389_v51 = vpop.f32.mrb[2].mxu1 }
 0x169   : > { %v7014_v52 = vpop.f32.mrb[3].mxu0  ;;  %7339 = vmatmul.mubr.msk.f32.gmra.mrb[108].mxu0 %vm396_vm1, %v6049_v49  ;;  %v7068_v53 = vpop.f32.mrb[3].mxu1 }
 0x16a   : > { %7341 = vmatprep.mubr.msk.f32.mxu0 %vm8615_vm0, %v8616_v1 }
 0x16c   : > { %v536_v55 = vpop.f32.mrb[4].mxu0  ;;  %v9397_v56 = vpop.f32.mrb[4].mxu1 }
 0x16d   : > { %v7017_v57 = vpop.f32.mrb[5].mxu0  ;;  %7342 = vmatmul.mubr.msk.f32.gmra.mrb[110].mxu0 %vm396_vm1, %v6050_v54  ;;  %v7071_v58 = vpop.f32.mrb[5].mxu1 }
 0x16e   : > { %7344 = vmatprep.mubr.msk.f32.mxu0 %vm8615_vm0, %v8616_v1 }
 0x170   : > { %v541_v60 = vpop.f32.mrb[6].mxu0  ;;  %v759_v61 = vpop.f32.mrb[6].mxu1 }
 0x171   : > { %v7020_v62 = vpop.f32.mrb[7].mxu0  ;;  %7345 = vmatmul.mubr.msk.f32.gmra.mrb[112].mxu0 %vm396_vm1, %v6051_v59  ;;  %v7082_v63 = vpop.f32.mrb[7].mxu1  ;;  %v9406_v2 = vadd.f32 %v759_v61, %v526_v45 }
 0x172   : > { %7347 = vmatprep.mubr.msk.f32.mxu0 %vm8615_vm0, %v8616_v1 }
 0x174   : > { %v546_v4 = vpop.f32.mrb[8].mxu0  ;;  %v764_v5 = vpop.f32.mrb[8].mxu1 }
 0x175   : > { %v7023_v6 = vpop.f32.mrb[9].mxu0  ;;  %7348 = vmatmul.mubr.msk.f32.gmra.mrb[114].mxu0 %vm396_vm1, %v6052_v3  ;;  %v7085_v7 = vpop.f32.mrb[9].mxu1  ;;  %v9414_v8 = vadd.f32 %v764_v5, %v531_v50 }
 0x176   : > { %7350 = vmatprep.mubr.msk.f32.mxu0 %vm8615_vm0, %v8616_v1 }
 0x178   : > { %v551_v10 = vpop.f32.mrb[10].mxu0  ;;  %v769_v11 = vpop.f32.mrb[10].mxu1 }
 0x179   : > { %v7026_v12 = vpop.f32.mrb[11].mxu0  ;;  %7351 = vmatmul.mubr.msk.f32.gmra.mrb[116].mxu0 %vm396_vm1, %v6053_v9  ;;  %v7088_v13 = vpop.f32.mrb[11].mxu1  ;;  %v9422_v14 = vadd.f32 %v769_v11, %v536_v55 }
 0x17a   : > { %7353 = vmatprep.mubr.msk.f32.mxu0 %vm8615_vm0, %v8616_v1 }
 0x17c   : > { %v556_v16 = vpop.f32.mrb[12].mxu0  ;;  %v774_v17 = vpop.f32.mrb[12].mxu1 }
 0x17d   : > { %v7029_v18 = vpop.f32.mrb[13].mxu0  ;;  %7354 = vmatmul.mubr.msk.f32.gmra.mrb[118].mxu0 %vm396_vm1, %v6054_v15  ;;  %v7091_v19 = vpop.f32.mrb[13].mxu1  ;;  %v9430_v20 = vadd.f32 %v774_v17, %v541_v60 }
 0x17e   : > { %7435 = vmatprep.mubr.msk.f32.mxu0 %vm8615_vm0, %v8616_v1 }
 0x180   : > { %v561_v28 = vpop.f32.mrb[14].mxu0  ;;  %v779_v29 = vpop.f32.mrb[14].mxu1 }
 0x181   : > { %v7032_v30 = vpop.f32.mrb[15].mxu0  ;;  %v7094_v31 = vpop.f32.mrb[15].mxu1  ;;  %v9453_v32 = vadd.f32 %v779_v29, %v546_v4 }
 0x184   : > { %v566_v33 = vpop.f32.mrb[16].mxu0  ;;  %v784_v34 = vpop.f32.mrb[16].mxu1 }
 0x185   : > { %v7035_v35 = vpop.f32.mrb[17].mxu0  ;;  %v7097_v36 = vpop.f32.mrb[17].mxu1  ;;  %v9458_v37 = vadd.f32 %v784_v34, %v551_v10 }
 0x188   : > { %v571_v38 = vpop.f32.mrb[18].mxu0  ;;  %v789_v39 = vpop.f32.mrb[18].mxu1 }
 0x189   : > { %v7038_v40 = vpop.f32.mrb[19].mxu0  ;;  %v7100_v41 = vpop.f32.mrb[19].mxu1  ;;  %v9460_v42 = vadd.f32 %v789_v39, %v556_v16 }
 0x18c   : > { %v576_v43 = vpop.f32.mrb[20].mxu0  ;;  %v794_v44 = vpop.f32.mrb[20].mxu1 }
 0x18d   : > { %v7041_v45 = vpop.f32.mrb[21].mxu0  ;;  %v7103_v47 = vpop.f32.mrb[21].mxu1  ;;  %v9462_v48 = vadd.f32 %v794_v44, %v561_v28 }
 0x190   : > { %v581_v49 = vpop.f32.mrb[22].mxu0  ;;  %v799_v50 = vpop.f32.mrb[22].mxu1 }
 0x191   : > { %v7044_v52 = vpop.f32.mrb[23].mxu0  ;;  %v7106_v53 = vpop.f32.mrb[23].mxu1  ;;  %v9464_v54 = vadd.f32 %v799_v50, %v566_v33 }
 0x194   : > { %v586_v55 = vpop.f32.mrb[24].mxu0  ;;  %v804_v57 = vpop.f32.mrb[24].mxu1 }
 0x195   : > { %v7047_v58 = vpop.f32.mrb[25].mxu0  ;;  %v7109_v59 = vpop.f32.mrb[25].mxu1  ;;  %v9466_v60 = vadd.f32 %v804_v57, %v571_v38 }
 0x198   : > { %v591_v61 = vpop.f32.mrb[26].mxu0  ;;  %v809_v62 = vpop.f32.mrb[26].mxu1 }
 0x199   : > { %v7050_v63 = vpop.f32.mrb[27].mxu0  ;;  %v7112_v3 = vpop.f32.mrb[27].mxu1  ;;  %v9468_v4 = vadd.f32 %v809_v62, %v576_v43 }
 0x19c   : > { %v596_v5 = vpop.f32.mrb[28].mxu0  ;;  %v814_v6 = vpop.f32.mrb[28].mxu1 }
 0x19d   : > { %v7053_v7 = vpop.f32.mrb[29].mxu0  ;;  %v7115_v9 = vpop.f32.mrb[29].mxu1  ;;  %v9470_v10 = vadd.f32 %v814_v6, %v581_v49 }
 0x1a0   : > { %v601_v11 = vpop.f32.mrb[30].mxu0  ;;  %v819_v12 = vpop.f32.mrb[30].mxu1 }
 0x1a1   : > { %v7056_v13 = vpop.f32.mrb[31].mxu0  ;;  %v7118_v15 = vpop.f32.mrb[31].mxu1  ;;  %v9472_v16 = vadd.f32 %v819_v12, %v586_v55 }
 0x1a4   : > { %v606_v17 = vpop.f32.mrb[32].mxu0  ;;  %v824_v18 = vpop.f32.mrb[32].mxu1 }
 0x1a5   : > { %v7059_v19 = vpop.f32.mrb[33].mxu0  ;;  %v7121_v21 = vpop.f32.mrb[33].mxu1  ;;  %v9474_v22 = vadd.f32 %v824_v18, %v591_v61 }
 0x1a8   : > { %v611_v23 = vpop.f32.mrb[34].mxu0  ;;  %v829_v24 = vpop.f32.mrb[34].mxu1 }
 0x1a9   : > { %v7062_v25 = vpop.f32.mrb[35].mxu0  ;;  %v7124_v27 = vpop.f32.mrb[35].mxu1  ;;  %v9476_v28 = vadd.f32 %v829_v24, %v596_v5 }
 0x1ac   : > { %v834_v29 = vpop.f32.mrb[36].mxu1  ;;  %v1026_v30 = vpop.f32.mrb[36].mxu0 }
 0x1ad   : > { %v1130_v31 = vadd.f32 %v1026_v30, %v9406_v2  ;;  %v7153_v33 = vpop.f32.mrb[37].mxu0  ;;  %v7127_v34 = vpop.f32.mrb[37].mxu1  ;;  %v9479_v35 = vadd.f32 %v834_v29, %v601_v11 }
 0x1b0   : > { %v839_v36 = vpop.f32.mrb[38].mxu1  ;;  %v1031_v38 = vpop.f32.mrb[38].mxu0 }
 0x1b1   : > { %v1131_v39 = vadd.f32 %v1031_v38, %v9414_v8  ;;  %v7156_v40 = vpop.f32.mrb[39].mxu0  ;;  %v7130_v41 = vpop.f32.mrb[39].mxu1  ;;  %v9482_v43 = vadd.f32 %v839_v36, %v606_v17 }
 0x1b4   : > { %v844_v44 = vpop.f32.mrb[40].mxu1  ;;  %v1036_v45 = vpop.f32.mrb[40].mxu0 }
 0x1b5   : > { %v1132_v47 = vadd.f32 %v1036_v45, %v9422_v14  ;;  %v7159_v49 = vpop.f32.mrb[41].mxu0  ;;  %v7133_v50 = vpop.f32.mrb[41].mxu1  ;;  %v9485_v52 = vadd.f32 %v844_v44, %v611_v23 }
 0x1b8   : > { %v849_v2 = vpop.f32.mrb[42].mxu1  ;;  %v1041_v53 = vpop.f32.mrb[42].mxu0 }
 0x1b9   : > { %v1133_v55 = vadd.f32 %v1041_v53, %v9430_v20  ;;  %v7162_v57 = vpop.f32.mrb[43].mxu0  ;;  %v7136_v58 = vpop.f32.mrb[43].mxu1  ;;  %v9489_v8 = vadd.f32 %v849_v2, %v9381_v46 }
 0x1bc   : > { %v854_v59 = vpop.f32.mrb[44].mxu1  ;;  %v1046_v61 = vpop.f32.mrb[44].mxu0 }
 0x1bd   : > { %v9492_v62 = vadd.f32 %v854_v59, %v9389_v51  ;;  %v1134_v14 = vadd.f32 %v1046_v61, %v9453_v32  ;;  %v7165_v63 = vpop.f32.mrb[45].mxu0  ;;  %v7139_v3 = vpop.f32.mrb[45].mxu1 }
 0x1c0   : > { %v859_v5 = vpop.f32.mrb[46].mxu1  ;;  %v1051_v6 = vpop.f32.mrb[46].mxu0 }
 0x1c1   : > { %v9496_v7 = vadd.f32 %v859_v5, %v9397_v56  ;;  %v1135_v20 = vadd.f32 %v1051_v6, %v9458_v37  ;;  %v7168_v9 = vpop.f32.mrb[47].mxu0  ;;  %v7142_v11 = vpop.f32.mrb[47].mxu1 }
 0x1c4   : > { %v1056_v46 = vpop.f32.mrb[48].mxu0  ;;  %v1314_v12 = vpop.f32.mrb[48].mxu1 }
 0x1c5   : > { %v1136_v13 = vadd.f32 %v1056_v46, %v9460_v42  ;;  %v9500_v15 = vadd.f32 %v1314_v12, %v1130_v31  ;;  %v7171_v51 = vpop.f32.mrb[49].mxu0  ;;  %v7224_v17 = vpop.f32.mrb[49].mxu1 }
 0x1c8   : > { %v1061_v32 = vpop.f32.mrb[50].mxu0  ;;  %v1319_v18 = vpop.f32.mrb[50].mxu1 }
 0x1c9   : > { %v1137_v19 = vadd.f32 %v1061_v32, %v9462_v48  ;;  %v9503_v21 = vadd.f32 %v1319_v18, %v1131_v39  ;;  %v7174_v56 = vpop.f32.mrb[51].mxu0  ;;  %v7227_v23 = vpop.f32.mrb[51].mxu1 }
 0x1cc   : > { %v1066_v24 = vpop.f32.mrb[52].mxu0  ;;  %v1324_v37 = vpop.f32.mrb[52].mxu1 }
 0x1cd   : > { %v1138_v25 = vadd.f32 %v1066_v24, %v9464_v54  ;;  %v9506_v27 = vadd.f32 %v1324_v37, %v1132_v47  ;;  %v7177_v29 = vpop.f32.mrb[53].mxu0  ;;  %v7230_v42 = vpop.f32.mrb[53].mxu1 }
 0x1d0   : > { %v1071_v30 = vpop.f32.mrb[54].mxu0  ;;  %v1329_v31 = vpop.f32.mrb[54].mxu1 }
 0x1d1   : > { %v1139_v33 = vadd.f32 %v1071_v30, %v9466_v60  ;;  %v9509_v34 = vadd.f32 %v1329_v31, %v1133_v55  ;;  %v7180_v36 = vpop.f32.mrb[55].mxu0  ;;  %v7233_v48 = vpop.f32.mrb[55].mxu1 }
 0x1d4   : > { %v1076_v38 = vpop.f32.mrb[56].mxu0  ;;  %v1334_v39 = vpop.f32.mrb[56].mxu1 }
 0x1d5   : > { %v1140_v40 = vadd.f32 %v1076_v38, %v9468_v4  ;;  %v9512_v41 = vadd.f32 %v1334_v39, %v1134_v14  ;;  %v7183_v44 = vpop.f32.mrb[57].mxu0  ;;  %v7236_v54 = vpop.f32.mrb[57].mxu1 }
 0x1d8   : > { %v1081_v45 = vpop.f32.mrb[58].mxu0  ;;  %v1339_v47 = vpop.f32.mrb[58].mxu1 }
 0x1d9   : > { %v1141_v49 = vadd.f32 %v1081_v45, %v9470_v10  ;;  %v9515_v50 = vadd.f32 %v1339_v47, %v1135_v20  ;;  %v7186_v2 = vpop.f32.mrb[59].mxu0  ;;  %v7239_v60 = vpop.f32.mrb[59].mxu1 }
 0x1dc   : > { %v1086_v53 = vpop.f32.mrb[60].mxu0  ;;  %v1344_v55 = vpop.f32.mrb[60].mxu1 }
 0x1dd   : > { %v1142_v57 = vadd.f32 %v1086_v53, %v9472_v16  ;;  %v9518_v58 = vadd.f32 %v1344_v55, %v1136_v13  ;;  %v7189_v59 = vpop.f32.mrb[61].mxu0  ;;  %v7242_v4 = vpop.f32.mrb[61].mxu1 }
 0x1e0   : > { %v1091_v61 = vpop.f32.mrb[62].mxu0  ;;  %v1349_v14 = vpop.f32.mrb[62].mxu1 }
 0x1e1   : > { %v1143_v63 = vadd.f32 %v1091_v61, %v9474_v22  ;;  %v9521_v3 = vadd.f32 %v1349_v14, %v1137_v19  ;;  %v7192_v5 = vpop.f32.mrb[63].mxu0  ;;  %v7245_v10 = vpop.f32.mrb[63].mxu1 }
 0x1e2   : > { %v1751_v14 = vpop.permute.xlu0 %1750 }
 0x1e4   : > { %v1096_v6 = vpop.f32.mrb[64].mxu0  ;;  %v1354_v20 = vpop.f32.mrb[64].mxu1 }
 0x1e5   : > { %v1144_v9 = vadd.f32 %v1096_v6, %v9476_v28  ;;  %v9524_v11 = vadd.f32 %v1354_v20, %v1138_v25  ;;  %v7195_v46 = vpop.f32.mrb[65].mxu0  ;;  %v7248_v16 = vpop.f32.mrb[65].mxu1 }
 0x1e8   : > { %v1101_v12 = vpop.f32.mrb[66].mxu0  ;;  %v1359_v13 = vpop.f32.mrb[66].mxu1 }
 0x1e9   : > { %v1145_v51 = vadd.f32 %v1101_v12, %v9479_v35  ;;  %v9527_v17 = vadd.f32 %v1359_v13, %v1139_v33  ;;  %v7198_v32 = vpop.f32.mrb[67].mxu0  ;;  %v7251_v22 = vpop.f32.mrb[67].mxu1 }
 0x1ec   : > { %v1106_v18 = vpop.f32.mrb[68].mxu0  ;;  %v1364_v19 = vpop.f32.mrb[68].mxu1 }
 0x1ed   : > { %v1146_v56 = vadd.f32 %v1106_v18, %v9482_v43  ;;  %v9530_v23 = vadd.f32 %v1364_v19, %v1140_v40  ;;  %v7201_v24 = vpop.f32.mrb[69].mxu0  ;;  %v7254_v28 = vpop.f32.mrb[69].mxu1 }
 0x1f0   : > { %v1111_v37 = vpop.f32.mrb[70].mxu0  ;;  %v1369_v25 = vpop.f32.mrb[70].mxu1 }
 0x1f1   : > { %v1147_v29 = vadd.f32 %v1111_v37, %v9485_v52  ;;  %v9533_v42 = vadd.f32 %v1369_v25, %v1141_v49  ;;  %v7204_v30 = vpop.f32.mrb[71].mxu0  ;;  %v7257_v35 = vpop.f32.mrb[71].mxu1 }
 0x1f2   : > { %v1766_v35 = vpop.permute.xlu0 %1765 }
 0x1f4   : > { %v1116_v31 = vpop.f32.mrb[72].mxu0  ;;  %v1374_v33 = vpop.f32.mrb[72].mxu1 }
 0x1f5   : > { %v1148_v36 = vadd.f32 %v1116_v31, %v9489_v8  ;;  %v9536_v48 = vadd.f32 %v1374_v33, %v1142_v57  ;;  %v7207_v38 = vpop.f32.mrb[73].mxu0  ;;  %v7260_v43 = vpop.f32.mrb[73].mxu1 }
 0x1f8   : > { %v1121_v39 = vpop.f32.mrb[74].mxu0  ;;  %v1379_v40 = vpop.f32.mrb[74].mxu1 }
 0x1f9   : > { %v1149_v44 = vadd.f32 %v1121_v39, %v9492_v62  ;;  %v9539_v54 = vadd.f32 %v1379_v40, %v1143_v63  ;;  %v7210_v45 = vpop.f32.mrb[75].mxu0  ;;  %v7263_v52 = vpop.f32.mrb[75].mxu1 }
 0x1fa   : > { %v1756_v63 = vpop.permute.xlu1 %1755 }
 0x1fc   : > { %v1126_v47 = vpop.f32.mrb[76].mxu0  ;;  %v1384_v49 = vpop.f32.mrb[76].mxu1 }
 0x1fd   : > { %v9542_v2 = vadd.f32 %v1126_v47, %v9496_v7  ;;  %v9544_v60 = vadd.f32 %v1384_v49, %v1144_v9  ;;  %v7213_v8 = vpop.f32.mrb[77].mxu0  ;;  %v7266_v53 = vpop.f32.mrb[77].mxu1 }
 0x1fe   : > { %v1761_v19 = vpop.permute.xlu1 %1760 }
 0x200   : > { %v1389_v55 = vpop.f32.mrb[78].mxu1  ;;  %v1602_v57 = vpop.f32.mrb[78].mxu0 }
 0x201   : > { %v9546_v59 = vadd.f32 %v1389_v55, %v1145_v51  ;;  %v1706_v4 = vadd.f32 %v1602_v57, %v9500_v15  ;;  %v7295_v62 = vpop.f32.mrb[79].mxu0  ;;  %v7269_v61 = vpop.f32.mrb[79].mxu1 }
 0x202   : > { %v1771_v45 = vpop.permute.xlu1 %1770  ;;  %v1776_v57 = vpop.permute.xlu0 %1775 }
 0x203   : > { %v1853_v5 = vadd.f32 %v1751_v14, %v1706_v4 }
 0x204   : > { %v1394_v10 = vpop.f32.mrb[80].mxu1  ;;  %v1607_v6 = vpop.f32.mrb[80].mxu0 }
 0x205   : > { %v1874_v7 = vmax.f32 %v1853_v5, 0.0  ;;  %v9549_v20 = vadd.f32 %v1394_v10, %v1146_v56  ;;  %v1707_v9 = vadd.f32 %v1607_v6, %v9503_v21  ;;  %v7298_v46 = vpop.f32.mrb[81].mxu0  ;;  %v7272_v16 = vpop.f32.mrb[81].mxu1 }
 0x207   : > { %v1854_v12 = vadd.f32 %v1756_v63, %v1707_v9  ;;  %7365 = vmatmul.mubr.msk.f32.vlgmr.msra.gmra.mrb[90].mxu1 %vm1899_vm5, %v1874_v7  ;;  %7436 = vmatmul.mubr.msk.f32.vlgmr.msra.gmra.mrb[120].mxu0 %vm1899_vm5, %v1874_v7  ;;  %v1786_v9 = vpop.permute.xlu0 %1785 }
 0x208   : > { %v1399_v15 = vpop.f32.mrb[82].mxu1  ;;  %v1612_v13 = vpop.f32.mrb[82].mxu0  ;;  %7367 = vmatprep.mubr.msk.f32.mxu1 %vm8615_vm0, %v8616_v1  ;;  %7438 = vmatprep.mubr.msk.f32.mxu0 %vm8615_vm0, %v8616_v1 }
 0x209   : > { %v1875_v51 = vmax.f32 %v1854_v12, 0.0  ;;  %v9558_v32 = vadd.f32 %v1399_v15, %v1147_v29  ;;  %v1708_v21 = vadd.f32 %v1612_v13, %v9506_v27  ;;  %v7301_v22 = vpop.f32.mrb[83].mxu0  ;;  %v7275_v18 = vpop.f32.mrb[83].mxu1 }
 0x20b   : > { %v1855_v56 = vadd.f32 %v1761_v19, %v1708_v21  ;;  %7368 = vmatmul.mubr.msk.f32.gmra.mrb[92].mxu1 %vm1899_vm5, %v1875_v51  ;;  %7439 = vmatmul.mubr.msk.f32.gmra.mrb[122].mxu0 %vm1899_vm5, %v1875_v51  ;;  %v1796_v19 = vpop.permute.xlu0 %1795 }
 0x20c   : > { %v1404_v24 = vpop.f32.mrb[84].mxu1  ;;  %v1617_v28 = vpop.f32.mrb[84].mxu0  ;;  %7370 = vmatprep.mubr.msk.f32.mxu1 %vm8615_vm0, %v8616_v1  ;;  %7441 = vmatprep.mubr.msk.f32.mxu0 %vm8615_vm0, %v8616_v1 }
 0x20d   : > { %v1876_v37 = vmax.f32 %v1855_v56, 0.0  ;;  %v9567_v25 = vadd.f32 %v1404_v24, %v1148_v36  ;;  %v1709_v27 = vadd.f32 %v1617_v28, %v9509_v34  ;;  %v7304_v29 = vpop.f32.mrb[85].mxu0  ;;  %v7278_v30 = vpop.f32.mrb[85].mxu1 }
 0x20f   : > { %v1856_v31 = vadd.f32 %v1766_v35, %v1709_v27  ;;  %7371 = vmatmul.mubr.msk.f32.gmra.mrb[94].mxu1 %vm1899_vm5, %v1876_v37  ;;  %7442 = vmatmul.mubr.msk.f32.gmra.mrb[124].mxu0 %vm1899_vm5, %v1876_v37 }
 0x210   : > { %v1409_v33 = vpop.f32.mrb[86].mxu1  ;;  %v1622_v38 = vpop.f32.mrb[86].mxu0  ;;  %7373 = vmatprep.mubr.msk.f32.mxu1 %vm8615_vm0, %v8616_v1  ;;  %7444 = vmatprep.mubr.msk.f32.mxu0 %vm8615_vm0, %v8616_v1 }
 0x211   : > { %v1877_v36 = vmax.f32 %v1856_v31, 0.0  ;;  %v9576_v43 = vadd.f32 %v1409_v33, %v1149_v44  ;;  %v1710_v34 = vadd.f32 %v1622_v38, %v9512_v41  ;;  %v7307_v39 = vpop.f32.mrb[87].mxu0  ;;  %v7281_v40 = vpop.f32.mrb[87].mxu1 }
 0x212   : > { %v1806_v33 = vpop.permute.xlu0 %1805 }
 0x213   : > { %v1857_v52 = vadd.f32 %v1771_v45, %v1710_v34  ;;  %7374 = vmatmul.mubr.msk.f32.gmra.mrb[96].mxu1 %vm1899_vm5, %v1877_v36  ;;  %7445 = vmatmul.mubr.msk.f32.gmra.mrb[126].mxu0 %vm1899_vm5, %v1877_v36 }
 0x214   : > { %v1414_v47 = vpop.f32.mrb[88].mxu1  ;;  %v1627_v49 = vpop.f32.mrb[88].mxu0  ;;  %7376 = vmatprep.mubr.msk.f32.mxu1 %vm8615_vm0, %v8616_v1  ;;  %7447 = vmatprep.mubr.msk.f32.mxu0 %vm8615_vm0, %v8616_v1 }
 0x215   : > { %v1878_v44 = vmax.f32 %v1857_v52, 0.0  ;;  %v9586_v8 = vadd.f32 %v1414_v47, %v9542_v2  ;;  %v1711_v41 = vadd.f32 %v1627_v49, %v9515_v50  ;;  %v7310_v53 = vpop.f32.mrb[89].mxu0  ;;  %v7284_v55 = vpop.f32.mrb[89].mxu1 }
 0x216   : > { %v1781_v50 = vpop.permute.xlu1 %1780 }
 0x217   : > { %v1858_v4 = vadd.f32 %v1776_v57, %v1711_v41  ;;  %7377 = vmatmul.mubr.msk.f32.gmra.mrb[98].mxu1 %vm1899_vm5, %v1878_v44  ;;  %7448 = vmatmul.mubr.msk.f32.gmra.mrb[128].mxu0 %vm1899_vm5, %v1878_v44  ;;  %v1816_v44 = vpop.permute.xlu0 %1815 }
 0x218   : > { %v1632_v62 = vpop.f32.mrb[90].mxu0  ;;  %7379 = vmatprep.mubr.msk.f32.mxu1 %vm8615_vm0, %v8616_v1  ;;  %7450 = vmatprep.mubr.msk.f32.mxu0 %vm8615_vm0, %v8616_v1 }
 0x219   : > { %v1879_v61 = vmax.f32 %v1858_v4, 0.0  ;;  %v1712_v2 = vadd.f32 %v1632_v62, %v9518_v58  ;;  %v7313_v14 = vpop.f32.mrb[91].mxu0 }
 0x21a   : > { %v1791_v13 = vpop.permute.xlu1 %1790 }
 0x21b   : > { %v1859_v63 = vadd.f32 %v1781_v50, %v1712_v2  ;;  %7380 = vmatmul.mubr.msk.f32.gmra.mrb[100].mxu1 %vm1899_vm5, %v1879_v61  ;;  %7451 = vmatmul.mubr.msk.f32.gmra.mrb[130].mxu0 %vm1899_vm5, %v1879_v61  ;;  %v1826_v50 = vpop.permute.xlu0 %1825 }
 0x21c   : > { %v1637_v5 = vpop.f32.mrb[92].mxu0  ;;  %7382 = vmatprep.mubr.msk.f32.mxu1 %vm8615_vm0, %v8616_v1  ;;  %7453 = vmatprep.mubr.msk.f32.mxu0 %vm8615_vm0, %v8616_v1 }
 0x21d   : > { %v1880_v10 = vmax.f32 %v1859_v63, 0.0  ;;  %v1713_v6 = vadd.f32 %v1637_v5, %v9521_v3  ;;  %v7316_v7 = vpop.f32.mrb[93].mxu0 }
 0x21e   : > { %v1801_v27 = vpop.permute.xlu1 %1800 }
 0x21f   : > { %v1860_v58 = vadd.f32 %v1786_v9, %v1713_v6  ;;  %7383 = vmatmul.mubr.msk.f32.gmra.mrb[102].mxu1 %vm1899_vm5, %v1880_v10  ;;  %7454 = vmatmul.mubr.msk.f32.gmra.mrb[132].mxu0 %vm1899_vm5, %v1880_v10 }
 0x220   : > { %v1642_v46 = vpop.f32.mrb[94].mxu0  ;;  %7385 = vmatprep.mubr.msk.f32.mxu1 %vm8615_vm0, %v8616_v1  ;;  %7456 = vmatprep.mubr.msk.f32.mxu0 %vm8615_vm0, %v8616_v1 }
 0x221   : > { %v1881_v16 = vmax.f32 %v1860_v58, 0.0  ;;  %v1714_v12 = vadd.f32 %v1642_v46, %v9524_v11  ;;  %v7319_v15 = vpop.f32.mrb[95].mxu0 }
 0x222   : > { %v1811_v40 = vpop.permute.xlu1 %1810 }
 0x223   : > { %v1861_v3 = vadd.f32 %v1791_v13, %v1714_v12  ;;  %7386 = vmatmul.mubr.msk.f32.gmra.mrb[104].mxu1 %vm1899_vm5, %v1881_v16  ;;  %7457 = vmatmul.mubr.msk.f32.gmra.mrb[134].mxu0 %vm1899_vm5, %v1881_v16  ;;  %v1836_v12 = vpop.permute.xlu0 %1835 }
 0x224   : > { %v1647_v51 = vpop.f32.mrb[96].mxu0  ;;  %7388 = vmatprep.mubr.msk.f32.mxu1 %vm8615_vm0, %v8616_v1  ;;  %7459 = vmatprep.mubr.msk.f32.mxu0 %vm8615_vm0, %v8616_v1 }
 0x225   : > { %v1882_v21 = vmax.f32 %v1861_v3, 0.0  ;;  %v1715_v22 = vadd.f32 %v1647_v51, %v9527_v17  ;;  %v7322_v18 = vpop.f32.mrb[97].mxu0 }
 0x226   : > { %v1821_v4 = vpop.permute.xlu1 %1820 }
 0x227   : > { %v1862_v11 = vadd.f32 %v1796_v19, %v1715_v22  ;;  %7389 = vmatmul.mubr.msk.f32.gmra.mrb[106].mxu1 %vm1899_vm5, %v1882_v21  ;;  %7460 = vmatmul.mubr.msk.f32.gmra.mrb[136].mxu0 %vm1899_vm5, %v1882_v21 }
 0x228   : > { %v1652_v56 = vpop.f32.mrb[98].mxu0  ;;  %7391 = vmatprep.mubr.msk.f32.mxu1 %vm8615_vm0, %v8616_v1  ;;  %7462 = vmatprep.mubr.msk.f32.mxu0 %vm8615_vm0, %v8616_v1 }
 0x229   : > { %v1883_v24 = vmax.f32 %v1862_v11, 0.0  ;;  %v1716_v28 = vadd.f32 %v1652_v56, %v9530_v23  ;;  %v7325_v37 = vpop.f32.mrb[99].mxu0  ;;  %v1846_v56 = vpop.permute.xlu0 %1845 }
 0x22a   : > { %v1831_v7 = vpop.permute.xlu1 %1830 }
 0x22b   : > { %v1863_v17 = vadd.f32 %v1801_v27, %v1716_v28  ;;  %7392 = vmatmul.mubr.msk.f32.gmra.mrb[108].mxu1 %vm1899_vm5, %v1883_v24  ;;  %7463 = vmatmul.mubr.msk.f32.gmra.mrb[138].mxu0 %vm1899_vm5, %v1883_v24 }
 0x22c   : > { %v1657_v29 = vpop.f32.mrb[100].mxu0  ;;  %7394 = vmatprep.mubr.msk.f32.mxu1 %vm8615_vm0, %v8616_v1  ;;  %7465 = vmatprep.mubr.msk.f32.mxu0 %vm8615_vm0, %v8616_v1 }
 0x22d   : > { %v1884_v30 = vmax.f32 %v1863_v17, 0.0  ;;  %v1717_v35 = vadd.f32 %v1657_v29, %v9533_v42  ;;  %v7328_v31 = vpop.f32.mrb[101].mxu0 }
 0x22e   : > { %v1841_v21 = vpop.permute.xlu1 %1840 }
 0x22f   : > { %v1864_v23 = vadd.f32 %v1806_v33, %v1717_v35  ;;  %7395 = vmatmul.mubr.msk.f32.gmra.mrb[110].mxu1 %vm1899_vm5, %v1884_v30  ;;  %7466 = vmatmul.mubr.msk.f32.gmra.mrb[140].mxu0 %vm1899_vm5, %v1884_v30 }
 0x230   : > { %v1662_v38 = vpop.f32.mrb[102].mxu0  ;;  %7397 = vmatprep.mubr.msk.f32.mxu1 %vm8615_vm0, %v8616_v1  ;;  %7468 = vmatprep.mubr.msk.f32.mxu0 %vm8615_vm0, %v8616_v1 }
 0x231   : > { %v1885_v36 = vmax.f32 %v1864_v23, 0.0  ;;  %v1718_v34 = vadd.f32 %v1662_v38, %v9536_v48  ;;  %v7331_v39 = vpop.f32.mrb[103].mxu0 }
 0x232   : > { %v1851_v17 = vpop.permute.xlu1 %1850 }
 0x233   : > { %v1865_v42 = vadd.f32 %v1811_v40, %v1718_v34  ;;  %7398 = vmatmul.mubr.msk.f32.gmra.mrb[112].mxu1 %vm1899_vm5, %v1885_v36  ;;  %7469 = vmatmul.mubr.msk.f32.gmra.mrb[142].mxu0 %vm1899_vm5, %v1885_v36 }
 0x234   : > { %v1667_v45 = vpop.f32.mrb[104].mxu0  ;;  %7400 = vmatprep.mubr.msk.f32.mxu1 %vm8615_vm0, %v8616_v1  ;;  %7471 = vmatprep.mubr.msk.f32.mxu0 %vm8615_vm0, %v8616_v1 }
 0x235   : > { %v1886_v52 = vmax.f32 %v1865_v42, 0.0  ;;  %v1719_v47 = vadd.f32 %v1667_v45, %v9539_v54  ;;  %v7334_v49 = vpop.f32.mrb[105].mxu0 }
 0x237   : > { %v1866_v48 = vadd.f32 %v1816_v44, %v1719_v47  ;;  %7401 = vmatmul.mubr.msk.f32.gmra.mrb[114].mxu1 %vm1899_vm5, %v1886_v52  ;;  %7472 = vmatmul.mubr.msk.f32.gmra.mrb[144].mxu0 %vm1899_vm5, %v1886_v52 }
 0x238   : > { %v1672_v41 = vpop.f32.mrb[106].mxu0  ;;  %7403 = vmatprep.mubr.msk.f32.mxu1 %vm8615_vm0, %v8616_v1  ;;  %7474 = vmatprep.mubr.msk.f32.mxu0 %vm8615_vm0, %v8616_v1 }
 0x239   : > { %v1887_v53 = vmax.f32 %v1866_v48, 0.0  ;;  %v1720_v55 = vadd.f32 %v1672_v41, %v9544_v60  ;;  %v7337_v57 = vpop.f32.mrb[107].mxu0 }
 0x23b   : > { %v1867_v54 = vadd.f32 %v1821_v4, %v1720_v55  ;;  %7404 = vmatmul.mubr.msk.f32.gmra.mrb[116].mxu1 %vm1899_vm5, %v1887_v53  ;;  %7475 = vmatmul.mubr.msk.f32.gmra.mrb[146].mxu0 %vm1899_vm5, %v1887_v53 }
 0x23c   : > { %v1677_v62 = vpop.f32.mrb[108].mxu0  ;;  %7406 = vmatprep.mubr.msk.f32.mxu1 %vm8615_vm0, %v8616_v1  ;;  %7477 = vmatprep.mubr.msk.f32.mxu0 %vm8615_vm0, %v8616_v1 }
 0x23d   : > { %v1888_v61 = vmax.f32 %v1867_v54, 0.0  ;;  %v1721_v2 = vadd.f32 %v1677_v62, %v9546_v59  ;;  %v7340_v14 = vpop.f32.mrb[109].mxu0 }
 0x23f   : > { %v1868_v60 = vadd.f32 %v1826_v50, %v1721_v2  ;;  %7407 = vmatmul.mubr.msk.f32.gmra.mrb[118].mxu1 %vm1899_vm5, %v1888_v61  ;;  %7478 = vmatmul.mubr.msk.f32.gmra.mrb[148].mxu0 %vm1899_vm5, %v1888_v61 }
 0x240   : > { %v1682_v63 = vpop.f32.mrb[110].mxu0  ;;  %7409 = vmatprep.mubr.msk.f32.mxu1 %vm8615_vm0, %v8616_v1  ;;  %7480 = vmatprep.mubr.msk.f32.mxu0 %vm8615_vm0, %v8616_v1 }
 0x241   : > { %v1889_v5 = vmax.f32 %v1868_v60, 0.0  ;;  %v1722_v10 = vadd.f32 %v1682_v63, %v9549_v20  ;;  %v7343_v6 = vpop.f32.mrb[111].mxu0 }
 0x243   : > { %v1869_v59 = vadd.f32 %v1831_v7, %v1722_v10  ;;  %7410 = vmatmul.mubr.msk.f32.gmra.mrb[120].mxu1 %vm1899_vm5, %v1889_v5  ;;  %7481 = vmatmul.mubr.msk.f32.gmra.mrb[150].mxu0 %vm1899_vm5, %v1889_v5 }
 0x244   : > { %v1687_v9 = vpop.f32.mrb[112].mxu0  ;;  %7412 = vmatprep.mubr.msk.f32.mxu1 %vm8615_vm0, %v8616_v1  ;;  %7483 = vmatprep.mubr.msk.f32.mxu0 %vm8615_vm0, %v8616_v1 }
 0x245   : > { %v1890_v58 = vmax.f32 %v1869_v59, 0.0  ;;  %v1723_v46 = vadd.f32 %v1687_v9, %v9558_v32  ;;  %v7346_v16 = vpop.f32.mrb[113].mxu0 }
 0x247   : > { %v1870_v20 = vadd.f32 %v1836_v12, %v1723_v46  ;;  %7413 = vmatmul.mubr.msk.f32.gmra.mrb[122].mxu1 %vm1899_vm5, %v1890_v58  ;;  %7484 = vmatmul.mubr.msk.f32.gmra.mrb[152].mxu0 %vm1899_vm5, %v1890_v58 }
 0x248   : > { %v1692_v15 = vpop.f32.mrb[114].mxu0  ;;  %7415 = vmatprep.mubr.msk.f32.mxu1 %vm8615_vm0, %v8616_v1  ;;  %7486 = vmatprep.mubr.msk.f32.mxu0 %vm8615_vm0, %v8616_v1 }
 0x249   : > { %v1891_v13 = vmax.f32 %v1870_v20, 0.0  ;;  %v1724_v3 = vadd.f32 %v1692_v15, %v9567_v25  ;;  %v7349_v51 = vpop.f32.mrb[115].mxu0 }
 0x24b   : > { %v1871_v32 = vadd.f32 %v1841_v21, %v1724_v3  ;;  %7416 = vmatmul.mubr.msk.f32.gmra.mrb[124].mxu1 %vm1899_vm5, %v1891_v13  ;;  %7487 = vmatmul.mubr.msk.f32.gmra.mrb[154].mxu0 %vm1899_vm5, %v1891_v13 }
 0x24c   : > { %v1697_v22 = vpop.f32.mrb[116].mxu0  ;;  %7418 = vmatprep.mubr.msk.f32.mxu1 %vm8615_vm0, %v8616_v1  ;;  %7489 = vmatprep.mubr.msk.f32.mxu0 %vm8615_vm0, %v8616_v1 }
 0x24d   : > { %v1892_v18 = vmax.f32 %v1871_v32, 0.0  ;;  %v1725_v19 = vadd.f32 %v1697_v22, %v9576_v43  ;;  %v7352_v11 = vpop.f32.mrb[117].mxu0 }
 0x24f   : > { %v1872_v25 = vadd.f32 %v1846_v56, %v1725_v19  ;;  %7419 = vmatmul.mubr.msk.f32.gmra.mrb[126].mxu1 %vm1899_vm5, %v1892_v18  ;;  %7490 = vmatmul.mubr.msk.f32.gmra.mrb[156].mxu0 %vm1899_vm5, %v1892_v18 }
 0x250   : > { %v1702_v24 = vpop.f32.mrb[118].mxu0  ;;  %7421 = vmatprep.mubr.msk.f32.mxu1 %vm8615_vm0, %v8616_v1  ;;  %7492 = vmatprep.mubr.msk.f32.mxu0 %vm8615_vm0, %v8616_v1 }
 0x251   : > { %v1893_v28 = vmax.f32 %v1872_v25, 0.0  ;;  %v1726_v37 = vadd.f32 %v1702_v24, %v9586_v8  ;;  %v7355_v27 = vpop.f32.mrb[119].mxu0  ;;  %v2337_v8 = vld [vmem:[%s11277_s4 + $0x8] sm:$0xff] }
 0x253   : > { %v1873_v43 = vadd.f32 %v1851_v17, %v1726_v37  ;;  %7422 = vmatmul.mubr.msk.f32.gmra.mrb[128].mxu1 %vm1899_vm5, %v1893_v28  ;;  %7493 = vmatmul.mubr.msk.f32.gmra.mrb[158].mxu0 %vm1899_vm5, %v1893_v28 }
 0x254   : > { %7424 = vmatprep.mubr.msk.f32.mxu1 %vm8615_vm0, %v8616_v1  ;;  %7495 = vmatprep.mubr.msk.f32.mxu0 %vm8615_vm0, %v8616_v1 }
 0x255   : > { %v1894_v29 = vmax.f32 %v1873_v43, 0.0 }
 0x257   : > { %7425 = vmatmul.mubr.msk.f32.gmra.mrb[130].mxu1 %vm1899_vm5, %v1894_v29  ;;  %7496 = vmatmul.mubr.msk.f32.gmra.mrb[160].mxu0 %vm1899_vm5, %v1894_v29 }
 0x258   : > { %6124 = vmatprep.mubr.msk.f32.mxu1 %vm2364_vm6, %v2337_v8 }
 0x2da   : > { %v2033_v30 = vpop.f32.mrb[90].mxu1  ;;  %v2211_v35 = vpop.f32.mrb[120].mxu0 }
 0x2db   : > { %v2315_v31 = vmax.f32 %v2033_v30, %v2211_v35  ;;  %v7366_v33 = vpop.f32.mrb[91].mxu1  ;;  %v7437_v23 = vpop.f32.mrb[121].mxu0 }
 0x2de   : > { %v2038_v38 = vpop.f32.mrb[92].mxu1  ;;  %v2216_v36 = vpop.f32.mrb[122].mxu0 }
 0x2df   : > { %v2316_v34 = vmax.f32 %v2038_v38, %v2216_v36  ;;  %v7369_v39 = vpop.f32.mrb[93].mxu1  ;;  %v7440_v40 = vpop.f32.mrb[123].mxu0 }
 0x2e1   : > { %v9706_v42 = vpack.c.bf16 %v2316_v34, %v2315_v31 }
 0x2e2   : > { %v2043_v45 = vpop.f32.mrb[94].mxu1  ;;  %v2221_v52 = vpop.f32.mrb[124].mxu0 }
 0x2e3   : > { %v2317_v47 = vmax.f32 %v2043_v45, %v2221_v52  ;;  %v7372_v49 = vpop.f32.mrb[95].mxu1  ;;  %v7443_v44 = vpop.f32.mrb[125].mxu0  ;;  %7986 = vmatpush1.bf16.msra.mxu1 %v9706_v42 }
 0x2e4   : > { %7987 = vmatprep.subr.bf16.mxu1 %v8614_v0 }
 0x2e6   : > { %v2048_v48 = vpop.f32.mrb[96].mxu1  ;;  %v2226_v41 = vpop.f32.mrb[126].mxu0 }
 0x2e7   : > { %v2318_v53 = vmax.f32 %v2048_v48, %v2226_v41  ;;  %v7375_v55 = vpop.f32.mrb[97].mxu1  ;;  %v7446_v57 = vpop.f32.mrb[127].mxu0 }
 0x2e9   : > { %v9710_v4 = vpack.c.bf16 %v2318_v53, %v2317_v47 }
 0x2ea   : > { %v2053_v54 = vpop.f32.mrb[98].mxu1  ;;  %v2231_v62 = vpop.f32.mrb[128].mxu0 }
 0x2eb   : > { %v2319_v61 = vmax.f32 %v2053_v54, %v2231_v62  ;;  %v7378_v2 = vpop.f32.mrb[99].mxu1  ;;  %v7449_v14 = vpop.f32.mrb[129].mxu0  ;;  %7989 = vmatpush1.bf16.msra.mxu1 %v9710_v4 }
 0x2ec   : > { %7990 = vmatprep.subr.bf16.mxu1 %v8614_v0 }
 0x2ee   : > { %v2058_v50 = vpop.f32.mrb[100].mxu1  ;;  %v2236_v60 = vpop.f32.mrb[130].mxu0 }
 0x2ef   : > { %v2320_v63 = vmax.f32 %v2058_v50, %v2236_v60  ;;  %v7381_v5 = vpop.f32.mrb[101].mxu1  ;;  %v7452_v10 = vpop.f32.mrb[131].mxu0 }
 0x2f1   : > { %v9714_v6 = vpack.c.bf16 %v2320_v63, %v2319_v61 }
 0x2f2   : > { %v2063_v7 = vpop.f32.mrb[102].mxu1  ;;  %v2241_v59 = vpop.f32.mrb[132].mxu0 }
 0x2f3   : > { %v2321_v9 = vmax.f32 %v2063_v7, %v2241_v59  ;;  %v7384_v58 = vpop.f32.mrb[103].mxu1  ;;  %v7455_v46 = vpop.f32.mrb[133].mxu0  ;;  %7992 = vmatpush1.bf16.msra.mxu1 %v9714_v6 }
 0x2f4   : > { %7993 = vmatprep.subr.bf16.mxu1 %v8614_v0 }
 0x2f6   : > { %v2068_v16 = vpop.f32.mrb[104].mxu1  ;;  %v2246_v12 = vpop.f32.mrb[134].mxu0 }
 0x2f7   : > { %v2322_v20 = vmax.f32 %v2068_v16, %v2246_v12  ;;  %v7387_v15 = vpop.f32.mrb[105].mxu1  ;;  %v7458_v13 = vpop.f32.mrb[135].mxu0 }
 0x2f9   : > { %v9718_v3 = vpack.c.bf16 %v2322_v20, %v2321_v9 }
 0x2fa   : > { %v2073_v51 = vpop.f32.mrb[106].mxu1  ;;  %v2251_v21 = vpop.f32.mrb[136].mxu0 }
 0x2fb   : > { %v2323_v32 = vmax.f32 %v2073_v51, %v2251_v21  ;;  %v7390_v22 = vpop.f32.mrb[107].mxu1  ;;  %v7461_v18 = vpop.f32.mrb[137].mxu0  ;;  %7995 = vmatpush1.bf16.msra.mxu1 %v9718_v3 }
 0x2fc   : > { %7996 = vmatprep.subr.bf16.mxu1 %v8614_v0 }
 0x2fe   : > { %v2078_v19 = vpop.f32.mrb[108].mxu1  ;;  %v2256_v11 = vpop.f32.mrb[138].mxu0 }
 0x2ff   : > { %v2324_v56 = vmax.f32 %v2078_v19, %v2256_v11  ;;  %v7393_v25 = vpop.f32.mrb[109].mxu1  ;;  %v7464_v24 = vpop.f32.mrb[139].mxu0 }
 0x301   : > { %v9722_v28 = vpack.c.bf16 %v2324_v56, %v2323_v32 }
 0x302   : > { %v2083_v37 = vpop.f32.mrb[110].mxu1  ;;  %v2261_v27 = vpop.f32.mrb[140].mxu0 }
 0x303   : > { %v2325_v17 = vmax.f32 %v2083_v37, %v2261_v27  ;;  %v7396_v43 = vpop.f32.mrb[111].mxu1  ;;  %v7467_v29 = vpop.f32.mrb[141].mxu0  ;;  %7998 = vmatpush1.bf16.msra.mxu1 %v9722_v28 }
 0x304   : > { %7999 = vmatprep.subr.bf16.mxu1 %v8614_v0  ;;  %v2336_v29 = vld [vmem:[%s11277_s4] sm:$0xff] }
 0x306   : > { %v2088_v8 = vpop.f32.mrb[112].mxu1  ;;  %v2266_v30 = vpop.f32.mrb[142].mxu0 }
 0x307   : > { %v2326_v35 = vmax.f32 %v2088_v8, %v2266_v30  ;;  %v7399_v31 = vpop.f32.mrb[113].mxu1  ;;  %v7470_v33 = vpop.f32.mrb[143].mxu0  ;;  %v2339_v8 = vld [vmem:[%s11277_s4 + $0x18] sm:$0xff]  ;;  %v2338_v30 = vld [vmem:[%s11277_s4 + $0x10] sm:$0xff] }
 0x308   : > { %v2343_v31 = vld [vmem:[%s11277_s4 + $0x38] sm:$0xff]  ;;  %v2345_v33 = vld [vmem:[%s11277_s4 + $0x48] sm:$0xff] }
 0x309   : > { %v9726_v23 = vpack.c.bf16 %v2326_v35, %v2325_v17  ;;  %v2341_v35 = vld [vmem:[%s11277_s4 + $0x28] sm:$0xff] }
 0x30a   : > { %v2093_v38 = vpop.f32.mrb[114].mxu1  ;;  %v2271_v36 = vpop.f32.mrb[144].mxu0 }
 0x30b   : > { %v2327_v34 = vmax.f32 %v2093_v38, %v2271_v36  ;;  %v7402_v39 = vpop.f32.mrb[115].mxu1  ;;  %v7473_v40 = vpop.f32.mrb[145].mxu0  ;;  %8001 = vmatpush1.bf16.msra.mxu1 %v9726_v23  ;;  %v2347_v38 = vld [vmem:[%s11277_s4 + $0x58] sm:$0xff]  ;;  %v2349_v36 = vld [vmem:[%s11277_s4 + $0x68] sm:$0xff] }
 0x30c   : > { %8002 = vmatprep.subr.bf16.mxu1 %v8614_v0  ;;  %v2353_v39 = vld [vmem:[%s11277_s4 + $0x88] sm:$0xff]  ;;  %v2352_v40 = vld [vmem:[%s11277_s4 + $0x80] sm:$0xff] }
 0x30e   : > { %v2098_v45 = vpop.f32.mrb[116].mxu1  ;;  %v2276_v52 = vpop.f32.mrb[146].mxu0 }
 0x30f   : > { %v2328_v47 = vmax.f32 %v2098_v45, %v2276_v52  ;;  %v7405_v49 = vpop.f32.mrb[117].mxu1  ;;  %v7476_v44 = vpop.f32.mrb[147].mxu0  ;;  %v2355_v45 = vld [vmem:[%s11277_s4 + $0x98] sm:$0xff]  ;;  %v2354_v52 = vld [vmem:[%s11277_s4 + $0x90] sm:$0xff] }
 0x310   : > { %v2356_v49 = vld [vmem:[%s11277_s4 + $0xa0] sm:$0xff]  ;;  %v2359_v44 = vld [vmem:[%s11277_s4 + $0xb8] sm:$0xff] }
 0x311   : > { %v9730_v48 = vpack.c.bf16 %v2328_v47, %v2327_v34  ;;  %v2351_v34 = vld [vmem:[%s11277_s4 + $0x78] sm:$0xff]  ;;  %v2357_v47 = vld [vmem:[%s11277_s4 + $0xa8] sm:$0xff] }
 0x312   : > { %v2103_v41 = vpop.f32.mrb[118].mxu1  ;;  %v2281_v53 = vpop.f32.mrb[148].mxu0 }
 0x313   : > { %v2329_v55 = vmax.f32 %v2103_v41, %v2281_v53  ;;  %v7408_v57 = vpop.f32.mrb[119].mxu1  ;;  %v7479_v54 = vpop.f32.mrb[149].mxu0  ;;  %8004 = vmatpush1.bf16.msra.mxu1 %v9730_v48  ;;  %v2361_v41 = vld [vmem:[%s11277_s4 + $0xc8] sm:$0xff]  ;;  %v2363_v53 = vld [vmem:[%s11277_s4 + $0xd8] sm:$0xf] }
 0x314   : > { %8005 = vmatprep.subr.bf16.mxu1 %v8614_v0  ;;  %v6139_v57 = vld [vmem:[%s11277_s4 + $0xe8] sm:$0xff]  ;;  %v6138_v54 = vld [vmem:[%s11277_s4 + $0xe0] sm:$0xff] }
 0x316   : > { %v2108_v62 = vpop.f32.mrb[120].mxu1  ;;  %v2286_v61 = vpop.f32.mrb[150].mxu0 }
 0x317   : > { %v2330_v2 = vmax.f32 %v2108_v62, %v2286_v61  ;;  %v7411_v14 = vpop.f32.mrb[121].mxu1  ;;  %v7482_v50 = vpop.f32.mrb[151].mxu0  ;;  %v6141_v62 = vld [vmem:[%s11277_s4 + $0xf8] sm:$0xff]  ;;  %v6140_v61 = vld [vmem:[%s11277_s4 + $0xf0] sm:$0xff] }
 0x318   : > { %v6142_v14 = vld [vmem:[%s11277_s4 + $0x100] sm:$0xff]  ;;  %v6145_v50 = vld [vmem:[%s11277_s4 + $0x118] sm:$0xff] }
 0x319   : > { %v9734_v60 = vpack.c.bf16 %v2330_v2, %v2329_v55  ;;  %v2362_v55 = vld [vmem:[%s11277_s4 + $0xd0] sm:$0xf]  ;;  %v6143_v2 = vld [vmem:[%s11277_s4 + $0x108] sm:$0xff] }
 0x31a   : > { %v2113_v63 = vpop.f32.mrb[122].mxu1  ;;  %v2291_v5 = vpop.f32.mrb[152].mxu0 }
 0x31b   : > { %v2331_v10 = vmax.f32 %v2113_v63, %v2291_v5  ;;  %v7414_v7 = vpop.f32.mrb[123].mxu1  ;;  %v7485_v59 = vpop.f32.mrb[153].mxu0  ;;  %8007 = vmatpush1.bf16.msra.mxu1 %v9734_v60  ;;  %v6147_v63 = vld [vmem:[%s11277_s4 + $0x128] sm:$0xff]  ;;  %v6146_v5 = vld [vmem:[%s11277_s4 + $0x120] sm:$0xff] }
 0x31c   : > { %8008 = vmatprep.subr.bf16.mxu1 %v8614_v0  ;;  %v6148_v7 = vld [vmem:[%s11277_s4 + $0x130] sm:$0xff]  ;;  %v6151_v59 = vld [vmem:[%s11277_s4 + $0x148] sm:$0xff] }
 0x31e   : > { %v2118_v9 = vpop.f32.mrb[124].mxu1  ;;  %v2296_v58 = vpop.f32.mrb[154].mxu0 }
 0x31f   : > { %v2332_v46 = vmax.f32 %v2118_v9, %v2296_v58  ;;  %v7417_v16 = vpop.f32.mrb[125].mxu1  ;;  %v7488_v12 = vpop.f32.mrb[155].mxu0  ;;  %v6150_v9 = vld [vmem:[%s11277_s4 + $0x140] sm:$0xff]  ;;  %v6153_v58 = vld [vmem:[%s11277_s4 + $0x158] sm:$0xff] }
 0x320   : > { %v6155_v16 = vld [vmem:[%s11277_s4 + $0x168] sm:$0xff]  ;;  %v6154_v12 = vld [vmem:[%s11277_s4 + $0x160] sm:$0xff] }
 0x321   : > { %v9738_v20 = vpack.c.bf16 %v2332_v46, %v2331_v10  ;;  %v6149_v10 = vld [vmem:[%s11277_s4 + $0x138] sm:$0xff]  ;;  %v6152_v46 = vld [vmem:[%s11277_s4 + $0x150] sm:$0xff] }
 0x322   : > { %v2123_v15 = vpop.f32.mrb[126].mxu1  ;;  %v2301_v13 = vpop.f32.mrb[156].mxu0 }
 0x323   : > { %v2333_v51 = vmax.f32 %v2123_v15, %v2301_v13  ;;  %v7420_v21 = vpop.f32.mrb[127].mxu1  ;;  %v7491_v32 = vpop.f32.mrb[157].mxu0  ;;  %8010 = vmatpush1.bf16.msra.mxu1 %v9738_v20  ;;  %v6156_v15 = vld [vmem:[%s11277_s4 + $0x170] sm:$0xff]  ;;  %v6159_v13 = vld [vmem:[%s11277_s4 + $0x188] sm:$0xff] }
 0x324   : > { %8011 = vmatprep.subr.bf16.mxu1 %v8614_v0  ;;  %v6161_v21 = vld [vmem:[%s11277_s4 + $0x198] sm:$0xff]  ;;  %v6160_v32 = vld [vmem:[%s11277_s4 + $0x190] sm:$0xff] }
 0x326   : > { %v2128_v22 = vpop.f32.mrb[128].mxu1  ;;  %v2306_v18 = vpop.f32.mrb[158].mxu0 }
 0x327   : > { %v2334_v19 = vmax.f32 %v2128_v22, %v2306_v18  ;;  %v7423_v11 = vpop.f32.mrb[129].mxu1  ;;  %v7494_v56 = vpop.f32.mrb[159].mxu0  ;;  %v6163_v22 = vld [vmem:[%s11277_s4 + $0x1a8] sm:$0xff]  ;;  %v6162_v18 = vld [vmem:[%s11277_s4 + $0x1a0] sm:$0xff] }
 0x328   : > { %v6164_v11 = vld [vmem:[%s11277_s4 + $0x1b0] sm:$0xf] }
 0x329   : > { %v9742_v25 = vpack.c.bf16 %v2334_v19, %v2333_v51  ;;  %v6158_v51 = vld [vmem:[%s11277_s4 + $0x180] sm:$0xff]  ;;  %v6165_v19 = vld [vmem:[%s11277_s4 + $0x1b8] sm:$0xf] }
 0x32a   : > { %v2133_v24 = vpop.f32.mrb[130].mxu1  ;;  %v2311_v37 = vpop.f32.mrb[160].mxu0 }
 0x32b   : > { %v9744_v27 = vmax.f32 %v2133_v24, %v2311_v37  ;;  %v7426_v17 = vpop.f32.mrb[131].mxu1  ;;  %v7497_v43 = vpop.f32.mrb[161].mxu0  ;;  %8013 = vmatpush1.bf16.msra.mxu1 %v9742_v25 }
 0x32c   : > { %2447 = vmatprep.subr.mxu1 %v8616_v1 }
 0x32f   : > { %2448 = vmatpush1.msra.mxu1 %v9744_v27 }
 0x330   : > { %2472 = vmatmul.mubr.f32.vlgmr.msra.gmra.mrb[132].mxu1 %v2336_v29  ;;  %8014 = vmatprep.subr.bf16.mxu1 %v8614_v0 }
 0x331   : > { %8016 = vmatpush1.bf16.msra.mxu1 %v9706_v42  ;;  %6125 = vmatprep.mubr.msk.f32.mxu1 %vm2364_vm6, %v2339_v8  ;;  %v2340_v42 = vld [vmem:[%s11277_s4 + $0x20] sm:$0xff] }
 0x332   : > { %8017 = vmatprep.subr.bf16.mxu1 %v8614_v0 }
 0x334   : > { %2477 = vmatmul.mubr.f32.gmra.mrb[134].mxu1 %v2338_v30 }
 0x335   : > { %8019 = vmatpush1.bf16.msra.mxu1 %v9710_v4  ;;  %6126 = vmatprep.mubr.msk.f32.mxu1 %vm2364_vm6, %v2341_v35  ;;  %v2342_v4 = vld [vmem:[%s11277_s4 + $0x30] sm:$0xff] }
 0x336   : > { %8020 = vmatprep.subr.bf16.mxu1 %v8614_v0 }
 0x338   : > { %2482 = vmatmul.mubr.f32.gmra.mrb[136].mxu1 %v2340_v42 }
 0x339   : > { %8022 = vmatpush1.bf16.msra.mxu1 %v9714_v6  ;;  %6127 = vmatprep.mubr.msk.f32.mxu1 %vm2364_vm6, %v2343_v31  ;;  %v2344_v6 = vld [vmem:[%s11277_s4 + $0x40] sm:$0xff] }
 0x33a   : > { %8023 = vmatprep.subr.bf16.mxu1 %v8614_v0 }
 0x33c   : > { %2487 = vmatmul.mubr.f32.gmra.mrb[138].mxu1 %v2342_v4 }
 0x33d   : > { %8025 = vmatpush1.bf16.msra.mxu1 %v9718_v3  ;;  %6128 = vmatprep.mubr.msk.f32.mxu1 %vm2364_vm6, %v2345_v33  ;;  %v2346_v3 = vld [vmem:[%s11277_s4 + $0x50] sm:$0xff] }
 0x33e   : > { %8026 = vmatprep.subr.bf16.mxu1 %v8614_v0 }
 0x340   : > { %2492 = vmatmul.mubr.f32.gmra.mrb[140].mxu1 %v2344_v6 }
 0x341   : > { %8028 = vmatpush1.bf16.msra.mxu1 %v9722_v28  ;;  %6129 = vmatprep.mubr.msk.f32.mxu1 %vm2364_vm6, %v2347_v38  ;;  %v2348_v28 = vld [vmem:[%s11277_s4 + $0x60] sm:$0xff] }
 0x342   : > { %8029 = vmatprep.subr.bf16.mxu1 %v8614_v0 }
 0x344   : > { %2497 = vmatmul.mubr.f32.gmra.mrb[142].mxu1 %v2346_v3 }
 0x345   : > { %8031 = vmatpush1.bf16.msra.mxu1 %v9726_v23  ;;  %6130 = vmatprep.mubr.msk.f32.mxu1 %vm2364_vm6, %v2349_v36  ;;  %v2350_v23 = vld [vmem:[%s11277_s4 + $0x70] sm:$0xff] }
 0x346   : > { %8032 = vmatprep.subr.bf16.mxu1 %v8614_v0 }
 0x348   : > { %2502 = vmatmul.mubr.f32.gmra.mrb[144].mxu1 %v2348_v28 }
 0x349   : > { %8034 = vmatpush1.bf16.msra.mxu1 %v9730_v48  ;;  %6131 = vmatprep.mubr.msk.f32.mxu1 %vm2364_vm6, %v2351_v34  ;;  %v2358_v48 = vld [vmem:[%s11277_s4 + $0xb0] sm:$0xff] }
 0x34a   : > { %8035 = vmatprep.subr.bf16.mxu1 %v8614_v0 }
 0x34c   : > { %2507 = vmatmul.mubr.f32.gmra.mrb[146].mxu1 %v2350_v23 }
 0x34d   : > { %8037 = vmatpush1.bf16.msra.mxu1 %v9734_v60  ;;  %6132 = vmatprep.mubr.msk.f32.mxu1 %vm2364_vm6, %v2353_v39  ;;  %v6144_v60 = vld [vmem:[%s11277_s4 + $0x110] sm:$0xff] }
 0x34e   : > { %8038 = vmatprep.subr.bf16.mxu1 %v8614_v0 }
 0x350   : > { %2512 = vmatmul.mubr.f32.gmra.mrb[148].mxu1 %v2352_v40 }
 0x351   : > { %8040 = vmatpush1.bf16.msra.mxu1 %v9738_v20  ;;  %6133 = vmatprep.mubr.msk.f32.mxu1 %vm2364_vm6, %v2355_v45  ;;  %v6157_v20 = vld [vmem:[%s11277_s4 + $0x178] sm:$0xff] }
 0x352   : > { %8041 = vmatprep.subr.bf16.mxu1 %v8614_v0 }
 0x354   : > { %2517 = vmatmul.mubr.f32.gmra.mrb[150].mxu1 %v2354_v52 }
 0x355   : > { %8043 = vmatpush1.bf16.msra.mxu1 %v9742_v25  ;;  %6134 = vmatprep.mubr.msk.f32.mxu1 %vm2364_vm6, %v2357_v47 }
 0x356   : > { %2653 = vmatprep.subr.mxu1 %v8616_v1  ;;  %v2360_v1 = vld [vmem:[%s11277_s4 + $0xc0] sm:$0xff] }
 0x358   : > { %2522 = vmatmul.mubr.f32.gmra.mrb[152].mxu1 %v2356_v49 }
 0x359   : > { %2654 = vmatpush1.msra.mxu1 %v9744_v27  ;;  %6135 = vmatprep.mubr.msk.f32.mxu1 %vm2364_vm6, %v2359_v44 }
 0x35c   : > { %2527 = vmatmul.mubr.f32.gmra.mrb[154].mxu1 %v2358_v48 }
 0x35d   : > { %6136 = vmatprep.mubr.msk.f32.mxu1 %vm2364_vm6, %v2361_v41 }
 0x360   : > { %2532 = vmatmul.mubr.f32.gmra.mrb[156].mxu1 %v2360_v1 }
 0x361   : > { %6137 = vmatprep.mubr.msk.f32.mxu1 %vm2364_vm6, %v2363_v53 }
 0x364   : > { %2537 = vmatmul.mubr.f32.gmra.mrb[158].mxu1 %v2362_v55 }
 0x365   : > { %6166 = vmatprep.mubr.msk.f32.mxu1 %vm2364_vm6, %v6139_v57 }
 0x368   : > { %2678 = vmatmul.mubr.f32.vlgmr.msra.gmra.mrb[160].mxu1 %v6138_v54 }
 0x369   : > { %6167 = vmatprep.mubr.msk.f32.mxu1 %vm2364_vm6, %v6141_v62 }
 0x36c   : > { %2683 = vmatmul.mubr.f32.gmra.mrb[162].mxu1 %v6140_v61 }
 0x36d   : > { %6168 = vmatprep.mubr.msk.f32.mxu1 %vm2364_vm6, %v6143_v2 }
 0x370   : > { %2688 = vmatmul.mubr.f32.gmra.mrb[164].mxu1 %v6142_v14 }
 0x371   : > { %6169 = vmatprep.mubr.msk.f32.mxu1 %vm2364_vm6, %v6145_v50 }
 0x374   : > { %2693 = vmatmul.mubr.f32.gmra.mrb[166].mxu1 %v6144_v60 }
 0x375   : > { %6170 = vmatprep.mubr.msk.f32.mxu1 %vm2364_vm6, %v6147_v63 }
 0x378   : > { %2698 = vmatmul.mubr.f32.gmra.mrb[168].mxu1 %v6146_v5 }
 0x379   : > { %6171 = vmatprep.mubr.msk.f32.mxu1 %vm2364_vm6, %v6149_v10 }
 0x37c   : > { %2703 = vmatmul.mubr.f32.gmra.mrb[170].mxu1 %v6148_v7 }
 0x37d   : > { %6172 = vmatprep.mubr.msk.f32.mxu1 %vm2364_vm6, %v6151_v59 }
 0x380   : > { %2708 = vmatmul.mubr.f32.gmra.mrb[172].mxu1 %v6150_v9 }
 0x381   : > { %6173 = vmatprep.mubr.msk.f32.mxu1 %vm2364_vm6, %v6153_v58 }
 0x384   : > { %2713 = vmatmul.mubr.f32.gmra.mrb[174].mxu1 %v6152_v46 }
 0x385   : > { %6174 = vmatprep.mubr.msk.f32.mxu1 %vm2364_vm6, %v6155_v16 }
 0x388   : > { %2718 = vmatmul.mubr.f32.gmra.mrb[176].mxu1 %v6154_v12 }
 0x389   : > { %6175 = vmatprep.mubr.msk.f32.mxu1 %vm2364_vm6, %v6157_v20 }
 0x38c   : > { %2723 = vmatmul.mubr.f32.gmra.mrb[178].mxu1 %v6156_v15 }
 0x38d   : > { %6176 = vmatprep.mubr.msk.f32.mxu1 %vm2364_vm6, %v6159_v13 }
 0x390   : > { %2728 = vmatmul.mubr.f32.gmra.mrb[180].mxu1 %v6158_v51 }
 0x391   : > { %6177 = vmatprep.mubr.msk.f32.mxu1 %vm2364_vm6, %v6161_v21 }
 0x394   : > { %2733 = vmatmul.mubr.f32.gmra.mrb[182].mxu1 %v6160_v32 }
 0x395   : > { %6178 = vmatprep.mubr.msk.f32.mxu1 %vm2364_vm6, %v6163_v22 }
 0x398   : > { %2738 = vmatmul.mubr.f32.gmra.mrb[184].mxu1 %v6162_v18 }
 0x399   : > { %6179 = vmatprep.mubr.msk.f32.mxu1 %vm2364_vm6, %v6165_v19 }
 0x39c   : > { %2743 = vmatmul.mubr.f32.gmra.mrb[186].mxu1 %v6164_v11 }
 0x403   : > { %v2473_v56 = vpop.f32.mrb[132].mxu1 }
 0x404   : > { %v2475_v25 = vpop.f32.mrb[133].mxu1 }
 0x407   : > { %v2478_v24 = vpop.f32.mrb[134].mxu1 }
 0x408   : > { %v2480_v37 = vpop.f32.mrb[135].mxu1 }
 0x40b   : > { %v2483_v27 = vpop.f32.mrb[136].mxu1 }
 0x40c   : > { %v2485_v17 = vpop.f32.mrb[137].mxu1 }
 0x40f   : > { %v2488_v43 = vpop.f32.mrb[138].mxu1 }
 0x410   : > { %v2490_v29 = vpop.f32.mrb[139].mxu1 }
 0x413   : > { %v2493_v8 = vpop.f32.mrb[140].mxu1 }
 0x414   : > { %v2495_v30 = vpop.f32.mrb[141].mxu1 }
 0x417   : > { %v2498_v35 = vpop.f32.mrb[142].mxu1 }
 0x418   : > { %v2500_v42 = vpop.f32.mrb[143].mxu1 }
 0x41b   : > { %v2503_v31 = vpop.f32.mrb[144].mxu1 }
 0x41c   : > { %v2505_v4 = vpop.f32.mrb[145].mxu1 }
 0x41f   : > { %v2508_v33 = vpop.f32.mrb[146].mxu1 }
 0x420   : > { %v2510_v6 = vpop.f32.mrb[147].mxu1 }
 0x423   : > { %v2513_v38 = vpop.f32.mrb[148].mxu1 }
 0x424   : > { %v2515_v3 = vpop.f32.mrb[149].mxu1 }
 0x425   : > { %v6180_v3 = vld [vmem:[%s11278_s5 + $0xe0] sm:$0xff] }
 0x426   : > { %7526 = vmatprep.mubr.msk.f32.mxu0 %vm2874_vm7, %v6180_v3 }
 0x427   : > { %v2518_v36 = vpop.f32.mrb[150].mxu1 }
 0x428   : > { %v2520_v28 = vpop.f32.mrb[151].mxu1 }
 0x42b   : > { %v2523_v34 = vpop.f32.mrb[152].mxu1 }
 0x42c   : > { %v2525_v23 = vpop.f32.mrb[153].mxu1 }
 0x42f   : > { %v2528_v39 = vpop.f32.mrb[154].mxu1 }
 0x430   : > { %v2530_v40 = vpop.f32.mrb[155].mxu1 }
 0x431   : > { %v4625_v40 = vld [vmem:[%s11279_s6 + $0x8] sm:$0xff] }
 0x433   : > { %v2533_v45 = vpop.f32.mrb[156].mxu1 }
 0x434   : > { %v2535_v52 = vpop.f32.mrb[157].mxu1 }
 0x435   : > { %v4624_v52 = vld [vmem:[%s11279_s6] sm:$0xff] }
 0x437   : > { %v9963_v47 = vpop.f32.mrb[158].mxu1 }
 0x438   : > { %v2540_v49 = vpop.f32.mrb[159].mxu1 }
 0x439   : > { %v4626_v49 = vld [vmem:[%s11279_s6 + $0x10] sm:$0xff] }
 0x43b   : > { %v2679_v44 = vpop.f32.mrb[160].mxu1 }
 0x43c   : > { %v2748_v48 = vmax.f32 %v2473_v56, %v2679_v44  ;;  %v2681_v41 = vpop.f32.mrb[161].mxu1  ;;  %v4631_v44 = vld [vmem:[%s11279_s6 + $0x38] sm:$0xff] }
 0x43d   : > { %v4633_v41 = vld [vmem:[%s11279_s6 + $0x48] sm:$0xff] }
 0x43f   : > { %v2684_v1 = vpop.f32.mrb[162].mxu1 }
 0x440   : > { %v2749_v53 = vmax.f32 %v2478_v24, %v2684_v1  ;;  %v2686_v55 = vpop.f32.mrb[163].mxu1  ;;  %v4630_v1 = vld [vmem:[%s11279_s6 + $0x30] sm:$0xff] }
 0x441   : > { %v4632_v55 = vld [vmem:[%s11279_s6 + $0x40] sm:$0xff] }
 0x442   : > { %v9965_v57 = vpack.i.bf16 %v2749_v53, %v2748_v48  ;;  %v9967_v62 = vpack.c.bf16 %v2749_v53, %v2748_v48  ;;  %v4628_v48 = vld [vmem:[%s11279_s6 + $0x20] sm:$0xff]  ;;  %v4635_v53 = vld [vmem:[%s11279_s6 + $0x58] sm:$0xff] }
 0x443   : > { %v2689_v54 = vpop.f32.mrb[164].mxu1 }
 0x444   : > { %v2750_v61 = vmax.f32 %v2483_v27, %v2689_v54  ;;  %8467 = vrot.lane.b32.xlu0 %v9965_v57, %s8617_s15  ;;  %v2691_v2 = vpop.f32.mrb[165].mxu1  ;;  %v4634_v54 = vld [vmem:[%s11279_s6 + $0x50] sm:$0xff] }
 0x445   : > { %v4636_v2 = vld [vmem:[%s11279_s6 + $0x60] sm:$0xff] }
 0x447   : > { %v2694_v14 = vpop.f32.mrb[166].mxu1 }
 0x448   : > { %v2751_v50 = vmax.f32 %v2488_v43, %v2694_v14  ;;  %v2696_v60 = vpop.f32.mrb[167].mxu1 }
 0x44a   : > { %v9971_v63 = vpack.i.bf16 %v2751_v50, %v2750_v61  ;;  %v9973_v10 = vpack.c.bf16 %v2751_v50, %v2750_v61  ;;  %v4639_v61 = vld [vmem:[%s11279_s6 + $0x78] sm:$0xff] }
 0x44b   : > { %v2699_v5 = vpop.f32.mrb[168].mxu1 }
 0x44c   : > { %v2752_v7 = vmax.f32 %v2493_v8, %v2699_v5  ;;  %8472 = vrot.lane.b32.xlu1 %v9971_v63, %s8617_s15  ;;  %v2701_v59 = vpop.f32.mrb[169].mxu1  ;;  %v4641_v5 = vld [vmem:[%s11279_s6 + $0x88] sm:$0xff] }
 0x44d   : > { %v4643_v59 = vld [vmem:[%s11279_s6 + $0x98] sm:$0xff] }
 0x44f   : > { %v2704_v9 = vpop.f32.mrb[170].mxu1 }
 0x450   : > { %v2753_v58 = vmax.f32 %v2498_v35, %v2704_v9  ;;  %v2706_v46 = vpop.f32.mrb[171].mxu1 }
 0x452   : > { %v8476_v16 = vpack.i.bf16 %v2753_v58, %v2752_v7  ;;  %v9977_v20 = vpack.c.bf16 %v2753_v58, %v2752_v7  ;;  %v4638_v7 = vld [vmem:[%s11279_s6 + $0x70] sm:$0xff]  ;;  %v4640_v58 = vld [vmem:[%s11279_s6 + $0x80] sm:$0xff] }
 0x453   : > { %v2709_v12 = vpop.f32.mrb[172].mxu1 }
 0x454   : > { %v2754_v15 = vmax.f32 %v2503_v31, %v2709_v12  ;;  %8477 = vrot.lane.b32.xlu0 %v8476_v16, %s8617_s15  ;;  %v2711_v13 = vpop.f32.mrb[173].mxu1 }
 0x455   : > { %v4642_v13 = vld [vmem:[%s11279_s6 + $0x90] sm:$0xff] }
 0x457   : > { %v2714_v51 = vpop.f32.mrb[174].mxu1 }
 0x458   : > { %v2755_v21 = vmax.f32 %v2508_v33, %v2714_v51  ;;  %v2716_v32 = vpop.f32.mrb[175].mxu1  ;;  %v4647_v51 = vld [vmem:[%s11279_s6 + $0xb8] sm:$0xff] }
 0x459   : > { %v4644_v32 = vld [vmem:[%s11279_s6 + $0xa0] sm:$0xff] }
 0x45a   : > { %v8481_v22 = vpack.i.bf16 %v2755_v21, %v2754_v15  ;;  %v9980_v19 = vpack.c.bf16 %v2755_v21, %v2754_v15  ;;  %v4645_v15 = vld [vmem:[%s11279_s6 + $0xa8] sm:$0xff] }
 0x45b   : > { %v2719_v18 = vpop.f32.mrb[176].mxu1 }
 0x45c   : > { %v2756_v11 = vmax.f32 %v2513_v38, %v2719_v18  ;;  %8482 = vrot.lane.b32.xlu1 %v8481_v22, %s8617_s15  ;;  %v2721_v56 = vpop.f32.mrb[177].mxu1 }
 0x45d   : > { %v4649_v56 = vld [vmem:[%s11279_s6 + $0xc8] sm:$0xff] }
 0x45f   : > { %v2724_v25 = vpop.f32.mrb[178].mxu1 }
 0x460   : > { %v2757_v24 = vmax.f32 %v2518_v36, %v2724_v25  ;;  %v2726_v37 = vpop.f32.mrb[179].mxu1  ;;  %v4646_v25 = vld [vmem:[%s11279_s6 + $0xb0] sm:$0xff] }
 0x462   : > { %v8486_v27 = vpack.i.bf16 %v2757_v24, %v2756_v11  ;;  %v9983_v43 = vpack.c.bf16 %v2757_v24, %v2756_v11  ;;  %v4651_v24 = vld [vmem:[%s11279_s6 + $0xd8] sm:$0xff] }
 0x463   : > { %v2729_v17 = vpop.f32.mrb[180].mxu1 }
 0x464   : > { %v2758_v29 = vmax.f32 %v2523_v34, %v2729_v17  ;;  %8487 = vrot.lane.b32.xlu0 %v8486_v27, %s8617_s15  ;;  %v2731_v8 = vpop.f32.mrb[181].mxu1 }
 0x467   : > { %v2734_v30 = vpop.f32.mrb[182].mxu1 }
 0x468   : > { %v2759_v35 = vmax.f32 %v2528_v39, %v2734_v30  ;;  %v2736_v42 = vpop.f32.mrb[183].mxu1  ;;  %v4650_v30 = vld [vmem:[%s11279_s6 + $0xd0] sm:$0xff] }
 0x46a   : > { %v8491_v31 = vpack.i.bf16 %v2759_v35, %v2758_v29  ;;  %v9986_v33 = vpack.c.bf16 %v2759_v35, %v2758_v29 }
 0x46b   : > { %v2739_v4 = vpop.f32.mrb[184].mxu1 }
 0x46c   : > { %v2760_v6 = vmax.f32 %v2533_v45, %v2739_v4  ;;  %8492 = vrot.lane.b32.xlu1 %v8491_v31, %s8617_s15  ;;  %v2741_v38 = vpop.f32.mrb[185].mxu1  ;;  %v4627_v45 = vld [vmem:[%s11279_s6 + $0x18] sm:$0xff] }
 0x46f   : > { %v2744_v36 = vpop.f32.mrb[186].mxu1 }
 0x470   : > { %v2761_v28 = vmax.f32 %v9963_v47, %v2744_v36  ;;  %8502 = vrot.lane.b32.xlu1 %v9965_v57, %s8618_s16  ;;  %v2746_v34 = vpop.f32.mrb[187].mxu1  ;;  %v4629_v47 = vld [vmem:[%s11279_s6 + $0x28] sm:$0xff] }
 0x472   : > { %v8496_v23 = vpack.i.bf16 %v2761_v28, %v2760_v6  ;;  %v9996_v39 = vpack.c.bf16 %v2761_v28, %v2760_v6 }
 0x474   : > { %8512 = vrot.lane.b32.xlu1 %v8476_v16, %s8618_s16  ;;  %8497 = vrot.lane.b32.xlu0 %v8496_v23, %s8617_s15 }
 0x478   : > { %8522 = vrot.lane.b32.xlu1 %v8486_v27, %s8618_s16  ;;  %8507 = vrot.lane.b32.xlu0 %v9971_v63, %s8618_s16 }
 0x47c   : > { %8532 = vrot.lane.b32.xlu1 %v8496_v23, %s8618_s16  ;;  %8517 = vrot.lane.b32.xlu0 %v8481_v22, %s8618_s16 }
 0x480   : > { %8542 = vrot.lane.b32.xlu1 %v9971_v63, %s8619_s17  ;;  %8527 = vrot.lane.b32.xlu0 %v8491_v31, %s8618_s16  ;;  %s11240_s16 = scalar_lea.vmem %s11282_s9, %s8406_s24 }
 0x484   : > { %8552 = vrot.lane.b32.xlu1 %v8481_v22, %s8619_s17  ;;  %8537 = vrot.lane.b32.xlu0 %v9965_v57, %s8619_s17 }
 0x488   : > { %8562 = vrot.lane.b32.xlu1 %v8491_v31, %s8619_s17  ;;  %8547 = vrot.lane.b32.xlu0 %v8476_v16, %s8619_s17 }
 0x48c   : > { %8572 = vrot.lane.b32.xlu1 %v9965_v57, %s8620_s18  ;;  %8557 = vrot.lane.b32.xlu0 %v8486_v27, %s8619_s17  ;;  %v4637_v57 = vld [vmem:[%s11279_s6 + $0x68] sm:$0xff] }
 0x490   : > { %8582 = vrot.lane.b32.xlu1 %v8476_v16, %s8620_s18  ;;  %8567 = vrot.lane.b32.xlu0 %v8496_v23, %s8619_s17 }
 0x494   : > { %8592 = vrot.lane.b32.xlu1 %v8486_v27, %s8620_s18  ;;  %8577 = vrot.lane.b32.xlu0 %v9971_v63, %s8620_s18  ;;  %v4648_v27 = vld [vmem:[%s11279_s6 + $0xc0] sm:$0xff] }
 0x498   : > { %8602 = vrot.lane.b32.xlu1 %v8496_v23, %s8620_s18  ;;  %8587 = vrot.lane.b32.xlu0 %v8481_v22, %s8620_s18 }
 0x49c   : > { %4659 = vperm.xlu1 %8465, %v4625_v40   ;;  %8597 = vrot.lane.b32.xlu0 %v8491_v31, %s8620_s18 }
 0x4a0   : > { %4669 = vperm.xlu1 %8465, %v4627_v45   ;;  %4654 = vperm.xlu0 %8464, %v4624_v52   ;;  %v6181_v45 = vld [vmem:[%s11278_s5 + $0xe8] sm:$0xff]  ;;  %v6182_v52 = vld [vmem:[%s11278_s5 + $0xf0] sm:$0xff] }
 0x4a4   : > { %4679 = vperm.xlu1 %8465, %v4629_v47   ;;  %4664 = vperm.xlu0 %8464, %v4626_v49   ;;  %v6183_v47 = vld [vmem:[%s11278_s5 + $0xf8] sm:$0xff]  ;;  %v6184_v49 = vld [vmem:[%s11278_s5 + $0x100] sm:$0xff] }
 0x4a8   : > { %4689 = vperm.xlu1 %8465, %v4631_v44   ;;  %4674 = vperm.xlu0 %8464, %v4628_v48   ;;  %v6186_v44 = vld [vmem:[%s11278_s5 + $0x110] sm:$0xff]  ;;  %v6188_v48 = vld [vmem:[%s11278_s5 + $0x120] sm:$0xff] }
 0x4ac   : > { %4699 = vperm.xlu1 %8465, %v4633_v41   ;;  %4684 = vperm.xlu0 %8464, %v4630_v1   ;;  %v6190_v41 = vld [vmem:[%s11278_s5 + $0x130] sm:$0xff] }
 0x4b0   : > { %4709 = vperm.xlu1 %8465, %v4635_v53   ;;  %4694 = vperm.xlu0 %8464, %v4632_v55   ;;  %v6192_v53 = vld [vmem:[%s11278_s5 + $0x140] sm:$0xff] }
 0x4b4   : > { %4719 = vperm.xlu1 %8465, %v4637_v57   ;;  %4704 = vperm.xlu0 %8464, %v4634_v54   ;;  %v6194_v54 = vld [vmem:[%s11278_s5 + $0x150] sm:$0xff] }
 0x4b6   : > { %v8468_v14 = vpop.permute.xlu0 %8467 }
 0x4b7   : > { %v8470_v50 = vunpack.i.h.bf16 %v8468_v14  ;;  %v8469_v60 = vunpack.i.l.bf16 %v8468_v14  ;;  %v6197_v14 = vld [vmem:[%s11278_s5 + $0x168] sm:$0xff] }
 0x4b8   : > { %4729 = vperm.xlu1 %8465, %v4639_v61   ;;  %4714 = vperm.xlu0 %8464, %v4636_v2   ;;  %v6196_v2 = vld [vmem:[%s11278_s5 + $0x160] sm:$0xff] }
 0x4b9   : > { %v8044_v63 = vpack.c.bf16 %v8470_v50, %v8469_v60  ;;  %v6199_v50 = vld [vmem:[%s11278_s5 + $0x178] sm:$0xff]  ;;  %v6200_v60 = vld [vmem:[%s11278_s5 + $0x180] sm:$0xff] }
 0x4bb   : > { %8045 = vmatprep.subr.bf16.mxu0 %v8044_v63 }
 0x4bc   : > { %8047 = vmatpush3.bf16.msra.mxu0 %v8044_v63  ;;  %4739 = vperm.xlu1 %8465, %v4641_v5   ;;  %v6201_v63 = vld [vmem:[%s11278_s5 + $0x188] sm:$0xff]  ;;  %v6202_v5 = vld [vmem:[%s11278_s5 + $0x190] sm:$0xff] }
 0x4bd   : > { %4724 = vperm.xlu0 %8464, %v4638_v7   ;;  %v6203_v7 = vld [vmem:[%s11278_s5 + $0x198] sm:$0xff] }
 0x4be   : > { %v8473_v9 = vpop.permute.xlu1 %8472 }
 0x4bf   : > { %v8475_v46 = vunpack.i.h.bf16 %v8473_v9  ;;  %v8474_v16 = vunpack.i.l.bf16 %v8473_v9  ;;  %v6205_v9 = vld [vmem:[%s11278_s5 + $0x1a8] sm:$0xff] }
 0x4c0   : > { %4749 = vperm.xlu1 %8465, %v4643_v59   ;;  %v6204_v59 = vld [vmem:[%s11278_s5 + $0x1a0] sm:$0xff] }
 0x4c1   : > { %v8048_v12 = vpack.c.bf16 %v8475_v46, %v8474_v16  ;;  %4734 = vperm.xlu0 %8464, %v4640_v58   ;;  %v6206_v58 = vld [vmem:[%s11278_s5 + $0x1b0] sm:$0xff]  ;;  %v6207_v16 = vld [vmem:[%s11278_s5 + $0x1b8] sm:$0xff] }
 0x4c3   : > { %8049 = vmatprep.subr.bf16.mxu0 %v8048_v12 }
 0x4c4   : > { %8051 = vmatpush3.bf16.msra.mxu0 %v8048_v12  ;;  %4759 = vperm.xlu1 %8465, %v4645_v15   ;;  %v2762_v12 = vld [vmem:[%s11278_s5] sm:$0xff] }
 0x4c5   : > { %4744 = vperm.xlu0 %8464, %v4642_v13  }
 0x4c6   : > { %v8478_v21 = vpop.permute.xlu0 %8477 }
 0x4c7   : > { %v8480_v22 = vunpack.i.h.bf16 %v8478_v21  ;;  %v8479_v18 = vunpack.i.l.bf16 %v8478_v21  ;;  %v2763_v21 = vld [vmem:[%s11278_s5 + $0x8] sm:$0xff] }
 0x4c8   : > { %4769 = vperm.xlu1 %8465, %v4647_v51  }
 0x4c9   : > { %v8052_v11 = vpack.c.bf16 %v8480_v22, %v8479_v18  ;;  %4754 = vperm.xlu0 %8464, %v4644_v32   ;;  %v2764_v32 = vld [vmem:[%s11278_s5 + $0x10] sm:$0xff] }
 0x4cb   : > { %8053 = vmatprep.subr.bf16.mxu0 %v8052_v11 }
 0x4cc   : > { %8055 = vmatpush3.bf16.msra.mxu0 %v8052_v11  ;;  %4779 = vperm.xlu1 %8465, %v4649_v56  }
 0x4cd   : > { %4764 = vperm.xlu0 %8464, %v4646_v25   ;;  %v2765_v25 = vld [vmem:[%s11278_s5 + $0x18] sm:$0xff] }
 0x4ce   : > { %v8483_v37 = vpop.permute.xlu1 %8482 }
 0x4cf   : > { %v8485_v17 = vunpack.i.h.bf16 %v8483_v37  ;;  %v8484_v29 = vunpack.i.l.bf16 %v8483_v37 }
 0x4d0   : > { %4789 = vperm.xlu1 %8465, %v4651_v24   ;;  %v2766_v24 = vld [vmem:[%s11278_s5 + $0x20] sm:$0xff] }
 0x4d1   : > { %v8056_v8 = vpack.c.bf16 %v8485_v17, %v8484_v29  ;;  %4774 = vperm.xlu0 %8464, %v4648_v27  }
 0x4d3   : > { %8057 = vmatprep.subr.bf16.mxu0 %v8056_v8 }
 0x4d4   : > { %8059 = vmatpush3.bf16.msra.mxu0 %v8056_v8  ;;  %v2767_v8 = vld [vmem:[%s11278_s5 + $0x28] sm:$0xff] }
 0x4d5   : > { %4784 = vperm.xlu0 %8464, %v4650_v30   ;;  %v2768_v30 = vld [vmem:[%s11278_s5 + $0x30] sm:$0xff] }
 0x4d6   : > { %v8488_v35 = vpop.permute.xlu0 %8487 }
 0x4d7   : > { %v8490_v42 = vunpack.i.h.bf16 %v8488_v35  ;;  %v8489_v31 = vunpack.i.l.bf16 %v8488_v35 }
 0x4d9   : > { %v8060_v4 = vpack.c.bf16 %v8490_v42, %v8489_v31 }
 0x4db   : > { %8061 = vmatprep.subr.bf16.mxu0 %v8060_v4 }
 0x4dc   : > { %8063 = vmatpush3.bf16.msra.mxu0 %v8060_v4 }
 0x4de   : > { %v8493_v6 = vpop.permute.xlu1 %8492 }
 0x4df   : > { %v8495_v38 = vunpack.i.h.bf16 %v8493_v6  ;;  %v8494_v3 = vunpack.i.l.bf16 %v8493_v6  ;;  %v2769_v6 = vld [vmem:[%s11278_s5 + $0x38] sm:$0xff] }
 0x4e1   : > { %v8064_v36 = vpack.c.bf16 %v8495_v38, %v8494_v3  ;;  %v2770_v38 = vld [vmem:[%s11278_s5 + $0x40] sm:$0xff] }
 0x4e2   : > { %v8503_v1 = vpop.permute.xlu1 %8502 }
 0x4e3   : > { %8065 = vmatprep.subr.bf16.mxu0 %v8064_v36  ;;  %v8505_v55 = vunpack.i.h.bf16 %v8503_v1  ;;  %v8504_v57 = vunpack.i.l.bf16 %v8503_v1  ;;  %v2776_v1 = vld [vmem:[%s11278_s5 + $0x70] sm:$0xff] }
 0x4e4   : > { %8067 = vmatpush3.bf16.msra.mxu0 %v8064_v36 }
 0x4e5   : > { %v8104_v61 = vpack.c.bf16 %v8505_v55, %v8504_v57  ;;  %v2778_v55 = vld [vmem:[%s11278_s5 + $0x80] sm:$0xff]  ;;  %v2779_v57 = vld [vmem:[%s11278_s5 + $0x88] sm:$0xff] }
 0x4e6   : > { %v8498_v28 = vpop.permute.xlu0 %8497  ;;  %v8513_v51 = vpop.permute.xlu1 %8512 }
 0x4e7   : > { %v8500_v34 = vunpack.i.h.bf16 %v8498_v28  ;;  %v8499_v23 = vunpack.i.l.bf16 %v8498_v28  ;;  %v8515_v22 = vunpack.i.h.bf16 %v8513_v51  ;;  %v8514_v18 = vunpack.i.l.bf16 %v8513_v51 }
 0x4e9   : > { %v8068_v40 = vpack.c.bf16 %v8500_v34, %v8499_v23  ;;  %v8112_v37 = vpack.c.bf16 %v8515_v22, %v8514_v18  ;;  %v2771_v23 = vld [vmem:[%s11278_s5 + $0x48] sm:$0xff] }
 0x4ea   : > { %v8508_v46 = vpop.permute.xlu0 %8507  ;;  %v8523_v29 = vpop.permute.xlu1 %8522 }
 0x4eb   : > { %8070 = vmatprep.subr.msk.bf16.mxu0 %vm9447_vm4, %v8068_v40  ;;  %v8510_v15 = vunpack.i.h.bf16 %v8508_v46  ;;  %v8509_v13 = vunpack.i.l.bf16 %v8508_v46  ;;  %v8525_v35 = vunpack.i.h.bf16 %v8523_v29  ;;  %v8524_v42 = vunpack.i.l.bf16 %v8523_v29  ;;  %v6267_v46 = vld [vmem:[%s11278_s5 + $0x1c8] sm:$0xff] }
 0x4ec   : > { %8073 = vmatpush3.bf16.msk.msra.mxu0 %vm9447_vm4, %v8068_v40  ;;  %v2772_v40 = vld [vmem:[%s11278_s5 + $0x50] sm:$0xff] }
 0x4ed   : > { %8075 = vmatprep.subr.bf16.mxu0 %v9967_v62  ;;  %v8108_v11 = vpack.c.bf16 %v8510_v15, %v8509_v13  ;;  %v8120_v3 = vpack.c.bf16 %v8525_v35, %v8524_v42 }
 0x4ee   : > { %v8518_v56 = vpop.permute.xlu0 %8517  ;;  %v8533_v34 = vpop.permute.xlu1 %8532 }
 0x4ef   : > { %7527 = vmatmul.mubr.msk.f32.vlgmr.msra.gmra.mrb[162].mxu0 %vm2874_vm7, %v6181_v45  ;;  %v8520_v27 = vunpack.i.h.bf16 %v8518_v56  ;;  %v8519_v17 = vunpack.i.l.bf16 %v8518_v56  ;;  %v8535_v45 = vunpack.i.h.bf16 %v8533_v34 }
 0x4f0   : > { %8077 = vmatpush3.bf16.msra.mxu0 %v9967_v62  ;;  %7529 = vmatprep.mubr.msk.f32.mxu0 %vm2874_vm7, %v6182_v52  ;;  %v6185_v62 = vld [vmem:[%s11278_s5 + $0x108] sm:$0xff]  ;;  %v8534_v52 = vunpack.i.l.bf16 %v8533_v34 }
 0x4f1   : > { %8079 = vmatprep.subr.bf16.mxu0 %v9973_v10  ;;  %v8116_v31 = vpack.c.bf16 %v8520_v27, %v8519_v17 }
 0x4f2   : > { %v8528_v4 = vpop.permute.xlu0 %8527 }
 0x4f3   : > { %7530 = vmatmul.mubr.msk.f32.gmra.mrb[164].mxu0 %vm2874_vm7, %v6183_v47  ;;  %v8530_v36 = vunpack.i.h.bf16 %v8528_v4  ;;  %v8529_v28 = vunpack.i.l.bf16 %v8528_v4 }
 0x4f4   : > { %8081 = vmatpush3.bf16.msra.mxu0 %v9973_v10  ;;  %7532 = vmatprep.mubr.msk.f32.mxu0 %vm2874_vm7, %v6184_v49  ;;  %v6187_v10 = vld [vmem:[%s11278_s5 + $0x118] sm:$0xff] }
 0x4f5   : > { %8083 = vmatprep.subr.bf16.mxu0 %v9977_v20  ;;  %v8124_v47 = vpack.c.bf16 %v8530_v36, %v8529_v28 }
 0x4f6   : > { %v8538_v49 = vpop.permute.xlu0 %8537 }
 0x4f7   : > { %7533 = vmatmul.mubr.msk.f32.gmra.mrb[166].mxu0 %vm2874_vm7, %v6185_v62  ;;  %v2773_v62 = vld [vmem:[%s11278_s5 + $0x58] sm:$0xff] }
 0x4f8   : > { %8085 = vmatpush3.bf16.msra.mxu0 %v9977_v20  ;;  %7535 = vmatprep.mubr.msk.f32.mxu0 %vm2874_vm7, %v6186_v44  ;;  %v6189_v20 = vld [vmem:[%s11278_s5 + $0x128] sm:$0xff]  ;;  %v2774_v44 = vld [vmem:[%s11278_s5 + $0x60] sm:$0xff] }
 0x4f9   : > { %8087 = vmatprep.subr.bf16.mxu0 %v9980_v19 }
 0x4fb   : > { %7536 = vmatmul.mubr.msk.f32.gmra.mrb[168].mxu0 %vm2874_vm7, %v6187_v10  ;;  %v8128_v10 = vpack.c.bf16 %v8535_v45, %v8534_v52 }
 0x4fc   : > { %8089 = vmatpush3.bf16.msra.mxu0 %v9980_v19  ;;  %7538 = vmatprep.mubr.msk.f32.mxu0 %vm2874_vm7, %v6188_v48  ;;  %v6191_v19 = vld [vmem:[%s11278_s5 + $0x138] sm:$0xff]  ;;  %v8540_v48 = vunpack.i.h.bf16 %v8538_v49 }
 0x4fd   : > { %8091 = vmatprep.subr.bf16.mxu0 %v9983_v43 }
 0x4ff   : > { %7539 = vmatmul.mubr.msk.f32.gmra.mrb[170].mxu0 %vm2874_vm7, %v6189_v20  ;;  %v8539_v20 = vunpack.i.l.bf16 %v8538_v49  ;;  %v6279_v49 = vld [vmem:[%s11278_s5 + $0x228] sm:$0xff] }
 0x500   : > { %8093 = vmatpush3.bf16.msra.mxu0 %v9983_v43  ;;  %7541 = vmatprep.mubr.msk.f32.mxu0 %vm2874_vm7, %v6190_v41  ;;  %v6193_v43 = vld [vmem:[%s11278_s5 + $0x148] sm:$0xff] }
 0x501   : > { %8095 = vmatprep.subr.bf16.mxu0 %v9986_v33  ;;  %v2775_v41 = vld [vmem:[%s11278_s5 + $0x68] sm:$0xff] }
 0x503   : > { %7542 = vmatmul.mubr.msk.f32.gmra.mrb[172].mxu0 %vm2874_vm7, %v6191_v19  ;;  %v8134_v19 = vpack.c.bf16 %v8540_v48, %v8539_v20  ;;  %v6282_v48 = vld [vmem:[%s11278_s5 + $0x240] sm:$0xff]  ;;  %v6283_v20 = vld [vmem:[%s11278_s5 + $0x248] sm:$0xff] }
 0x504   : > { %8097 = vmatpush3.bf16.msra.mxu0 %v9986_v33  ;;  %7544 = vmatprep.mubr.msk.f32.mxu0 %vm2874_vm7, %v6192_v53  ;;  %v6195_v33 = vld [vmem:[%s11278_s5 + $0x158] sm:$0xff] }
 0x505   : > { %8100 = vmatprep.subr.msk.bf16.mxu0 %vm9447_vm4, %v9996_v39  ;;  %v2777_v53 = vld [vmem:[%s11278_s5 + $0x78] sm:$0xff] }
 0x507   : > { %7545 = vmatmul.mubr.msk.f32.gmra.mrb[174].mxu0 %vm2874_vm7, %v6193_v43  ;;  %v2780_v43 = vld [vmem:[%s11278_s5 + $0x90] sm:$0xff] }
 0x508   : > { %8103 = vmatpush3.bf16.msk.msra.mxu0 %vm9447_vm4, %v9996_v39  ;;  %7547 = vmatprep.mubr.msk.f32.mxu0 %vm2874_vm7, %v6194_v54  ;;  %v6198_v39 = vld [vmem:[%s11278_s5 + $0x170] sm:$0xff]  ;;  %v2781_v54 = vld [vmem:[%s11278_s5 + $0x98] sm:$0xff] }
 0x509   : > { %8105 = vmatprep.subr.bf16.mxu0 %v8104_v61 }
 0x50b   : > { %7548 = vmatmul.mubr.msk.f32.gmra.mrb[176].mxu0 %vm2874_vm7, %v6195_v33  ;;  %v2783_v33 = vld [vmem:[%s11278_s5 + $0xa8] sm:$0xff] }
 0x50c   : > { %7550 = vmatprep.mubr.msk.f32.mxu0 %vm2874_vm7, %v6196_v2  ;;  %v2784_v2 = vld [vmem:[%s11278_s5 + $0xb0] sm:$0xff] }
 0x50f   : > { %7551 = vmatmul.mubr.msk.f32.gmra.mrb[178].mxu0 %vm2874_vm7, %v6197_v14  ;;  %v2785_v14 = vld [vmem:[%s11278_s5 + $0xb8] sm:$0xff] }
 0x510   : > { %7553 = vmatprep.mubr.msk.f32.mxu0 %vm2874_vm7, %v6198_v39  ;;  %v2786_v39 = vld [vmem:[%s11278_s5 + $0xc0] sm:$0xff] }
 0x513   : > { %7554 = vmatmul.mubr.msk.f32.gmra.mrb[180].mxu0 %vm2874_vm7, %v6199_v50  ;;  %v2787_v50 = vld [vmem:[%s11278_s5 + $0xc8] sm:$0xff] }
 0x514   : > { %7556 = vmatprep.mubr.msk.f32.mxu0 %vm2874_vm7, %v6200_v60  ;;  %v2788_v60 = vld [vmem:[%s11278_s5 + $0xd0] sm:$0xff] }
 0x517   : > { %7557 = vmatmul.mubr.msk.f32.gmra.mrb[182].mxu0 %vm2874_vm7, %v6201_v63  ;;  %v8543_v63 = vpop.permute.xlu1 %8542 }
 0x518   : > { %7559 = vmatprep.mubr.msk.f32.mxu0 %vm2874_vm7, %v6202_v5  ;;  %v2789_v5 = vld [vmem:[%s11278_s5 + $0xd8] sm:$0xff] }
 0x51b   : > { %7560 = vmatmul.mubr.msk.f32.gmra.mrb[184].mxu0 %vm2874_vm7, %v6203_v7  ;;  %v6266_v7 = vld [vmem:[%s11278_s5 + $0x1c0] sm:$0xff]  ;;  %v8553_v51 = vpop.permute.xlu1 %8552 }
 0x51c   : > { %7562 = vmatprep.mubr.msk.f32.mxu0 %vm2874_vm7, %v6204_v59  ;;  %v8545_v59 = vunpack.i.h.bf16 %v8543_v63  ;;  %v8555_v22 = vunpack.i.h.bf16 %v8553_v51  ;;  %v8554_v18 = vunpack.i.l.bf16 %v8553_v51  ;;  %v6327_v51 = vld [vmem:[%s11278_s5 + $0x2c0] sm:$0xff] }
 0x51f   : > { %7563 = vmatmul.mubr.msk.f32.gmra.mrb[186].mxu0 %vm2874_vm7, %v6205_v9  ;;  %v8544_v9 = vunpack.i.l.bf16 %v8543_v63  ;;  %v8563_v29 = vpop.permute.xlu1 %8562  ;;  %v6323_v63 = vld [vmem:[%s11278_s5 + $0x2a0] sm:$0xff] }
 0x520   : > { %7565 = vmatprep.mubr.msk.f32.mxu0 %vm2874_vm7, %v6206_v58  ;;  %v8548_v58 = vpop.permute.xlu0 %8547  ;;  %v8565_v35 = vunpack.i.h.bf16 %v8563_v29  ;;  %v8564_v42 = vunpack.i.l.bf16 %v8563_v29  ;;  %v6331_v29 = vld [vmem:[%s11278_s5 + $0x2e0] sm:$0xff] }
 0x521   : > { %v8550_v15 = vunpack.i.h.bf16 %v8548_v58  ;;  %v8549_v13 = vunpack.i.l.bf16 %v8548_v58  ;;  %v6325_v58 = vld [vmem:[%s11278_s5 + $0x2b0] sm:$0xff] }
 0x523   : > { %7566 = vmatmul.mubr.msk.f32.gmra.mrb[188].mxu0 %vm2874_vm7, %v6207_v16  ;;  %v6268_v16 = vld [vmem:[%s11278_s5 + $0x1d0] sm:$0xff]  ;;  %v8573_v34 = vpop.permute.xlu1 %8572 }
 0x524   : > { %7596 = vmatprep.mubr.msk.f32.mxu0 %vm2874_vm7, %v2762_v12  ;;  %v8138_v12 = vpack.c.bf16 %v8545_v59, %v8544_v9  ;;  %v8558_v56 = vpop.permute.xlu0 %8557  ;;  %v8575_v45 = vunpack.i.h.bf16 %v8573_v34  ;;  %v8574_v52 = vunpack.i.l.bf16 %v8573_v34  ;;  %v6324_v9 = vld [vmem:[%s11278_s5 + $0x2a8] sm:$0xff] }
 0x525   : > { %v8560_v27 = vunpack.i.h.bf16 %v8558_v56  ;;  %v8559_v17 = vunpack.i.l.bf16 %v8558_v56  ;;  %v6329_v56 = vld [vmem:[%s11278_s5 + $0x2d0] sm:$0xff] }
 0x527   : > { %7597 = vmatmul.mubr.msk.f32.vlgmr.msra.gmra.mrb[162].mxu0 %vm2874_vm7, %v2763_v21  ;;  %v6269_v21 = vld [vmem:[%s11278_s5 + $0x1d8] sm:$0xff]  ;;  %v8583_v59 = vpop.permute.xlu1 %8582 }
 0x528   : > { %8107 = vmatpush3.bf16.msra.mxu0 %v8104_v61  ;;  %7599 = vmatprep.mubr.msk.f32.mxu0 %vm2874_vm7, %v2764_v32  ;;  %v2782_v61 = vld [vmem:[%s11278_s5 + $0xa0] sm:$0xff]  ;;  %v8568_v4 = vpop.permute.xlu0 %8567 }
 0x529   : > { %8109 = vmatprep.subr.bf16.mxu0 %v8108_v11  ;;  %v6270_v32 = vld [vmem:[%s11278_s5 + $0x1e0] sm:$0xff]  ;;  %v8570_v36 = vunpack.i.h.bf16 %v8568_v4  ;;  %v8569_v28 = vunpack.i.l.bf16 %v8568_v4  ;;  %v6333_v4 = vld [vmem:[%s11278_s5 + $0x2f0] sm:$0xff] }
 0x52b   : > { %7600 = vmatmul.mubr.msk.f32.gmra.mrb[164].mxu0 %vm2874_vm7, %v2765_v25  ;;  %v6271_v25 = vld [vmem:[%s11278_s5 + $0x1e8] sm:$0xff] }
 0x52c   : > { %8111 = vmatpush3.bf16.msra.mxu0 %v8108_v11  ;;  %7602 = vmatprep.mubr.msk.f32.mxu0 %vm2874_vm7, %v2766_v24  ;;  %v8142_v11 = vpack.c.bf16 %v8550_v15, %v8549_v13  ;;  %v6272_v24 = vld [vmem:[%s11278_s5 + $0x1f0] sm:$0xff]  ;;  %v6326_v13 = vld [vmem:[%s11278_s5 + $0x2b8] sm:$0xff] }
 0x52d   : > { %8113 = vmatprep.subr.bf16.mxu0 %v8112_v37 }
 0x52f   : > { %7603 = vmatmul.mubr.msk.f32.gmra.mrb[166].mxu0 %vm2874_vm7, %v2767_v8  ;;  %v6273_v8 = vld [vmem:[%s11278_s5 + $0x1f8] sm:$0xff] }
 0x530   : > { %8115 = vmatpush3.bf16.msra.mxu0 %v8112_v37  ;;  %7605 = vmatprep.mubr.msk.f32.mxu0 %vm2874_vm7, %v2768_v30  ;;  %v8146_v37 = vpack.c.bf16 %v8555_v22, %v8554_v18  ;;  %v6274_v30 = vld [vmem:[%s11278_s5 + $0x200] sm:$0xff]  ;;  %v8593_v18 = vpop.permute.xlu1 %8592 }
 0x531   : > { %8117 = vmatprep.subr.bf16.mxu0 %v8116_v31 }
 0x533   : > { %7606 = vmatmul.mubr.msk.f32.gmra.mrb[168].mxu0 %vm2874_vm7, %v2769_v6  ;;  %v6275_v6 = vld [vmem:[%s11278_s5 + $0x208] sm:$0xff] }
 0x534   : > { %8119 = vmatpush3.bf16.msra.mxu0 %v8116_v31  ;;  %7608 = vmatprep.mubr.msk.f32.mxu0 %vm2874_vm7, %v2770_v38  ;;  %v8150_v31 = vpack.c.bf16 %v8560_v27, %v8559_v17  ;;  %v6276_v38 = vld [vmem:[%s11278_s5 + $0x210] sm:$0xff]  ;;  %v6330_v17 = vld [vmem:[%s11278_s5 + $0x2d8] sm:$0xff] }
 0x535   : > { %8121 = vmatprep.subr.bf16.mxu0 %v8120_v3 }
 0x537   : > { %7609 = vmatmul.mubr.msk.f32.gmra.mrb[170].mxu0 %vm2874_vm7, %v2771_v23  ;;  %v6277_v23 = vld [vmem:[%s11278_s5 + $0x218] sm:$0xff] }
 0x538   : > { %8123 = vmatpush3.bf16.msra.mxu0 %v8120_v3  ;;  %7611 = vmatprep.mubr.msk.f32.mxu0 %vm2874_vm7, %v2772_v40  ;;  %v8154_v3 = vpack.c.bf16 %v8565_v35, %v8564_v42  ;;  %v6278_v40 = vld [vmem:[%s11278_s5 + $0x220] sm:$0xff]  ;;  %v8603_v42 = vpop.permute.xlu1 %8602 }
 0x539   : > { %8125 = vmatprep.subr.bf16.mxu0 %v8124_v47 }
 0x53b   : > { %7612 = vmatmul.mubr.msk.f32.gmra.mrb[172].mxu0 %vm2874_vm7, %v2773_v62  ;;  %v6280_v62 = vld [vmem:[%s11278_s5 + $0x230] sm:$0xff] }
 0x53c   : > { %8127 = vmatpush3.bf16.msra.mxu0 %v8124_v47  ;;  %7614 = vmatprep.mubr.msk.f32.mxu0 %vm2874_vm7, %v2774_v44  ;;  %v8158_v47 = vpack.c.bf16 %v8570_v36, %v8569_v28  ;;  %v8164_v44 = vpack.c.bf16 %v8575_v45, %v8574_v52  ;;  %v6334_v36 = vld [vmem:[%s11278_s5 + $0x2f8] sm:$0xff]  ;;  %v6335_v28 = vld [vmem:[%s11278_s5 + $0x300] sm:$0xff] }
 0x53d   : > { %8130 = vmatprep.subr.msk.bf16.mxu0 %vm9447_vm4, %v8128_v10  ;;  %v6338_v45 = vld [vmem:[%s11278_s5 + $0x318] sm:$0xff]  ;;  %v6339_v52 = vld [vmem:[%s11278_s5 + $0x320] sm:$0xff] }
 0x53f   : > { %7615 = vmatmul.mubr.msk.f32.gmra.mrb[174].mxu0 %vm2874_vm7, %v2775_v41  ;;  %v6284_v41 = vld [vmem:[%s11278_s5 + $0x250] sm:$0xff] }
 0x540   : > { %8133 = vmatpush3.bf16.msk.msra.mxu0 %vm9447_vm4, %v8128_v10  ;;  %7617 = vmatprep.mubr.msk.f32.mxu0 %vm2874_vm7, %v2776_v1  ;;  %v6281_v10 = vld [vmem:[%s11278_s5 + $0x238] sm:$0xff] }
 0x541   : > { %8135 = vmatprep.subr.bf16.mxu0 %v8134_v19  ;;  %v6285_v1 = vld [vmem:[%s11278_s5 + $0x258] sm:$0xff] }
 0x543   : > { %7618 = vmatmul.mubr.msk.f32.gmra.mrb[176].mxu0 %vm2874_vm7, %v2777_v53  ;;  %v4848_v53 = vld [vmem:[%s11280_s7] sm:$0xff] }
 0x544   : > { %7620 = vmatprep.mubr.msk.f32.mxu0 %vm2874_vm7, %v2778_v55  ;;  %v4849_v55 = vld [vmem:[%s11280_s7 + $0x8] sm:$0x3f] }
 0x547   : > { %7621 = vmatmul.mubr.msk.f32.gmra.mrb[178].mxu0 %vm2874_vm7, %v2779_v57  ;;  %v6287_v57 = vld [vmem:[%s11278_s5 + $0x268] sm:$0xff] }
 0x548   : > { %7623 = vmatprep.mubr.msk.f32.mxu0 %vm2874_vm7, %v2780_v43  ;;  %v8194_v43 = vpack.c.bf16 %v4849_v55, %v4848_v53  ;;  %v6380_v53 = vld [vmem:[%s11278_s5 + $0x380] sm:$0xff]  ;;  %v6381_v55 = vld [vmem:[%s11278_s5 + $0x388] sm:$0xff] }
 0x54a   : > { %8196 = vmatprep.subr.msk.bf16.mxu1 %vm10452_vm9, %v8194_v43 }
 0x54b   : > { %7624 = vmatmul.mubr.msk.f32.gmra.mrb[180].mxu0 %vm2874_vm7, %v2781_v54  ;;  %8199 = vmatpush3.bf16.msk.msra.mxu1 %vm10452_vm9, %v8194_v43  ;;  %v6383_v43 = vld [vmem:[%s11278_s5 + $0x398] sm:$0xff] }
 0x54c   : > { %7626 = vmatprep.mubr.msk.f32.mxu0 %vm2874_vm7, %v2782_v61  ;;  %v6288_v61 = vld [vmem:[%s11278_s5 + $0x270] sm:$0xff] }
 0x54f   : > { %7627 = vmatmul.mubr.msk.f32.gmra.mrb[182].mxu0 %vm2874_vm7, %v2783_v33  ;;  %v6289_v33 = vld [vmem:[%s11278_s5 + $0x278] sm:$0xff] }
 0x550   : > { %7629 = vmatprep.mubr.msk.f32.mxu0 %vm2874_vm7, %v2784_v2  ;;  %v6290_v2 = vld [vmem:[%s11278_s5 + $0x280] sm:$0xff] }
 0x553   : > { %7630 = vmatmul.mubr.msk.f32.gmra.mrb[184].mxu0 %vm2874_vm7, %v2785_v14  ;;  %v6291_v14 = vld [vmem:[%s11278_s5 + $0x288] sm:$0xff] }
 0x554   : > { %7632 = vmatprep.mubr.msk.f32.mxu0 %vm2874_vm7, %v2786_v39  ;;  %v6292_v39 = vld [vmem:[%s11278_s5 + $0x290] sm:$0xff] }
 0x557   : > { %7633 = vmatmul.mubr.msk.f32.gmra.mrb[186].mxu0 %vm2874_vm7, %v2787_v50  ;;  %v8578_v50 = vpop.permute.xlu0 %8577 }
 0x558   : > { %7635 = vmatprep.mubr.msk.f32.mxu0 %vm2874_vm7, %v2788_v60  ;;  %v6293_v60 = vld [vmem:[%s11278_s5 + $0x298] sm:$0xff] }
 0x55b   : > { %7636 = vmatmul.mubr.msk.f32.gmra.mrb[188].mxu0 %vm2874_vm7, %v2789_v5  ;;  %v8580_v5 = vunpack.i.h.bf16 %v8578_v50  ;;  %v8588_v15 = vpop.permute.xlu0 %8587 }
 0x55c   : > { %7666 = vmatprep.mubr.msk.f32.mxu0 %vm2874_vm7, %v6266_v7  ;;  %v8579_v7 = vunpack.i.l.bf16 %v8578_v50  ;;  %v8589_v22 = vunpack.i.l.bf16 %v8588_v15  ;;  %v6389_v50 = vld [vmem:[%s11278_s5 + $0x3c8] sm:$0xff] }
 0x55f   : > { %7667 = vmatmul.mubr.msk.f32.vlgmr.msra.gmra.mrb[162].mxu0 %vm2874_vm7, %v6267_v46  ;;  %v8585_v46 = vunpack.i.h.bf16 %v8583_v59  ;;  %v8598_v27 = vpop.permute.xlu0 %8597 }
 0x560   : > { %8137 = vmatpush3.bf16.msra.mxu0 %v8134_v19  ;;  %7669 = vmatprep.mubr.msk.f32.mxu0 %vm2874_vm7, %v6268_v16  ;;  %v6286_v19 = vld [vmem:[%s11278_s5 + $0x260] sm:$0xff]  ;;  %v8584_v16 = vunpack.i.l.bf16 %v8583_v59  ;;  %v8599_v35 = vunpack.i.l.bf16 %v8598_v27  ;;  %v6394_v59 = vld [vmem:[%s11278_s5 + $0x3f0] sm:$0xff] }
 0x561   : > { %8139 = vmatprep.subr.bf16.mxu0 %v8138_v12 }
 0x563   : > { %7670 = vmatmul.mubr.msk.f32.gmra.mrb[164].mxu0 %vm2874_vm7, %v6269_v21  ;;  %v8172_v21 = vpack.c.bf16 %v8585_v46, %v8584_v16  ;;  %v6397_v46 = vld [vmem:[%s11278_s5 + $0x408] sm:$0xff]  ;;  %v6398_v16 = vld [vmem:[%s11278_s5 + $0x410] sm:$0xff] }
 0x564   : > { %8141 = vmatpush3.bf16.msra.mxu0 %v8138_v12  ;;  %7672 = vmatprep.mubr.msk.f32.mxu0 %vm2874_vm7, %v6270_v32  ;;  %v8168_v12 = vpack.c.bf16 %v8580_v5, %v8579_v7  ;;  %v8590_v32 = vunpack.i.h.bf16 %v8588_v15  ;;  %v6392_v5 = vld [vmem:[%s11278_s5 + $0x3e0] sm:$0xff]  ;;  %v6393_v7 = vld [vmem:[%s11278_s5 + $0x3e8] sm:$0xff] }
 0x565   : > { %8143 = vmatprep.subr.bf16.mxu0 %v8142_v11  ;;  %v6400_v15 = vld [vmem:[%s11278_s5 + $0x420] sm:$0xff] }
 0x567   : > { %7673 = vmatmul.mubr.msk.f32.gmra.mrb[166].mxu0 %vm2874_vm7, %v6271_v25  ;;  %v8595_v25 = vunpack.i.h.bf16 %v8593_v18 }
 0x568   : > { %8145 = vmatpush3.bf16.msra.mxu0 %v8142_v11  ;;  %7675 = vmatprep.mubr.msk.f32.mxu0 %vm2874_vm7, %v6272_v24  ;;  %v6328_v11 = vld [vmem:[%s11278_s5 + $0x2c8] sm:$0xff]  ;;  %v8594_v24 = vunpack.i.l.bf16 %v8593_v18  ;;  %v6406_v18 = vld [vmem:[%s11278_s5 + $0x450] sm:$0xff] }
 0x569   : > { %8147 = vmatprep.subr.bf16.mxu0 %v8146_v37 }
 0x56b   : > { %7676 = vmatmul.mubr.msk.f32.gmra.mrb[168].mxu0 %vm2874_vm7, %v6273_v8  ;;  %v8180_v8 = vpack.c.bf16 %v8595_v25, %v8594_v24  ;;  %v6467_v25 = vld [vmem:[%s11280_s7 + $0x18] sm:$0x3f] }
 0x56c   : > { %8149 = vmatpush3.bf16.msra.mxu0 %v8146_v37  ;;  %7678 = vmatprep.mubr.msk.f32.mxu0 %vm2874_vm7, %v6274_v30  ;;  %v8176_v37 = vpack.c.bf16 %v8590_v32, %v8589_v22  ;;  %v8600_v30 = vunpack.i.h.bf16 %v8598_v27  ;;  %v6404_v32 = vld [vmem:[%s11278_s5 + $0x440] sm:$0xff]  ;;  %v6405_v22 = vld [vmem:[%s11278_s5 + $0x448] sm:$0xff]  ;;  %v4655_v27 = vpop.permute.xlu0 %4654 }
 0x56d   : > { %8151 = vmatprep.subr.bf16.mxu0 %v8150_v31 }
 0x56f   : > { %7679 = vmatmul.mubr.msk.f32.gmra.mrb[170].mxu0 %vm2874_vm7, %v6275_v6  ;;  %v8605_v6 = vunpack.i.h.bf16 %v8603_v42 }
 0x570   : > { %8153 = vmatpush3.bf16.msra.mxu0 %v8150_v31  ;;  %7681 = vmatprep.mubr.msk.f32.mxu0 %vm2874_vm7, %v6276_v38  ;;  %v6332_v31 = vld [vmem:[%s11278_s5 + $0x2e8] sm:$0xff]  ;;  %v8604_v38 = vunpack.i.l.bf16 %v8603_v42 }
 0x571   : > { %8155 = vmatprep.subr.bf16.mxu0 %v8154_v3 }
 0x572   : > { %v8188_v34 = vpack.c.bf16 %v8605_v6, %v8604_v38 }
 0x573   : > { %7682 = vmatmul.mubr.msk.f32.gmra.mrb[172].mxu0 %vm2874_vm7, %v6277_v23  ;;  %v6336_v23 = vld [vmem:[%s11278_s5 + $0x308] sm:$0xff] }
 0x574   : > { %8157 = vmatpush3.bf16.msra.mxu0 %v8154_v3  ;;  %7684 = vmatprep.mubr.msk.f32.mxu0 %vm2874_vm7, %v6278_v40  ;;  %v8184_v3 = vpack.c.bf16 %v8600_v30, %v8599_v35  ;;  %v6337_v40 = vld [vmem:[%s11278_s5 + $0x310] sm:$0xff] }
 0x575   : > { %8160 = vmatprep.subr.msk.bf16.mxu0 %vm9447_vm4, %v8158_v47 }
 0x577   : > { %7685 = vmatmul.mubr.msk.f32.gmra.mrb[174].mxu0 %vm2874_vm7, %v6279_v49  ;;  %v6342_v49 = vld [vmem:[%s11278_s5 + $0x338] sm:$0xff] }
 0x578   : > { %8163 = vmatpush3.bf16.msk.msra.mxu0 %vm9447_vm4, %v8158_v47  ;;  %7687 = vmatprep.mubr.msk.f32.mxu0 %vm2874_vm7, %v6280_v62  ;;  %v6340_v47 = vld [vmem:[%s11278_s5 + $0x328] sm:$0xff]  ;;  %v6343_v62 = vld [vmem:[%s11278_s5 + $0x340] sm:$0xff] }
 0x579   : > { %8165 = vmatprep.subr.bf16.mxu0 %v8164_v44 }
 0x57b   : > { %7688 = vmatmul.mubr.msk.f32.gmra.mrb[176].mxu0 %vm2874_vm7, %v6281_v10  ;;  %v6345_v10 = vld [vmem:[%s11278_s5 + $0x350] sm:$0xff] }
 0x57c   : > { %7690 = vmatprep.mubr.msk.f32.mxu0 %vm2874_vm7, %v6282_v48  ;;  %v6346_v48 = vld [vmem:[%s11278_s5 + $0x358] sm:$0xff] }
 0x57f   : > { %7691 = vmatmul.mubr.msk.f32.gmra.mrb[178].mxu0 %vm2874_vm7, %v6283_v20  ;;  %v6347_v20 = vld [vmem:[%s11278_s5 + $0x360] sm:$0xff] }
 0x580   : > { %7693 = vmatprep.mubr.msk.f32.mxu0 %vm2874_vm7, %v6284_v41  ;;  %v6348_v41 = vld [vmem:[%s11278_s5 + $0x368] sm:$0xff] }
 0x583   : > { %7694 = vmatmul.mubr.msk.f32.gmra.mrb[180].mxu0 %vm2874_vm7, %v6285_v1  ;;  %v6349_v1 = vld [vmem:[%s11278_s5 + $0x370] sm:$0xff] }
 0x584   : > { %7696 = vmatprep.mubr.msk.f32.mxu0 %vm2874_vm7, %v6286_v19  ;;  %v6350_v19 = vld [vmem:[%s11278_s5 + $0x378] sm:$0xff] }
 0x587   : > { %7697 = vmatmul.mubr.msk.f32.gmra.mrb[182].mxu0 %vm2874_vm7, %v6287_v57  ;;  %v6382_v57 = vld [vmem:[%s11278_s5 + $0x390] sm:$0xff] }
 0x588   : > { %7699 = vmatprep.mubr.msk.f32.mxu0 %vm2874_vm7, %v6288_v61  ;;  %v6384_v61 = vld [vmem:[%s11278_s5 + $0x3a0] sm:$0xff] }
 0x58b   : > { %7700 = vmatmul.mubr.msk.f32.gmra.mrb[184].mxu0 %vm2874_vm7, %v6289_v33  ;;  %v6385_v33 = vld [vmem:[%s11278_s5 + $0x3a8] sm:$0xff] }
 0x58c   : > { %7702 = vmatprep.mubr.msk.f32.mxu0 %vm2874_vm7, %v6290_v2  ;;  %v6386_v2 = vld [vmem:[%s11278_s5 + $0x3b0] sm:$0xff] }
 0x58f   : > { %7703 = vmatmul.mubr.msk.f32.gmra.mrb[186].mxu0 %vm2874_vm7, %v6291_v14  ;;  %v6387_v14 = vld [vmem:[%s11278_s5 + $0x3b8] sm:$0xff] }
 0x590   : > { %7705 = vmatprep.mubr.msk.f32.mxu0 %vm2874_vm7, %v6292_v39  ;;  %v6388_v39 = vld [vmem:[%s11278_s5 + $0x3c0] sm:$0xff] }
 0x593   : > { %7706 = vmatmul.mubr.msk.f32.gmra.mrb[188].mxu0 %vm2874_vm7, %v6293_v60  ;;  %v6390_v60 = vld [vmem:[%s11278_s5 + $0x3d0] sm:$0xff] }
 0x594   : > { %7736 = vmatprep.mubr.msk.f32.mxu0 %vm2874_vm7, %v6323_v63  ;;  %v6391_v63 = vld [vmem:[%s11278_s5 + $0x3d8] sm:$0xff] }
 0x597   : > { %7737 = vmatmul.mubr.msk.f32.vlgmr.msra.gmra.mrb[162].mxu0 %vm2874_vm7, %v6324_v9  ;;  %v6395_v9 = vld [vmem:[%s11278_s5 + $0x3f8] sm:$0xff] }
 0x598   : > { %8167 = vmatpush3.bf16.msra.mxu0 %v8164_v44  ;;  %7739 = vmatprep.mubr.msk.f32.mxu0 %vm2874_vm7, %v6325_v58  ;;  %v6344_v44 = vld [vmem:[%s11278_s5 + $0x348] sm:$0xff]  ;;  %v6396_v58 = vld [vmem:[%s11278_s5 + $0x400] sm:$0xff] }
 0x599   : > { %8169 = vmatprep.subr.bf16.mxu0 %v8168_v12 }
 0x59b   : > { %7740 = vmatmul.mubr.msk.f32.gmra.mrb[164].mxu0 %vm2874_vm7, %v6326_v13  ;;  %v6401_v13 = vld [vmem:[%s11278_s5 + $0x428] sm:$0xff] }
 0x59c   : > { %8171 = vmatpush3.bf16.msra.mxu0 %v8168_v12  ;;  %7742 = vmatprep.mubr.msk.f32.mxu0 %vm2874_vm7, %v6327_v51  ;;  %v6399_v12 = vld [vmem:[%s11278_s5 + $0x418] sm:$0xff]  ;;  %v6402_v51 = vld [vmem:[%s11278_s5 + $0x430] sm:$0xff] }
 0x59d   : > { %8173 = vmatprep.subr.bf16.mxu0 %v8172_v21 }
 0x59f   : > { %7743 = vmatmul.mubr.msk.f32.gmra.mrb[166].mxu0 %vm2874_vm7, %v6328_v11  ;;  %v6407_v11 = vld [vmem:[%s11278_s5 + $0x458] sm:$0xff] }
 0x5a0   : > { %8175 = vmatpush3.bf16.msra.mxu0 %v8172_v21  ;;  %7745 = vmatprep.mubr.msk.f32.mxu0 %vm2874_vm7, %v6329_v56  ;;  %v6403_v21 = vld [vmem:[%s11278_s5 + $0x438] sm:$0xff]  ;;  %v6466_v56 = vld [vmem:[%s11280_s7 + $0x10] sm:$0xff] }
 0x5a1   : > { %8177 = vmatprep.subr.bf16.mxu0 %v8176_v37  ;;  %v8200_v24 = vpack.c.bf16 %v6467_v25, %v6466_v56 }
 0x5a3   : > { %7746 = vmatmul.mubr.msk.f32.gmra.mrb[168].mxu0 %vm2874_vm7, %v6330_v17  ;;  %8202 = vmatprep.subr.msk.bf16.mxu1 %vm10452_vm9, %v8200_v24 }
 0x5a4   : > { %8179 = vmatpush3.bf16.msra.mxu0 %v8176_v37  ;;  %7748 = vmatprep.mubr.msk.f32.mxu0 %vm2874_vm7, %v6331_v29  ;;  %v4660_v37 = vpop.permute.xlu1 %4659  ;;  %v4665_v29 = vpop.permute.xlu0 %4664 }
 0x5a5   : > { %8181 = vmatprep.subr.bf16.mxu0 %v8180_v8 }
 0x5a7   : > { %7749 = vmatmul.mubr.msk.f32.gmra.mrb[170].mxu0 %vm2874_vm7, %v6332_v31 }
 0x5a8   : > { %8183 = vmatpush3.bf16.msra.mxu0 %v8180_v8  ;;  %7751 = vmatprep.mubr.msk.f32.mxu0 %vm2874_vm7, %v6333_v4  ;;  %v4670_v17 = vpop.permute.xlu1 %4669  ;;  %v4675_v30 = vpop.permute.xlu0 %4674 }
 0x5a9   : > { %8185 = vmatprep.subr.bf16.mxu0 %v8184_v3 }
 0x5ab   : > { %7752 = vmatmul.mubr.msk.f32.gmra.mrb[172].mxu0 %vm2874_vm7, %v6334_v36 }
 0x5ac   : > { %8187 = vmatpush3.bf16.msra.mxu0 %v8184_v3  ;;  %7754 = vmatprep.mubr.msk.f32.mxu0 %vm2874_vm7, %v6335_v28  ;;  %v4680_v8 = vpop.permute.xlu1 %4679  ;;  %v4685_v42 = vpop.permute.xlu0 %4684 }
 0x5ad   : > { %8190 = vmatprep.subr.msk.bf16.mxu0 %vm9447_vm4, %v8188_v34 }
 0x5af   : > { %7755 = vmatmul.mubr.msk.f32.gmra.mrb[174].mxu0 %vm2874_vm7, %v6336_v23 }
 0x5b0   : > { %8193 = vmatpush3.bf16.msk.msra.mxu0 %vm9447_vm4, %v8188_v34  ;;  %7757 = vmatprep.mubr.msk.f32.mxu0 %vm2874_vm7, %v6337_v40  ;;  %v4690_v35 = vpop.permute.xlu1 %4689  ;;  %v4695_v4 = vpop.permute.xlu0 %4694 }
 0x5b3   : > { %7758 = vmatmul.mubr.msk.f32.gmra.mrb[176].mxu0 %vm2874_vm7, %v6338_v45 }
 0x5b4   : > { %7760 = vmatprep.mubr.msk.f32.mxu0 %vm2874_vm7, %v6339_v52  ;;  %v4700_v31 = vpop.permute.xlu1 %4699  ;;  %v4705_v40 = vpop.permute.xlu0 %4704 }
 0x5b7   : > { %7761 = vmatmul.mubr.msk.f32.gmra.mrb[178].mxu0 %vm2874_vm7, %v6340_v47 }
 0x5b8   : > { %7763 = vmatprep.mubr.msk.f32.mxu0 %vm2874_vm7, %v6341_v26  ;;  %v4710_v28 = vpop.permute.xlu1 %4709 }
 0x5bb   : > { %7764 = vmatmul.mubr.msk.f32.gmra.mrb[180].mxu0 %vm2874_vm7, %v6342_v49 }
 0x5bc   : > { %7766 = vmatprep.mubr.msk.f32.mxu0 %vm2874_vm7, %v6343_v62 }
 0x5bf   : > { %7767 = vmatmul.mubr.msk.f32.gmra.mrb[182].mxu0 %vm2874_vm7, %v6344_v44 }
 0x5c0   : > { %7769 = vmatprep.mubr.msk.f32.mxu0 %vm2874_vm7, %v6345_v10 }
 0x5c3   : > { %7770 = vmatmul.mubr.msk.f32.gmra.mrb[184].mxu0 %vm2874_vm7, %v6346_v48 }
 0x5c4   : > { %7772 = vmatprep.mubr.msk.f32.mxu0 %vm2874_vm7, %v6347_v20  ;;  %v4720_v20 = vpop.permute.xlu1 %4719 }
 0x5c7   : > { %7773 = vmatmul.mubr.msk.f32.gmra.mrb[186].mxu0 %vm2874_vm7, %v6348_v41 }
 0x5c8   : > { %7775 = vmatprep.mubr.msk.f32.mxu0 %vm2874_vm7, %v6349_v1  ;;  %v4715_v1 = vpop.permute.xlu0 %4714 }
 0x5cb   : > { %7776 = vmatmul.mubr.msk.f32.gmra.mrb[188].mxu0 %vm2874_vm7, %v6350_v19 }
 0x5cc   : > { %7806 = vmatprep.mubr.msk.f32.mxu0 %vm2874_vm7, %v6380_v53 }
 0x5cf   : > { %7807 = vmatmul.mubr.msk.f32.vlgmr.msra.gmra.mrb[162].mxu0 %vm2874_vm7, %v6381_v55 }
 0x5d0   : > { %7809 = vmatprep.mubr.msk.f32.mxu0 %vm2874_vm7, %v6382_v57 }
 0x5d3   : > { %7810 = vmatmul.mubr.msk.f32.gmra.mrb[164].mxu0 %vm2874_vm7, %v6383_v43 }
 0x5d4   : > { %7812 = vmatprep.mubr.msk.f32.mxu0 %vm2874_vm7, %v6384_v61  ;;  %v4730_v61 = vpop.permute.xlu1 %4729 }
 0x5d7   : > { %7813 = vmatmul.mubr.msk.f32.gmra.mrb[166].mxu0 %vm2874_vm7, %v6385_v33 }
 0x5d8   : > { %7815 = vmatprep.mubr.msk.f32.mxu0 %vm2874_vm7, %v6386_v2 }
 0x5db   : > { %7816 = vmatmul.mubr.msk.f32.gmra.mrb[168].mxu0 %vm2874_vm7, %v6387_v14  ;;  %v4725_v14 = vpop.permute.xlu0 %4724 }
 0x5dc   : > { %7818 = vmatprep.mubr.msk.f32.mxu0 %vm2874_vm7, %v6388_v39 }
 0x5df   : > { %7819 = vmatmul.mubr.msk.f32.gmra.mrb[170].mxu0 %vm2874_vm7, %v6389_v50 }
 0x5e0   : > { %7821 = vmatprep.mubr.msk.f32.mxu0 %vm2874_vm7, %v6390_v60 }
 0x5e3   : > { %7822 = vmatmul.mubr.msk.f32.gmra.mrb[172].mxu0 %vm2874_vm7, %v6391_v63 }
 0x5e4   : > { %7824 = vmatprep.mubr.msk.f32.mxu0 %vm2874_vm7, %v6392_v5 }
 0x5e7   : > { %7825 = vmatmul.mubr.msk.f32.gmra.mrb[174].mxu0 %vm2874_vm7, %v6393_v7 }
 0x5e8   : > { %7827 = vmatprep.mubr.msk.f32.mxu0 %vm2874_vm7, %v6394_v59 }
 0x5eb   : > { %7828 = vmatmul.mubr.msk.f32.gmra.mrb[176].mxu0 %vm2874_vm7, %v6395_v9 }
 0x5ec   : > { %7830 = vmatprep.mubr.msk.f32.mxu0 %vm2874_vm7, %v6396_v58 }
 0x5ef   : > { %7831 = vmatmul.mubr.msk.f32.gmra.mrb[178].mxu0 %vm2874_vm7, %v6397_v46  ;;  %v4740_v46 = vpop.permute.xlu1 %4739 }
 0x5f0   : > { %7833 = vmatprep.mubr.msk.f32.mxu0 %vm2874_vm7, %v6398_v16 }
 0x5f3   : > { %7834 = vmatmul.mubr.msk.f32.gmra.mrb[180].mxu0 %vm2874_vm7, %v6399_v12  ;;  %v4735_v12 = vpop.permute.xlu0 %4734 }
 0x5f4   : > { %7836 = vmatprep.mubr.msk.f32.mxu0 %vm2874_vm7, %v6400_v15 }
 0x5f7   : > { %7837 = vmatmul.mubr.msk.f32.gmra.mrb[182].mxu0 %vm2874_vm7, %v6401_v13  ;;  %v4745_v25 = vpop.permute.xlu0 %4744 }
 0x5f8   : > { %7839 = vmatprep.mubr.msk.f32.mxu0 %vm2874_vm7, %v6402_v51 }
 0x5fb   : > { %7840 = vmatmul.mubr.msk.f32.gmra.mrb[184].mxu0 %vm2874_vm7, %v6403_v21 }
 0x5fc   : > { %7842 = vmatprep.mubr.msk.f32.mxu0 %vm2874_vm7, %v6404_v32 }
 0x5ff   : > { %7843 = vmatmul.mubr.msk.f32.gmra.mrb[186].mxu0 %vm2874_vm7, %v6405_v22 }
 0x600   : > { %7845 = vmatprep.mubr.msk.f32.mxu0 %vm2874_vm7, %v6406_v18  ;;  %v4750_v18 = vpop.permute.xlu1 %4749 }
 0x603   : > { %7846 = vmatmul.mubr.msk.f32.gmra.mrb[188].mxu0 %vm2874_vm7, %v6407_v11 }
 0x6a2   : > { %v7808_v6 = vpop.f32.mrb[162].mxu0 }
 0x6a3   : > { %v10721_v38 = vadd.f32 %v7808_v6, %v4660_v37  ;;  %v4457_v3 = vpop.f32.mrb[163].mxu0  ;;  %v4755_v6 = vpop.permute.xlu0 %4754 }
 0x6a4   : > { %v10723_v36 = vadd.f32 %v4655_v27, %v4457_v3 }
 0x6a5   : > { %v4821_v45 = vmax.f32 %v10721_v38, 0.0  ;;  %v5384_v38 = vld [vmem:[%s11281_s8 + $0x8] sm:$0xff] }
 0x6a6   : > { %v4820_v34 = vmax.f32 %v10723_v36, 0.0  ;;  %v7811_v23 = vpop.f32.mrb[164].mxu0 }
 0x6a7   : > { %v10727_v52 = vadd.f32 %v7811_v23, %v4670_v17  ;;  %v4467_v47 = vpop.f32.mrb[165].mxu0 }
 0x6a8   : > { %v10729_v26 = vadd.f32 %v4665_v29, %v4467_v47  ;;  %7852 = vmatprep.mubr.msk.f32.mxu1 %vm4850_vm10, %v4820_v34 }
 0x6a9   : > { %7853 = vmatmul.mubr.msk.f32.vlgmr.msra.gmra.mrb[188].mxu1 %vm4850_vm10, %v4821_v45  ;;  %v4823_v44 = vmax.f32 %v10727_v52, 0.0 }
 0x6aa   : > { %v4822_v49 = vmax.f32 %v10729_v26, 0.0  ;;  %v7814_v62 = vpop.f32.mrb[166].mxu0  ;;  %8205 = vmatpush3.bf16.msk.msra.mxu1 %vm10452_vm9, %v8200_v24 }
 0x6ab   : > { %v10741_v10 = vadd.f32 %v7814_v62, %v4680_v8  ;;  %v4477_v48 = vpop.f32.mrb[167].mxu0  ;;  %8206 = vmatprep.subr.bf16.mxu1 %v8614_v0 }
 0x6ac   : > { %v10744_v41 = vadd.f32 %v4675_v30, %v4477_v48  ;;  %7855 = vmatprep.mubr.msk.f32.mxu1 %vm4850_vm10, %v4822_v49 }
 0x6ad   : > { %7856 = vmatmul.mubr.msk.f32.gmra.mrb[190].mxu1 %vm4850_vm10, %v4823_v44  ;;  %v4825_v53 = vmax.f32 %v10741_v10, 0.0 }
 0x6ae   : > { %v4824_v54 = vmax.f32 %v10744_v41, 0.0  ;;  %v7817_v19 = vpop.f32.mrb[168].mxu0 }
 0x6af   : > { %v10754_v55 = vadd.f32 %v7817_v19, %v4690_v35  ;;  %v4487_v57 = vpop.f32.mrb[169].mxu0  ;;  %v4765_v19 = vpop.permute.xlu0 %4764 }
 0x6b0   : > { %v10756_v43 = vadd.f32 %v4685_v42, %v4487_v57  ;;  %7858 = vmatprep.mubr.msk.f32.mxu1 %vm4850_vm10, %v4824_v54 }
 0x6b1   : > { %7859 = vmatmul.mubr.msk.f32.gmra.mrb[192].mxu1 %vm4850_vm10, %v4825_v53  ;;  %v4827_v39 = vmax.f32 %v10754_v55, 0.0 }
 0x6b2   : > { %v4826_v33 = vmax.f32 %v10756_v43, 0.0  ;;  %v7820_v2 = vpop.f32.mrb[170].mxu0 }
 0x6b3   : > { %v10766_v50 = vadd.f32 %v7820_v2, %v4700_v31  ;;  %v4497_v60 = vpop.f32.mrb[171].mxu0  ;;  %v4760_v31 = vpop.permute.xlu1 %4759 }
 0x6b4   : > { %v10768_v63 = vadd.f32 %v4695_v4, %v4497_v60  ;;  %7861 = vmatprep.mubr.msk.f32.mxu1 %vm4850_vm10, %v4826_v33 }
 0x6b5   : > { %7862 = vmatmul.mubr.msk.f32.gmra.mrb[194].mxu1 %vm4850_vm10, %v4827_v39  ;;  %v4829_v59 = vmax.f32 %v10766_v50, 0.0 }
 0x6b6   : > { %v4828_v5 = vmax.f32 %v10768_v63, 0.0  ;;  %v7823_v7 = vpop.f32.mrb[172].mxu0 }
 0x6b7   : > { %v10778_v9 = vadd.f32 %v7823_v7, %v4710_v28  ;;  %v4507_v58 = vpop.f32.mrb[173].mxu0  ;;  %v4770_v48 = vpop.permute.xlu1 %4769 }
 0x6b8   : > { %v10780_v16 = vadd.f32 %v4705_v40, %v4507_v58  ;;  %7864 = vmatprep.mubr.msk.f32.mxu1 %vm4850_vm10, %v4828_v5 }
 0x6b9   : > { %7865 = vmatmul.mubr.msk.f32.gmra.mrb[196].mxu1 %vm4850_vm10, %v4829_v59  ;;  %v4831_v51 = vmax.f32 %v10778_v9, 0.0 }
 0x6ba   : > { %v4830_v15 = vmax.f32 %v10780_v16, 0.0  ;;  %v7826_v13 = vpop.f32.mrb[174].mxu0 }
 0x6bb   : > { %v10790_v21 = vadd.f32 %v7826_v13, %v4720_v20  ;;  %v4517_v32 = vpop.f32.mrb[175].mxu0  ;;  %v4780_v13 = vpop.permute.xlu1 %4779 }
 0x6bc   : > { %v10792_v22 = vadd.f32 %v4715_v1, %v4517_v32  ;;  %7867 = vmatprep.mubr.msk.f32.mxu1 %vm4850_vm10, %v4830_v15 }
 0x6bd   : > { %7868 = vmatmul.mubr.msk.f32.gmra.mrb[198].mxu1 %vm4850_vm10, %v4831_v51  ;;  %v4833_v24 = vmax.f32 %v10790_v21, 0.0 }
 0x6be   : > { %v4832_v11 = vmax.f32 %v10792_v22, 0.0  ;;  %v7829_v56 = vpop.f32.mrb[176].mxu0 }
 0x6bf   : > { %v10802_v37 = vadd.f32 %v7829_v56, %v4730_v61  ;;  %v4527_v27 = vpop.f32.mrb[177].mxu0 }
 0x6c0   : > { %v10804_v17 = vadd.f32 %v4725_v14, %v4527_v27  ;;  %7870 = vmatprep.mubr.msk.f32.mxu1 %vm4850_vm10, %v4832_v11 }
 0x6c1   : > { %7871 = vmatmul.mubr.msk.f32.gmra.mrb[200].mxu1 %vm4850_vm10, %v4833_v24  ;;  %v4835_v30 = vmax.f32 %v10802_v37, 0.0 }
 0x6c2   : > { %v4834_v29 = vmax.f32 %v10804_v17, 0.0  ;;  %v7832_v8 = vpop.f32.mrb[178].mxu0 }
 0x6c3   : > { %v10814_v35 = vadd.f32 %v7832_v8, %v4740_v46  ;;  %v4537_v42 = vpop.f32.mrb[179].mxu0 }
 0x6c4   : > { %v10816_v4 = vadd.f32 %v4735_v12, %v4537_v42  ;;  %7873 = vmatprep.mubr.msk.f32.mxu1 %vm4850_vm10, %v4834_v29 }
 0x6c5   : > { %7874 = vmatmul.mubr.msk.f32.gmra.mrb[202].mxu1 %vm4850_vm10, %v4835_v30  ;;  %v4837_v23 = vmax.f32 %v10814_v35, 0.0 }
 0x6c6   : > { %v4836_v3 = vmax.f32 %v10816_v4, 0.0  ;;  %v7835_v28 = vpop.f32.mrb[180].mxu0 }
 0x6c7   : > { %v10826_v40 = vadd.f32 %v7835_v28, %v4750_v18  ;;  %v4547_v47 = vpop.f32.mrb[181].mxu0  ;;  %v4775_v18 = vpop.permute.xlu0 %4774 }
 0x6c8   : > { %v10828_v62 = vadd.f32 %v4745_v25, %v4547_v47  ;;  %7876 = vmatprep.mubr.msk.f32.mxu1 %vm4850_vm10, %v4836_v3 }
 0x6c9   : > { %7877 = vmatmul.mubr.msk.f32.gmra.mrb[204].mxu1 %vm4850_vm10, %v4837_v23  ;;  %v4839_v57 = vmax.f32 %v10826_v40, 0.0 }
 0x6ca   : > { %v4838_v20 = vmax.f32 %v10828_v62, 0.0  ;;  %v7838_v1 = vpop.f32.mrb[182].mxu0 }
 0x6cb   : > { %v4813_v61 = vadd.f32 %v7838_v1, %v4760_v31  ;;  %v4557_v2 = vpop.f32.mrb[183].mxu0  ;;  %v4785_v47 = vpop.permute.xlu0 %4784 }
 0x6cc   : > { %v4812_v14 = vadd.f32 %v4755_v6, %v4557_v2  ;;  %7879 = vmatprep.mubr.msk.f32.mxu1 %vm4850_vm10, %v4838_v20  ;;  %v4790_v6 = vpop.permute.xlu1 %4789 }
 0x6cd   : > { %7880 = vmatmul.mubr.msk.f32.gmra.mrb[206].mxu1 %vm4850_vm10, %v4839_v57  ;;  %v4841_v58 = vmax.f32 %v4813_v61, 0.0 }
 0x6ce   : > { %v4840_v60 = vmax.f32 %v4812_v14, 0.0  ;;  %v7841_v7 = vpop.f32.mrb[184].mxu0 }
 0x6cf   : > { %v4815_v46 = vadd.f32 %v7841_v7, %v4770_v48  ;;  %v4567_v12 = vpop.f32.mrb[185].mxu0 }
 0x6d0   : > { %v4814_v32 = vadd.f32 %v4765_v19, %v4567_v12  ;;  %7882 = vmatprep.mubr.msk.f32.mxu1 %vm4850_vm10, %v4840_v60 }
 0x6d1   : > { %7883 = vmatmul.mubr.msk.f32.gmra.mrb[208].mxu1 %vm4850_vm10, %v4841_v58  ;;  %v4843_v27 = vmax.f32 %v4815_v46, 0.0 }
 0x6d2   : > { %v4842_v56 = vmax.f32 %v4814_v32, 0.0  ;;  %v7844_v25 = vpop.f32.mrb[186].mxu0 }
 0x6d3   : > { %v4817_v8 = vadd.f32 %v7844_v25, %v4780_v13  ;;  %v4577_v42 = vpop.f32.mrb[187].mxu0 }
 0x6d4   : > { %v4816_v31 = vadd.f32 %v4775_v18, %v4577_v42  ;;  %7885 = vmatprep.mubr.msk.f32.mxu1 %vm4850_vm10, %v4842_v56 }
 0x6d5   : > { %7886 = vmatmul.mubr.msk.f32.gmra.mrb[210].mxu1 %vm4850_vm10, %v4843_v27  ;;  %v4845_v62 = vmax.f32 %v4817_v8, 0.0 }
 0x6d6   : > { %v4844_v28 = vmax.f32 %v4816_v31, 0.0  ;;  %v7847_v40 = vpop.f32.mrb[188].mxu0 }
 0x6d7   : > { %v4819_v48 = vadd.f32 %v7847_v40, %v4790_v6  ;;  %v4587_v1 = vpop.f32.mrb[189].mxu0 }
 0x6d8   : > { %v4818_v19 = vadd.f32 %v4785_v47, %v4587_v1  ;;  %7888 = vmatprep.mubr.msk.f32.mxu1 %vm4850_vm10, %v4844_v28 }
 0x6d9   : > { %7889 = vmatmul.mubr.msk.f32.gmra.mrb[212].mxu1 %vm4850_vm10, %v4845_v62  ;;  %v4847_v2 = vmax.f32 %v4819_v48, 0.0 }
 0x6da   : > { %v4846_v61 = vmax.f32 %v4818_v19, 0.0 }
 0x6dc   : > { %7891 = vmatprep.mubr.msk.f32.mxu1 %vm4850_vm10, %v4846_v61 }
 0x6dd   : > { %7892 = vmatmul.mubr.msk.f32.gmra.mrb[214].mxu1 %vm4850_vm10, %v4847_v2 }
 0x6de   : > { %7898 = vmatprep.mubr.msk.f32.mxu1 %vm4850_vm10, %v4820_v34 }
 0x6e1   : > { %7899 = vmatmul.mubr.msk.f32.vlgmr.msra.gmra.mrb[216].mxu1 %vm4850_vm10, %v4821_v45 }
 0x6e2   : > { %7901 = vmatprep.mubr.msk.f32.mxu1 %vm4850_vm10, %v4822_v49 }
 0x6e5   : > { %7902 = vmatmul.mubr.msk.f32.gmra.mrb[218].mxu1 %vm4850_vm10, %v4823_v44 }
 0x6e6   : > { %7904 = vmatprep.mubr.msk.f32.mxu1 %vm4850_vm10, %v4824_v54 }
 0x6e9   : > { %7905 = vmatmul.mubr.msk.f32.gmra.mrb[220].mxu1 %vm4850_vm10, %v4825_v53 }
 0x6ea   : > { %7907 = vmatprep.mubr.msk.f32.mxu1 %vm4850_vm10, %v4826_v33 }
 0x6ed   : > { %7908 = vmatmul.mubr.msk.f32.gmra.mrb[222].mxu1 %vm4850_vm10, %v4827_v39 }
 0x6ee   : > { %7910 = vmatprep.mubr.msk.f32.mxu1 %vm4850_vm10, %v4828_v5 }
 0x6f1   : > { %7911 = vmatmul.mubr.msk.f32.gmra.mrb[224].mxu1 %vm4850_vm10, %v4829_v59 }
 0x6f2   : > { %7913 = vmatprep.mubr.msk.f32.mxu1 %vm4850_vm10, %v4830_v15 }
 0x6f5   : > { %7914 = vmatmul.mubr.msk.f32.gmra.mrb[226].mxu1 %vm4850_vm10, %v4831_v51 }
 0x6f6   : > { %7916 = vmatprep.mubr.msk.f32.mxu1 %vm4850_vm10, %v4832_v11 }
 0x6f9   : > { %7917 = vmatmul.mubr.msk.f32.gmra.mrb[228].mxu1 %vm4850_vm10, %v4833_v24 }
 0x6fa   : > { %7919 = vmatprep.mubr.msk.f32.mxu1 %vm4850_vm10, %v4834_v29 }
 0x6fd   : > { %7920 = vmatmul.mubr.msk.f32.gmra.mrb[230].mxu1 %vm4850_vm10, %v4835_v30 }
 0x6fe   : > { %7922 = vmatprep.mubr.msk.f32.mxu1 %vm4850_vm10, %v4836_v3 }
 0x701   : > { %7923 = vmatmul.mubr.msk.f32.gmra.mrb[232].mxu1 %vm4850_vm10, %v4837_v23 }
 0x702   : > { %7925 = vmatprep.mubr.msk.f32.mxu1 %vm4850_vm10, %v4838_v20 }
 0x705   : > { %7926 = vmatmul.mubr.msk.f32.gmra.mrb[234].mxu1 %vm4850_vm10, %v4839_v57 }
 0x706   : > { %7928 = vmatprep.mubr.msk.f32.mxu1 %vm4850_vm10, %v4840_v60 }
 0x709   : > { %7929 = vmatmul.mubr.msk.f32.gmra.mrb[236].mxu1 %vm4850_vm10, %v4841_v58 }
 0x70a   : > { %7931 = vmatprep.mubr.msk.f32.mxu1 %vm4850_vm10, %v4842_v56 }
 0x70d   : > { %7932 = vmatmul.mubr.msk.f32.gmra.mrb[238].mxu1 %vm4850_vm10, %v4843_v27 }
 0x70e   : > { %7934 = vmatprep.mubr.msk.f32.mxu1 %vm4850_vm10, %v4844_v28 }
 0x711   : > { %7935 = vmatmul.mubr.msk.f32.gmra.mrb[240].mxu1 %vm4850_vm10, %v4845_v62 }
 0x712   : > { %7937 = vmatprep.mubr.msk.f32.mxu1 %vm4850_vm10, %v4846_v61 }
 0x715   : > { %7938 = vmatmul.mubr.msk.f32.gmra.mrb[242].mxu1 %vm4850_vm10, %v4847_v2 }
 0x716   : > { %6497 = vmatprep.mubr.msk.f32.mxu1 %vm5411_vm11, %v5384_v38 }
 0x77c   : > { %v7854_v36 = vpop.f32.mrb[188].mxu1 }
 0x77d   : > { %v5005_v34 = vpop.f32.mrb[189].mxu1 }
 0x780   : > { %v7857_v45 = vpop.f32.mrb[190].mxu1 }
 0x781   : > { %v5015_v52 = vpop.f32.mrb[191].mxu1 }
 0x784   : > { %v7860_v26 = vpop.f32.mrb[192].mxu1 }
 0x785   : > { %v5025_v49 = vpop.f32.mrb[193].mxu1 }
 0x788   : > { %v7863_v44 = vpop.f32.mrb[194].mxu1 }
 0x789   : > { %v5035_v10 = vpop.f32.mrb[195].mxu1 }
 0x78c   : > { %v7866_v41 = vpop.f32.mrb[196].mxu1 }
 0x78d   : > { %v5045_v54 = vpop.f32.mrb[197].mxu1 }
 0x790   : > { %v7869_v53 = vpop.f32.mrb[198].mxu1 }
 0x791   : > { %v5055_v55 = vpop.f32.mrb[199].mxu1 }
 0x794   : > { %v10916_v43 = vpop.f32.mrb[200].mxu1 }
 0x795   : > { %v5065_v33 = vpop.f32.mrb[201].mxu1 }
 0x798   : > { %v10918_v39 = vpop.f32.mrb[202].mxu1 }
 0x799   : > { %v10920_v50 = vpop.f32.mrb[203].mxu1 }
 0x79c   : > { %v10922_v63 = vpop.f32.mrb[204].mxu1 }
 0x79d   : > { %v10924_v5 = vpop.f32.mrb[205].mxu1 }
 0x7a0   : > { %v10926_v59 = vpop.f32.mrb[206].mxu1 }
 0x7a1   : > { %v10928_v9 = vpop.f32.mrb[207].mxu1 }
 0x7a4   : > { %v10930_v16 = vpop.f32.mrb[208].mxu1 }
 0x7a5   : > { %v10932_v15 = vpop.f32.mrb[209].mxu1 }
 0x7a8   : > { %v10934_v51 = vpop.f32.mrb[210].mxu1 }
 0x7a9   : > { %v10936_v21 = vpop.f32.mrb[211].mxu1 }
 0x7ac   : > { %v10938_v22 = vpop.f32.mrb[212].mxu1 }
 0x7ad   : > { %v10940_v11 = vpop.f32.mrb[213].mxu1 }
 0x7b0   : > { %v10942_v24 = vpop.f32.mrb[214].mxu1 }
 0x7b1   : > { %v10944_v37 = vpop.f32.mrb[215].mxu1 }
 0x7b4   : > { %v7900_v17 = vpop.f32.mrb[216].mxu1 }
 0x7b5   : > { %v5356_v29 = vmax.f32 %v7854_v36, %v7900_v17  ;;  %v5216_v30 = vpop.f32.mrb[217].mxu1 }
 0x7b6   : > { %v5355_v35 = vmax.f32 %v5005_v34, %v5216_v30 }
 0x7b8   : > { %v10946_v4 = vpack.c.bf16 %v5356_v29, %v5355_v35  ;;  %v7903_v3 = vpop.f32.mrb[218].mxu1 }
 0x7b9   : > { %v5358_v23 = vmax.f32 %v7857_v45, %v7903_v3  ;;  %v5226_v20 = vpop.f32.mrb[219].mxu1 }
 0x7ba   : > { %v5357_v57 = vmax.f32 %v5015_v52, %v5226_v20  ;;  %8208 = vmatpush1.bf16.msra.mxu1 %v10946_v4 }
 0x7bb   : > { %8209 = vmatprep.subr.bf16.mxu1 %v8614_v0 }
 0x7bc   : > { %v10950_v14 = vpack.c.bf16 %v5358_v23, %v5357_v57  ;;  %v7906_v60 = vpop.f32.mrb[220].mxu1 }
 0x7bd   : > { %v5360_v7 = vmax.f32 %v7860_v26, %v7906_v60  ;;  %v5236_v58 = vpop.f32.mrb[221].mxu1 }
 0x7be   : > { %v5359_v46 = vmax.f32 %v5025_v49, %v5236_v58  ;;  %8211 = vmatpush1.bf16.msra.mxu1 %v10950_v14  ;;  %v5388_v58 = vld [vmem:[%s11281_s8 + $0x28] sm:$0xff] }
 0x7bf   : > { %8212 = vmatprep.subr.bf16.mxu1 %v8614_v0 }
 0x7c0   : > { %v10954_v12 = vpack.c.bf16 %v5360_v7, %v5359_v46  ;;  %v7909_v13 = vpop.f32.mrb[222].mxu1  ;;  %v5390_v46 = vld [vmem:[%s11281_s8 + $0x38] sm:$0xff] }
 0x7c1   : > { %v5362_v32 = vmax.f32 %v7863_v44, %v7909_v13  ;;  %v5246_v18 = vpop.f32.mrb[223].mxu1  ;;  %v5392_v13 = vld [vmem:[%s11281_s8 + $0x48] sm:$0xff] }
 0x7c2   : > { %v5361_v56 = vmax.f32 %v5035_v10, %v5246_v18  ;;  %8214 = vmatpush1.bf16.msra.mxu1 %v10954_v12  ;;  %v5393_v18 = vld [vmem:[%s11281_s8 + $0x50] sm:$0xff] }
 0x7c3   : > { %8215 = vmatprep.subr.bf16.mxu1 %v8614_v0 }
 0x7c4   : > { %v10958_v25 = vpack.c.bf16 %v5362_v32, %v5361_v56  ;;  %v7912_v27 = vpop.f32.mrb[224].mxu1  ;;  %v5394_v32 = vld [vmem:[%s11281_s8 + $0x58] sm:$0xff]  ;;  %v5396_v56 = vld [vmem:[%s11281_s8 + $0x68] sm:$0xff] }
 0x7c5   : > { %v5364_v8 = vmax.f32 %v7866_v41, %v7912_v27  ;;  %v5256_v42 = vpop.f32.mrb[225].mxu1  ;;  %v5398_v27 = vld [vmem:[%s11281_s8 + $0x78] sm:$0xff] }
 0x7c6   : > { %v5363_v31 = vmax.f32 %v5045_v54, %v5256_v42  ;;  %8217 = vmatpush1.bf16.msra.mxu1 %v10958_v25  ;;  %v5400_v42 = vld [vmem:[%s11281_s8 + $0x88] sm:$0xff] }
 0x7c7   : > { %8218 = vmatprep.subr.bf16.mxu1 %v8614_v0 }
 0x7c8   : > { %v10962_v6 = vpack.c.bf16 %v5364_v8, %v5363_v31  ;;  %v7915_v28 = vpop.f32.mrb[226].mxu1  ;;  %v5397_v8 = vld [vmem:[%s11281_s8 + $0x70] sm:$0xff]  ;;  %v5399_v31 = vld [vmem:[%s11281_s8 + $0x80] sm:$0xff] }
 0x7c9   : > { %v5366_v40 = vmax.f32 %v7869_v53, %v7915_v28  ;;  %v5266_v47 = vpop.f32.mrb[227].mxu1  ;;  %v5401_v28 = vld [vmem:[%s11281_s8 + $0x90] sm:$0xff] }
 0x7ca   : > { %v5365_v62 = vmax.f32 %v5055_v55, %v5266_v47  ;;  %8220 = vmatpush1.bf16.msra.mxu1 %v10962_v6  ;;  %v5403_v47 = vld [vmem:[%s11281_s8 + $0xa0] sm:$0xff] }
 0x7cb   : > { %8221 = vmatprep.subr.bf16.mxu1 %v8614_v0 }
 0x7cc   : > { %v10966_v48 = vpack.c.bf16 %v5366_v40, %v5365_v62  ;;  %v7918_v1 = vpop.f32.mrb[228].mxu1  ;;  %v5404_v40 = vld [vmem:[%s11281_s8 + $0xa8] sm:$0xff]  ;;  %v5406_v62 = vld [vmem:[%s11281_s8 + $0xb8] sm:$0xff] }
 0x7cd   : > { %v5368_v19 = vmax.f32 %v10916_v43, %v7918_v1  ;;  %v5276_v61 = vpop.f32.mrb[229].mxu1  ;;  %v5408_v1 = vld [vmem:[%s11281_s8 + $0xc8] sm:$0xff] }
 0x7ce   : > { %v5367_v2 = vmax.f32 %v5065_v33, %v5276_v61  ;;  %8223 = vmatpush1.bf16.msra.mxu1 %v10966_v48  ;;  %v5410_v61 = vld [vmem:[%s11281_s8 + $0xd8] sm:$0xff] }
 0x7cf   : > { %8224 = vmatprep.subr.bf16.mxu1 %v8614_v0 }
 0x7d0   : > { %v10971_v38 = vpack.c.bf16 %v5368_v19, %v5367_v2  ;;  %v7921_v36 = vpop.f32.mrb[230].mxu1  ;;  %v5407_v19 = vld [vmem:[%s11281_s8 + $0xc0] sm:$0xff]  ;;  %v5409_v2 = vld [vmem:[%s11281_s8 + $0xd0] sm:$0xff] }
 0x7d1   : > { %v5370_v34 = vmax.f32 %v10918_v39, %v7921_v36  ;;  %v5286_v45 = vpop.f32.mrb[231].mxu1  ;;  %v6511_v36 = vld [vmem:[%s11281_s8 + $0xe0] sm:$0xff] }
 0x7d2   : > { %v5369_v52 = vmax.f32 %v10920_v50, %v5286_v45  ;;  %8226 = vmatpush1.bf16.msra.mxu1 %v10971_v38  ;;  %v6516_v45 = vld [vmem:[%s11281_s8 + $0x108] sm:$0xff] }
 0x7d3   : > { %8227 = vmatprep.subr.bf16.mxu1 %v8614_v0 }
 0x7d4   : > { %v10977_v26 = vpack.c.bf16 %v5370_v34, %v5369_v52  ;;  %v7924_v49 = vpop.f32.mrb[232].mxu1  ;;  %v6514_v34 = vld [vmem:[%s11281_s8 + $0xf8] sm:$0xff]  ;;  %v6515_v52 = vld [vmem:[%s11281_s8 + $0x100] sm:$0xff] }
 0x7d5   : > { %v5372_v44 = vmax.f32 %v10922_v63, %v7924_v49  ;;  %v5296_v10 = vpop.f32.mrb[233].mxu1  ;;  %v6517_v49 = vld [vmem:[%s11281_s8 + $0x110] sm:$0xff] }
 0x7d6   : > { %v5371_v41 = vmax.f32 %v10924_v5, %v5296_v10  ;;  %8229 = vmatpush1.bf16.msra.mxu1 %v10977_v26  ;;  %v6519_v10 = vld [vmem:[%s11281_s8 + $0x120] sm:$0xff] }
 0x7d7   : > { %8230 = vmatprep.subr.bf16.mxu1 %v8614_v0 }
 0x7d8   : > { %v10983_v54 = vpack.c.bf16 %v5372_v44, %v5371_v41  ;;  %v7927_v53 = vpop.f32.mrb[234].mxu1  ;;  %v6520_v44 = vld [vmem:[%s11281_s8 + $0x128] sm:$0xff]  ;;  %v6522_v41 = vld [vmem:[%s11281_s8 + $0x138] sm:$0xff] }
 0x7d9   : > { %v5374_v55 = vmax.f32 %v10926_v59, %v7927_v53  ;;  %v5306_v43 = vpop.f32.mrb[235].mxu1  ;;  %v6524_v53 = vld [vmem:[%s11281_s8 + $0x148] sm:$0xff] }
 0x7da   : > { %v5373_v33 = vmax.f32 %v10928_v9, %v5306_v43  ;;  %8232 = vmatpush1.bf16.msra.mxu1 %v10983_v54  ;;  %v6526_v43 = vld [vmem:[%s11281_s8 + $0x158] sm:$0xff] }
 0x7db   : > { %8233 = vmatprep.subr.bf16.mxu1 %v8614_v0 }
 0x7dc   : > { %v10989_v39 = vpack.c.bf16 %v5374_v55, %v5373_v33  ;;  %v7930_v50 = vpop.f32.mrb[236].mxu1  ;;  %v6523_v55 = vld [vmem:[%s11281_s8 + $0x140] sm:$0xff]  ;;  %v6525_v33 = vld [vmem:[%s11281_s8 + $0x150] sm:$0xff] }
 0x7dd   : > { %v5376_v63 = vmax.f32 %v10930_v16, %v7930_v50  ;;  %v5316_v5 = vpop.f32.mrb[237].mxu1  ;;  %v6527_v50 = vld [vmem:[%s11281_s8 + $0x160] sm:$0xff] }
 0x7de   : > { %v5375_v17 = vmax.f32 %v10932_v15, %v5316_v5  ;;  %8235 = vmatpush1.bf16.msra.mxu1 %v10989_v39  ;;  %v6529_v5 = vld [vmem:[%s11281_s8 + $0x170] sm:$0xff] }
 0x7df   : > { %8236 = vmatprep.subr.bf16.mxu1 %v8614_v0 }
 0x7e0   : > { %v10995_v59 = vpack.c.bf16 %v5376_v63, %v5375_v17  ;;  %v7933_v29 = vpop.f32.mrb[238].mxu1  ;;  %v6530_v63 = vld [vmem:[%s11281_s8 + $0x178] sm:$0xff]  ;;  %v6532_v17 = vld [vmem:[%s11281_s8 + $0x188] sm:$0xff] }
 0x7e1   : > { %v5378_v9 = vmax.f32 %v10934_v51, %v7933_v29  ;;  %v5326_v30 = vpop.f32.mrb[239].mxu1  ;;  %v6534_v29 = vld [vmem:[%s11281_s8 + $0x198] sm:$0xff] }
 0x7e2   : > { %v5377_v35 = vmax.f32 %v10936_v21, %v5326_v30  ;;  %8238 = vmatpush1.bf16.msra.mxu1 %v10995_v59  ;;  %v6536_v30 = vld [vmem:[%s11281_s8 + $0x1a8] sm:$0xff] }
 0x7e3   : > { %8239 = vmatprep.subr.bf16.mxu1 %v8614_v0 }
 0x7e4   : > { %v11001_v16 = vpack.c.bf16 %v5378_v9, %v5377_v35  ;;  %v7936_v3 = vpop.f32.mrb[240].mxu1  ;;  %v6533_v9 = vld [vmem:[%s11281_s8 + $0x190] sm:$0xff]  ;;  %v6535_v35 = vld [vmem:[%s11281_s8 + $0x1a0] sm:$0xff] }
 0x7e5   : > { %v5380_v15 = vmax.f32 %v10938_v22, %v7936_v3  ;;  %v5336_v23 = vpop.f32.mrb[241].mxu1  ;;  %v6537_v3 = vld [vmem:[%s11281_s8 + $0x1b0] sm:$0xff] }
 0x7e6   : > { %v5379_v20 = vmax.f32 %v10940_v11, %v5336_v23  ;;  %8241 = vmatpush1.bf16.msra.mxu1 %v11001_v16  ;;  %v5383_v11 = vld [vmem:[%s11281_s8] sm:$0xff] }
 0x7e7   : > { %8242 = vmatprep.subr.bf16.mxu1 %v8614_v0 }
 0x7e8   : > { %v11007_v51 = vpack.c.bf16 %v5380_v15, %v5379_v20  ;;  %v7939_v57 = vpop.f32.mrb[242].mxu1 }
 0x7e9   : > { %v5382_v21 = vmax.f32 %v10942_v24, %v7939_v57  ;;  %v5346_v60 = vpop.f32.mrb[243].mxu1  ;;  %v5386_v24 = vld [vmem:[%s11281_s8 + $0x18] sm:$0xff] }
 0x7ea   : > { %v5381_v7 = vmax.f32 %v10944_v37, %v5346_v60  ;;  %8244 = vmatpush1.bf16.msra.mxu1 %v11007_v51  ;;  %v5385_v37 = vld [vmem:[%s11281_s8 + $0x10] sm:$0xff] }
 0x7eb   : > { %8245 = vmatprep.subr.bf16.mxu1 %v8614_v0 }
 0x7ec   : > { %v11013_v22 = vpack.c.bf16 %v5382_v21, %v5381_v7 }
 0x7ee   : > { %8247 = vmatpush1.bf16.msra.mxu1 %v11013_v22 }
 0x7ef   : > { %8248 = vmatprep.subr.bf16.mxu1 %v8614_v0 }
 0x7f1   : > { %5519 = vmatmul.mubr.f32.vlgmr.msra.gmra.mrb[244].mxu1 %v5383_v11 }
 0x7f2   : > { %8250 = vmatpush1.bf16.msra.mxu1 %v10946_v4  ;;  %6498 = vmatprep.mubr.msk.f32.mxu1 %vm5411_vm11, %v5386_v24  ;;  %v5387_v4 = vld [vmem:[%s11281_s8 + $0x20] sm:$0xff] }
 0x7f3   : > { %8251 = vmatprep.subr.bf16.mxu1 %v8614_v0 }
 0x7f5   : > { %5524 = vmatmul.mubr.f32.gmra.mrb[246].mxu1 %v5385_v37 }
 0x7f6   : > { %8253 = vmatpush1.bf16.msra.mxu1 %v10950_v14  ;;  %6499 = vmatprep.mubr.msk.f32.mxu1 %vm5411_vm11, %v5388_v58  ;;  %v5389_v14 = vld [vmem:[%s11281_s8 + $0x30] sm:$0xff] }
 0x7f7   : > { %8254 = vmatprep.subr.bf16.mxu1 %v8614_v0 }
 0x7f9   : > { %5529 = vmatmul.mubr.f32.gmra.mrb[248].mxu1 %v5387_v4 }
 0x7fa   : > { %8256 = vmatpush1.bf16.msra.mxu1 %v10954_v12  ;;  %6500 = vmatprep.mubr.msk.f32.mxu1 %vm5411_vm11, %v5390_v46  ;;  %v5391_v12 = vld [vmem:[%s11281_s8 + $0x40] sm:$0xff] }
 0x7fb   : > { %8257 = vmatprep.subr.bf16.mxu1 %v8614_v0 }
 0x7fd   : > { %5534 = vmatmul.mubr.f32.gmra.mrb[250].mxu1 %v5389_v14 }
 0x7fe   : > { %8259 = vmatpush1.bf16.msra.mxu1 %v10958_v25  ;;  %6501 = vmatprep.mubr.msk.f32.mxu1 %vm5411_vm11, %v5392_v13  ;;  %v5395_v25 = vld [vmem:[%s11281_s8 + $0x60] sm:$0xff] }
 0x7ff   : > { %8260 = vmatprep.subr.bf16.mxu1 %v8614_v0 }
 0x801   : > { %5539 = vmatmul.mubr.f32.gmra.mrb[252].mxu1 %v5391_v12 }
 0x802   : > { %8262 = vmatpush1.bf16.msra.mxu1 %v10962_v6  ;;  %6502 = vmatprep.mubr.msk.f32.mxu1 %vm5411_vm11, %v5394_v32  ;;  %v5402_v6 = vld [vmem:[%s11281_s8 + $0x98] sm:$0xff] }
 0x803   : > { %8263 = vmatprep.subr.bf16.mxu1 %v8614_v0 }
 0x805   : > { %5544 = vmatmul.mubr.f32.gmra.mrb[254].mxu1 %v5393_v18 }
 0x806   : > { %8265 = vmatpush1.bf16.msra.mxu1 %v10966_v48  ;;  %6503 = vmatprep.mubr.msk.f32.mxu1 %vm5411_vm11, %v5396_v56  ;;  %v5405_v48 = vld [vmem:[%s11281_s8 + $0xb0] sm:$0xff] }
 0x807   : > { %8266 = vmatprep.subr.bf16.mxu1 %v8614_v0 }
 0x809   : > { %5549 = vmatmul.mubr.f32.gmra.mrb[0].mxu1 %v5395_v25 }
 0x80a   : > { %8268 = vmatpush1.bf16.msra.mxu1 %v10971_v38  ;;  %6504 = vmatprep.mubr.msk.f32.mxu1 %vm5411_vm11, %v5398_v27  ;;  %v6512_v38 = vld [vmem:[%s11281_s8 + $0xe8] sm:$0xff] }
 0x80b   : > { %8269 = vmatprep.subr.bf16.mxu1 %v8614_v0 }
 0x80d   : > { %5554 = vmatmul.mubr.f32.gmra.mrb[2].mxu1 %v5397_v8 }
 0x80e   : > { %8271 = vmatpush1.bf16.msra.mxu1 %v10977_v26  ;;  %6505 = vmatprep.mubr.msk.f32.mxu1 %vm5411_vm11, %v5400_v42  ;;  %v6518_v26 = vld [vmem:[%s11281_s8 + $0x118] sm:$0xff] }
 0x80f   : > { %8272 = vmatprep.subr.bf16.mxu1 %v8614_v0 }
 0x811   : > { %5559 = vmatmul.mubr.f32.gmra.mrb[4].mxu1 %v5399_v31 }
 0x812   : > { %8274 = vmatpush1.bf16.msra.mxu1 %v10983_v54  ;;  %6506 = vmatprep.mubr.msk.f32.mxu1 %vm5411_vm11, %v5402_v6  ;;  %v6521_v54 = vld [vmem:[%s11281_s8 + $0x130] sm:$0xff] }
 0x813   : > { %8275 = vmatprep.subr.bf16.mxu1 %v8614_v0 }
 0x815   : > { %5564 = vmatmul.mubr.f32.gmra.mrb[6].mxu1 %v5401_v28 }
 0x816   : > { %8277 = vmatpush1.bf16.msra.mxu1 %v10989_v39  ;;  %6507 = vmatprep.mubr.msk.f32.mxu1 %vm5411_vm11, %v5404_v40  ;;  %v6528_v39 = vld [vmem:[%s11281_s8 + $0x168] sm:$0xff] }
 0x817   : > { %8278 = vmatprep.subr.bf16.mxu1 %v8614_v0 }
 0x819   : > { %5569 = vmatmul.mubr.f32.gmra.mrb[8].mxu1 %v5403_v47 }
 0x81a   : > { %8280 = vmatpush1.bf16.msra.mxu1 %v10995_v59  ;;  %6508 = vmatprep.mubr.msk.f32.mxu1 %vm5411_vm11, %v5406_v62  ;;  %v6531_v59 = vld [vmem:[%s11281_s8 + $0x180] sm:$0xff] }
 0x81b   : > { %8281 = vmatprep.subr.bf16.mxu1 %v8614_v0 }
 0x81d   : > { %5574 = vmatmul.mubr.f32.gmra.mrb[10].mxu1 %v5405_v48 }
 0x81e   : > { %8283 = vmatpush1.bf16.msra.mxu1 %v11001_v16  ;;  %6509 = vmatprep.mubr.msk.f32.mxu1 %vm5411_vm11, %v5408_v1  ;;  %v6538_v16 = vld [vmem:[%s11281_s8 + $0x1b8] sm:$0xff] }
 0x81f   : > { %8284 = vmatprep.subr.bf16.mxu1 %v8614_v0 }
 0x821   : > { %5579 = vmatmul.mubr.f32.gmra.mrb[12].mxu1 %v5407_v19 }
 0x822   : > { %8286 = vmatpush1.bf16.msra.mxu1 %v11007_v51  ;;  %6510 = vmatprep.mubr.msk.f32.mxu1 %vm5411_vm11, %v5410_v61 }
 0x823   : > { %8287 = vmatprep.subr.bf16.mxu1 %v8614_v0  ;;  %v6513_v0 = vld [vmem:[%s11281_s8 + $0xf0] sm:$0xff] }
 0x825   : > { %5584 = vmatmul.mubr.f32.gmra.mrb[14].mxu1 %v5409_v2 }
 0x826   : > { %8289 = vmatpush1.bf16.msra.mxu1 %v11013_v22  ;;  %6539 = vmatprep.mubr.msk.f32.mxu1 %vm5411_vm11, %v6512_v38 }
 0x829   : > { %5725 = vmatmul.mubr.f32.vlgmr.msra.gmra.mrb[16].mxu1 %v6511_v36 }
 0x82a   : > { %6540 = vmatprep.mubr.msk.f32.mxu1 %vm5411_vm11, %v6514_v34 }
 0x82d   : > { %5730 = vmatmul.mubr.f32.gmra.mrb[18].mxu1 %v6513_v0 }
 0x82e   : > { %6541 = vmatprep.mubr.msk.f32.mxu1 %vm5411_vm11, %v6516_v45 }
 0x831   : > { %5735 = vmatmul.mubr.f32.gmra.mrb[20].mxu1 %v6515_v52 }
 0x832   : > { %6542 = vmatprep.mubr.msk.f32.mxu1 %vm5411_vm11, %v6518_v26 }
 0x835   : > { %5740 = vmatmul.mubr.f32.gmra.mrb[22].mxu1 %v6517_v49 }
 0x836   : > { %6543 = vmatprep.mubr.msk.f32.mxu1 %vm5411_vm11, %v6520_v44 }
 0x839   : > { %5745 = vmatmul.mubr.f32.gmra.mrb[24].mxu1 %v6519_v10 }
 0x83a   : > { %6544 = vmatprep.mubr.msk.f32.mxu1 %vm5411_vm11, %v6522_v41 }
 0x83d   : > { %5750 = vmatmul.mubr.f32.gmra.mrb[26].mxu1 %v6521_v54 }
 0x83e   : > { %6545 = vmatprep.mubr.msk.f32.mxu1 %vm5411_vm11, %v6524_v53 }
 0x841   : > { %5755 = vmatmul.mubr.f32.gmra.mrb[28].mxu1 %v6523_v55 }
 0x842   : > { %6546 = vmatprep.mubr.msk.f32.mxu1 %vm5411_vm11, %v6526_v43 }
 0x845   : > { %5760 = vmatmul.mubr.f32.gmra.mrb[30].mxu1 %v6525_v33 }
 0x846   : > { %6547 = vmatprep.mubr.msk.f32.mxu1 %vm5411_vm11, %v6528_v39 }
 0x849   : > { %5765 = vmatmul.mubr.f32.gmra.mrb[32].mxu1 %v6527_v50 }
 0x84a   : > { %6548 = vmatprep.mubr.msk.f32.mxu1 %vm5411_vm11, %v6530_v63 }
 0x84d   : > { %5770 = vmatmul.mubr.f32.gmra.mrb[34].mxu1 %v6529_v5 }
 0x84e   : > { %6549 = vmatprep.mubr.msk.f32.mxu1 %vm5411_vm11, %v6532_v17 }
 0x851   : > { %5775 = vmatmul.mubr.f32.gmra.mrb[36].mxu1 %v6531_v59 }
 0x852   : > { %6550 = vmatprep.mubr.msk.f32.mxu1 %vm5411_vm11, %v6534_v29 }
 0x855   : > { %5780 = vmatmul.mubr.f32.gmra.mrb[38].mxu1 %v6533_v9 }
 0x856   : > { %6551 = vmatprep.mubr.msk.f32.mxu1 %vm5411_vm11, %v6536_v30 }
 0x859   : > { %5785 = vmatmul.mubr.f32.gmra.mrb[40].mxu1 %v6535_v35 }
 0x85a   : > { %6552 = vmatprep.mubr.msk.f32.mxu1 %vm5411_vm11, %v6538_v16 }
 0x85d   : > { %5790 = vmatmul.mubr.f32.gmra.mrb[42].mxu1 %v6537_v3 }
 0x8c4   : > { %v5520_v15 = vpop.f32.mrb[244].mxu1 }
 0x8c5   : > { %v5522_v23 = vpop.f32.mrb[245].mxu1 }
 0x8c8   : > { %v5525_v20 = vpop.f32.mrb[246].mxu1 }
 0x8c9   : > { %v5527_v51 = vpop.f32.mrb[247].mxu1 }
 0x8cc   : > { %v5530_v57 = vpop.f32.mrb[248].mxu1 }
 0x8cd   : > { %v5532_v21 = vpop.f32.mrb[249].mxu1 }
 0x8d0   : > { %v5535_v60 = vpop.f32.mrb[250].mxu1 }
 0x8d1   : > { %v5537_v7 = vpop.f32.mrb[251].mxu1 }
 0x8d4   : > { %v5540_v22 = vpop.f32.mrb[252].mxu1 }
 0x8d5   : > { %v5542_v11 = vpop.f32.mrb[253].mxu1 }
 0x8d8   : > { %v5545_v24 = vpop.f32.mrb[254].mxu1 }
 0x8d9   : > { %v5547_v37 = vpop.f32.mrb[255].mxu1 }
 0x8dc   : > { %v5550_v58 = vpop.f32.mrb[0].mxu1 }
 0x8dd   : > { %v5552_v4 = vpop.f32.mrb[1].mxu1 }
 0x8e0   : > { %v5555_v46 = vpop.f32.mrb[2].mxu1 }
 0x8e1   : > { %v5557_v14 = vpop.f32.mrb[3].mxu1 }
 0x8e4   : > { %v5560_v13 = vpop.f32.mrb[4].mxu1 }
 0x8e5   : > { %v5562_v12 = vpop.f32.mrb[5].mxu1 }
 0x8e8   : > { %v5565_v32 = vpop.f32.mrb[6].mxu1 }
 0x8e9   : > { %v5567_v18 = vpop.f32.mrb[7].mxu1 }
 0x8ec   : > { %v5570_v56 = vpop.f32.mrb[8].mxu1 }
 0x8ed   : > { %v5572_v25 = vpop.f32.mrb[9].mxu1 }
 0x8f0   : > { %v5575_v27 = vpop.f32.mrb[10].mxu1 }
 0x8f1   : > { %v5577_v8 = vpop.f32.mrb[11].mxu1 }
 0x8f4   : > { %v5580_v42 = vpop.f32.mrb[12].mxu1 }
 0x8f5   : > { %v5582_v31 = vpop.f32.mrb[13].mxu1 }
 0x8f8   : > { %v5585_v6 = vpop.f32.mrb[14].mxu1 }
 0x8f9   : > { %v5587_v28 = vpop.f32.mrb[15].mxu1 }
 0x8fc   : > { %v5726_v40 = vpop.f32.mrb[16].mxu1 }
 0x8fd   : > { %v5795_v47 = vmax.f32 %v5520_v15, %v5726_v40  ;;  %v5728_v62 = vpop.f32.mrb[17].mxu1 }
 0x8ff   : > { %5810 = vst.msk [vmem:[%s11240_s16] sm:$0xff] %vm5809_vm12, %v5795_v47 }
 0x900   : > { %v5731_v48 = vpop.f32.mrb[18].mxu1 }
 0x901   : > { %v5796_v1 = vmax.f32 %v5525_v20, %v5731_v48  ;;  %v5733_v19 = vpop.f32.mrb[19].mxu1 }
 0x903   : > { %5811 = vst.msk [vmem:[%s11240_s16 + $0x8] sm:$0xff] %vm5809_vm12, %v5796_v1 }
 0x904   : > { %v5736_v61 = vpop.f32.mrb[20].mxu1 }
 0x905   : > { %v5797_v2 = vmax.f32 %v5530_v57, %v5736_v61  ;;  %v5738_v38 = vpop.f32.mrb[21].mxu1 }
 0x907   : > { %5812 = vst.msk [vmem:[%s11240_s16 + $0x10] sm:$0xff] %vm5809_vm12, %v5797_v2 }
 0x908   : > { %v5741_v36 = vpop.f32.mrb[22].mxu1 }
 0x909   : > { %v5798_v34 = vmax.f32 %v5535_v60, %v5741_v36  ;;  %v5743_v0 = vpop.f32.mrb[23].mxu1 }
 0x90b   : > { %5813 = vst.msk [vmem:[%s11240_s16 + $0x18] sm:$0xff] %vm5809_vm12, %v5798_v34 }
 0x90c   : > { %v5746_v45 = vpop.f32.mrb[24].mxu1 }
 0x90d   : > { %v5799_v52 = vmax.f32 %v5540_v22, %v5746_v45  ;;  %v5748_v26 = vpop.f32.mrb[25].mxu1 }
 0x90f   : > { %5814 = vst.msk [vmem:[%s11240_s16 + $0x20] sm:$0xff] %vm5809_vm12, %v5799_v52 }
 0x910   : > { %v5751_v49 = vpop.f32.mrb[26].mxu1 }
 0x911   : > { %v5800_v44 = vmax.f32 %v5545_v24, %v5751_v49  ;;  %v5753_v10 = vpop.f32.mrb[27].mxu1 }
 0x913   : > { %5815 = vst.msk [vmem:[%s11240_s16 + $0x28] sm:$0xff] %vm5809_vm12, %v5800_v44 }
 0x914   : > { %v5756_v41 = vpop.f32.mrb[28].mxu1 }
 0x915   : > { %v5801_v54 = vmax.f32 %v5550_v58, %v5756_v41  ;;  %v5758_v53 = vpop.f32.mrb[29].mxu1 }
 0x917   : > { %5816 = vst.msk [vmem:[%s11240_s16 + $0x30] sm:$0xff] %vm5809_vm12, %v5801_v54 }
 0x918   : > { %v5761_v55 = vpop.f32.mrb[30].mxu1 }
 0x919   : > { %v5802_v43 = vmax.f32 %v5555_v46, %v5761_v55  ;;  %v5763_v33 = vpop.f32.mrb[31].mxu1 }
 0x91b   : > { %5817 = vst.msk [vmem:[%s11240_s16 + $0x38] sm:$0xff] %vm5809_vm12, %v5802_v43 }
 0x91c   : > { %v5766_v39 = vpop.f32.mrb[32].mxu1 }
 0x91d   : > { %v5803_v50 = vmax.f32 %v5560_v13, %v5766_v39  ;;  %v5768_v63 = vpop.f32.mrb[33].mxu1 }
 0x91f   : > { %5818 = vst.msk [vmem:[%s11240_s16 + $0x40] sm:$0xff] %vm5809_vm12, %v5803_v50 }
 0x920   : > { %v5771_v5 = vpop.f32.mrb[34].mxu1 }
 0x921   : > { %v5804_v17 = vmax.f32 %v5565_v32, %v5771_v5  ;;  %v5773_v59 = vpop.f32.mrb[35].mxu1 }
 0x923   : > { %5819 = vst.msk [vmem:[%s11240_s16 + $0x48] sm:$0xff] %vm5809_vm12, %v5804_v17 }
 0x924   : > { %v5776_v29 = vpop.f32.mrb[36].mxu1 }
 0x925   : > { %v5805_v9 = vmax.f32 %v5570_v56, %v5776_v29  ;;  %v5778_v30 = vpop.f32.mrb[37].mxu1 }
 0x927   : > { %5820 = vst.msk [vmem:[%s11240_s16 + $0x50] sm:$0xff] %vm5809_vm12, %v5805_v9 }
 0x928   : > { %v5781_v35 = vpop.f32.mrb[38].mxu1 }
 0x929   : > { %v5806_v16 = vmax.f32 %v5575_v27, %v5781_v35  ;;  %v5783_v3 = vpop.f32.mrb[39].mxu1 }
 0x92b   : > { %5821 = vst.msk [vmem:[%s11240_s16 + $0x58] sm:$0xff] %vm5809_vm12, %v5806_v16 }
 0x92c   : > { %v5786_v15 = vpop.f32.mrb[40].mxu1 }
 0x92d   : > { %v5807_v23 = vmax.f32 %v5580_v42, %v5786_v15  ;;  %v5788_v20 = vpop.f32.mrb[41].mxu1 }
 0x92f   : > { %5822 = vst.msk [vmem:[%s11240_s16 + $0x60] sm:$0xff] %vm5809_vm12, %v5807_v23 }
 0x930   : > { %v5791_v51 = vpop.f32.mrb[42].mxu1 }
 0x931   : > { %v5808_v57 = vmax.f32 %v5585_v6, %v5791_v51  ;;  %v5793_v21 = vpop.f32.mrb[43].mxu1 }
 0x933   : > { %5823 = vst.msk [vmem:[%s11240_s16 + $0x68] sm:$0xff] %vm5809_vm12, %v5808_v57 }
 0x934 PF: > { %s19_s30 = sadd.s32 1, %s8612_s30  }
 0x935   : > { %p16_p4 = scmp.ge.s32.totalorder %s19_s30, 4  }
 0x937   :  { %18 = sbr.rel (!%p16_p4) target bundleno = 1 (0x1), region = 98 }

</bundles_post_ra>
